<compile_context>
chip_gen: v7x
topology: tpu7x:2x2x1
jax: 0.10.0
libtpu: 0.0.40
codegen_flags: <defaults>
</compile_context>

<pallas_src>
import math
import functools

import jax
import jax.numpy as jnp
from jax.experimental import pallas as pl
from jax.experimental.pallas import tpu as pltpu


# ---------------------------------------------------------------------------
# Attention inner variants (both operate on batch-major flattened rows).
# ---------------------------------------------------------------------------
def _attend_head_batched(q, k, v, B, T, Tk, nhead, hd, cdt, wo_ref, bo_ref):
    """Head-batched score / PV contractions: no per-head lane slices, no concat."""
    E = nhead * hd
    q4 = q.reshape(B, T, nhead, hd).astype(cdt)
    k4 = k.reshape(B, Tk, nhead, hd).astype(cdt)
    v4 = v.reshape(B, Tk, nhead, hd).astype(cdt)
    s = jnp.einsum("bqhd,bkhd->bhqk", q4, k4,
                   preferred_element_type=jnp.float32)            # (B, H, T, Tk)
    s = s - jnp.max(s, axis=-1, keepdims=True)
    p = jnp.exp(s)
    p = p * pl.reciprocal(jnp.sum(p, axis=-1, keepdims=True), approx=True)
    o = jnp.einsum("bhqk,bkhd->bqhd", p.astype(cdt), v4,
                   preferred_element_type=jnp.float32)            # (B, T, H, hd)
    attn = o.reshape(B * T, E)
    return jnp.dot(attn.astype(cdt), wo_ref[...],
                   preferred_element_type=jnp.float32) + bo_ref[...]


def _attend_head_loop(q, k, v, B, T, Tk, nhead, hd, cdt, wo_ref, bo_ref):
    """Per-head static unroll (previously-validated fallback path)."""
    E = nhead * hd
    q3 = q.reshape(B, T, E)
    k3 = k.reshape(B, Tk, E)
    v3 = v.reshape(B, Tk, E)
    heads = []
    for h in range(nhead):
        sl = slice(h * hd, (h + 1) * hd)
        s = jnp.einsum("bqd,bkd->bqk",
                       q3[..., sl].astype(cdt), k3[..., sl].astype(cdt),
                       preferred_element_type=jnp.float32)
        s = s - jnp.max(s, axis=-1, keepdims=True)
        p = jnp.exp(s)
        p = p * pl.reciprocal(jnp.sum(p, axis=-1, keepdims=True), approx=True)
        heads.append(jnp.einsum("bqk,bkd->bqd",
                                p.astype(cdt), v3[..., sl].astype(cdt),
                                preferred_element_type=jnp.float32))
    attn = jnp.concatenate(heads, axis=-1).reshape(B * T, E)
    return jnp.dot(attn.astype(cdt), wo_ref[...],
                   preferred_element_type=jnp.float32) + bo_ref[...]


# ---------------------------------------------------------------------------
# Pallas kernel: full decoder block for ONE batch block (B elements).
# ---------------------------------------------------------------------------
def _decoder_block_kernel(
    nhead, compute_dtype, time_major_io, head_batched,
    # inputs
    tgt_ref, mem_ref,
    sa_wqkv_ref, sa_bqkv_ref, sa_wo_ref, sa_bo_ref,
    ca_wq_ref, ca_bq_ref, ca_wkv_ref, ca_bkv_ref, ca_wo_ref, ca_bo_ref,
    w1t_ref, b1_ref, w2t_ref, b2_ref,
    g1_ref, be1_ref, g2_ref, be2_ref, g3_ref, be3_ref,
    # output
    out_ref,
):
    cdt = compute_dtype
    if time_major_io:
        # Blocks arrive in the PyTorch (T, B, E) / (S, B, E) layout; do the tiny
        # in-VMEM rearrangement here instead of wrapper-side HBM transpose passes.
        T, B, E = tgt_ref.shape
        S = mem_ref.shape[0]
        x3 = jnp.swapaxes(tgt_ref[...].astype(jnp.float32), 0, 1)     # (B, T, E)
        mem3 = jnp.swapaxes(mem_ref[...].astype(jnp.float32), 0, 1)   # (B, S, E)
    else:
        B, T, E = tgt_ref.shape
        S = mem_ref.shape[1]
        x3 = tgt_ref[...].astype(jnp.float32)
        mem3 = mem_ref[...].astype(jnp.float32)
    hd = E // nhead

    x = x3.reshape(B * T, E)
    mem = mem3.reshape(B * S, E)

    attend = _attend_head_batched if head_batched else _attend_head_loop

    def layer_norm(v, g_ref, b_ref):
        mu = jnp.mean(v, axis=-1, keepdims=True)
        c = v - mu
        var = jnp.mean(c * c, axis=-1, keepdims=True)
        return c * jax.lax.rsqrt(var + 1e-5) * g_ref[...] + b_ref[...]

    # --- self-attention (fused QKV; 1/sqrt(hd) pre-folded into Wq / bq) ---
    qkv = jnp.dot(x.astype(cdt), sa_wqkv_ref[...],
                  preferred_element_type=jnp.float32) + sa_bqkv_ref[...]
    sa = attend(qkv[:, :E], qkv[:, E:2 * E], qkv[:, 2 * E:],
                B, T, T, nhead, hd, cdt, sa_wo_ref, sa_bo_ref)
    x = layer_norm(x + sa, g1_ref, be1_ref)

    # --- cross-attention (fused KV; 1/sqrt(hd) pre-folded into Wq / bq) ---
    q = jnp.dot(x.astype(cdt), ca_wq_ref[...],
                preferred_element_type=jnp.float32) + ca_bq_ref[...]
    kv = jnp.dot(mem.astype(cdt), ca_wkv_ref[...],
                 preferred_element_type=jnp.float32) + ca_bkv_ref[...]
    ca = attend(q, kv[:, :E], kv[:, E:], B, T, S, nhead, hd, cdt,
                ca_wo_ref, ca_bo_ref)
    x = layer_norm(x + ca, g2_ref, be2_ref)

    # --- feed-forward + residual + norm3 ---
    h1 = jnp.maximum(jnp.dot(x.astype(cdt), w1t_ref[...],
                             preferred_element_type=jnp.float32) + b1_ref[...], 0.0)
    ff = jnp.dot(h1.astype(cdt), w2t_ref[...],
                 preferred_element_type=jnp.float32) + b2_ref[...]
    x = layer_norm(x + ff, g3_ref, be3_ref)

    y3 = x.reshape(B, T, E)
    if time_major_io:
        out_ref[...] = jnp.swapaxes(y3, 0, 1).astype(out_ref.dtype)   # (T, B, E)
    else:
        out_ref[...] = y3.astype(out_ref.dtype)                       # (B, T, E)


# ---------------------------------------------------------------------------
# Wrapper helpers: generation-aware VMEM budgeting and batch-block selection.
# ---------------------------------------------------------------------------
def _vmem_capacity_bytes():
    try:
        info = pltpu.get_tpu_info()
        cap = int(getattr(info, "vmem_capacity_bytes", 0))
        if cap > 0:
            return cap
    except Exception:
        pass
    return 128 << 20   # v5e / v6e default (v7x reports its 64 MiB via get_tpu_info)


def _per_batch_elem_vmem_bytes(T, S, E, F, nhead, cdt_itemsize):
    f32 = 4
    return int(
        2 * (T * E + S * E + T * E) * f32            # double-buffered tgt/mem/out blocks
        + (T * E + S * E) * f32                      # f32 working copies
        + (T * 3 * E + S * 2 * E) * f32              # fused QKV / KV projections
        + 2 * nhead * T * max(T, S) * f32            # scores + probabilities
        + T * E * f32                                # attention output (pre out-proj)
        + T * F * f32                                # FFN hidden
        + 2 * T * E * f32                            # residual / LayerNorm temporaries
        + (T * (4 * E + F) + S * 2 * E) * cdt_itemsize   # compute-dtype cast copies
    )


def _pick_batch_block(N, T, per_elem_bytes, budget_bytes, time_major):
    cands = [b for b in range(1, N + 1) if N % b == 0]
    if time_major:
        # Second-minor dim of the (T, B, E) block is B: it must be a sublane
        # multiple or span the full batch.
        cands = [b for b in cands if b % 8 == 0 or b == N] or [N]
    max_b = max(1, budget_bytes // max(per_elem_bytes, 1))
    feasible = [b for b in cands if b <= max_b] or [min(cands)]
    # Keep the grid >= 2 when possible so the "parallel" axis can shard across
    # both TensorCores on v7x-class chips (free on 1-TC chips).
    pref = [b for b in feasible if b <= max(1, N // 2)] or feasible
    pref = [b for b in pref if (b * T) % 8 == 0] or pref     # sublane-aligned M dim
    return max(pref)


# Fallback chain: each entry peels off one of the newer lowering features; the
# last entry is the previously-validated configuration.
_CONFIGS = (
    dict(fold_io=True,  head_batched=True,  single_buffer_weights=True),
    dict(fold_io=False, head_batched=True,  single_buffer_weights=True),
    dict(fold_io=False, head_batched=True,  single_buffer_weights=False),
    dict(fold_io=False, head_batched=False, single_buffer_weights=True),
    dict(fold_io=False, head_batched=False, single_buffer_weights=False),
)
_FIRST_CONFIG = [0]     # cache of the first configuration known to lower & run


# ---------------------------------------------------------------------------
# Wrapper: PyTorch (T, N, E) convention in/out.
# ---------------------------------------------------------------------------
def transformer_decoder_block(tgt, memory, params, nhead,
                              compute_dtype=jnp.bfloat16, batch_block=None):
    T, N, E = tgt.shape
    S = memory.shape[0]
    F = params["w1"].shape[0]
    assert E % nhead == 0
    hd = E // nhead
    # NOTE: for production configs keep E and F multiples of 128 (lane-dense stores)
    # and B*T a multiple of 8 (sublane-aligned matmul M dim).

    cdt = jnp.dtype(compute_dtype)
    scale = 1.0 / math.sqrt(hd)

    sa_w, sa_b = params["sa_in_w"], params["sa_in_b"]
    ca_w, ca_b = params["ca_in_w"], params["ca_in_b"]

    # Pre-transposed / fused weights; softmax 1/sqrt(hd) folded into Wq & bq.
    # Matmul weights in compute dtype; biases & LayerNorm params stay f32 (they are
    # applied after f32 accumulation).
    weight_args = [
        jnp.concatenate([sa_w[:E] * scale, sa_w[E:]], axis=0).T.astype(cdt),  # (E, 3E)
        jnp.concatenate([sa_b[:E] * scale, sa_b[E:]]).reshape(1, -1),         # (1, 3E)
        params["sa_out_w"].T.astype(cdt),                                     # (E, E)
        params["sa_out_b"].reshape(1, -1),                                    # (1, E)
        (ca_w[:E] * scale).T.astype(cdt),                                     # (E, E)
        (ca_b[:E] * scale).reshape(1, -1),                                    # (1, E)
        ca_w[E:].T.astype(cdt),                                               # (E, 2E)
        ca_b[E:].reshape(1, -1),                                              # (1, 2E)
        params["ca_out_w"].T.astype(cdt),                                     # (E, E)
        params["ca_out_b"].reshape(1, -1),                                    # (1, E)
        params["w1"].T.astype(cdt),                                           # (E, F)
        params["b1"].reshape(1, -1),                                          # (1, F)
        params["w2"].T.astype(cdt),                                           # (F, E)
        params["b2"].reshape(1, -1),                                          # (1, E)
        params["g1"].reshape(1, -1), params["be1"].reshape(1, -1),
        params["g2"].reshape(1, -1), params["be2"].reshape(1, -1),
        params["g3"].reshape(1, -1), params["be3"].reshape(1, -1),
    ]

    def nbytes(a):
        return int(a.size) * a.dtype.itemsize

    weight_bytes = sum(nbytes(w) for w in weight_args)
    per_elem = _per_batch_elem_vmem_bytes(T, S, E, F, nhead, cdt.itemsize)

    # Generation-aware VMEM cap with headroom for Mosaic internal scratch:
    # ~54 MiB on v7x (64 MiB physical), ~107 MiB on v5e/v6e (128 MiB physical).
    limit_cap = max(int(_vmem_capacity_bytes() * 0.84), 32 << 20)

    flops = int(
        2 * N * T * E * 3 * E          # self QKV projection
        + 4 * N * T * T * E            # self scores + PV
        + 2 * N * T * E * E            # self out-projection
        + 2 * N * T * E * E            # cross Q projection
        + 2 * N * S * E * 2 * E        # cross KV projection
        + 4 * N * T * S * E            # cross scores + PV
        + 2 * N * T * E * E            # cross out-projection
        + 4 * N * T * E * F            # FFN
    )
    transcendentals = int(N * nhead * T * (T + S) + 3 * N * T)
    bytes_accessed = int(nbytes(tgt) + nbytes(memory) + weight_bytes + N * T * E * 4)

    last_err = None
    for idx in range(_FIRST_CONFIG[0], len(_CONFIGS)):
        cfg = _CONFIGS[idx]
        fold = cfg["fold_io"]
        batched = cfg["head_batched"]
        sbuf = cfg["single_buffer_weights"]

        resident_weight_bytes = weight_bytes * (1 if sbuf else 2)
        budget = limit_cap - resident_weight_bytes - (6 << 20)
        if batch_block is not None:
            B = batch_block
        else:
            B = _pick_batch_block(N, T, per_elem, budget, time_major=fold)
        assert N % B == 0

        needed = resident_weight_bytes + B * per_elem + (6 << 20)
        vmem_limit = int(min(max(needed, 32 << 20), limit_cap))

        try:
            def full_spec(arr):
                idx_map = lambda n, nd=arr.ndim: (0,) * nd
                if sbuf:
                    # Grid-invariant operands: no point double-buffering them.
                    return pl.BlockSpec(arr.shape, idx_map,
                                        pipeline_mode=pl.Buffered(1))
                return pl.BlockSpec(arr.shape, idx_map)

            if fold:
                # Read (T, B, E) / (S, B, E) slabs straight out of the PyTorch
                # (T, N, E) / (S, N, E) arrays -> no wrapper-side HBM transposes.
                act_inputs = (tgt, memory)
                act_specs = [pl.BlockSpec((T, B, E), lambda n: (0, n, 0)),
                             pl.BlockSpec((S, B, E), lambda n: (0, n, 0))]
                out_spec = pl.BlockSpec((T, B, E), lambda n: (0, n, 0))
                out_shape = jax.ShapeDtypeStruct((T, N, E), jnp.float32)
            else:
                act_inputs = (jnp.transpose(tgt, (1, 0, 2)),
                              jnp.transpose(memory, (1, 0, 2)))
                act_specs = [pl.BlockSpec((B, T, E), lambda n: (n, 0, 0)),
                             pl.BlockSpec((B, S, E), lambda n: (n, 0, 0))]
                out_spec = pl.BlockSpec((B, T, E), lambda n: (n, 0, 0))
                out_shape = jax.ShapeDtypeStruct((N, T, E), jnp.float32)

            out = pl.pallas_call(
                functools.partial(_decoder_block_kernel, nhead, cdt, fold, batched),
                out_shape=out_shape,
                grid=(N // B,),
                in_specs=act_specs + [full_spec(w) for w in weight_args],
                out_specs=out_spec,
                compiler_params=pltpu.CompilerParams(
                    dimension_semantics=("parallel",),
                    vmem_limit_bytes=vmem_limit,
                ),
                cost_estimate=pl.CostEstimate(
                    flops=flops,
                    transcendentals=transcendentals,
                    bytes_accessed=bytes_accessed,
                ),
            )(*act_inputs, *weight_args)
            out = jax.block_until_ready(out)
        except Exception as err:   # fall back to a simpler, known-good lowering
            last_err = err
            continue

        _FIRST_CONFIG[0] = idx
        if fold:
            return out                               # already (T, N, E)
        return jnp.transpose(out, (1, 0, 2))         # back to (T, N, E)

    raise last_err


# ---------------------------------------------------------------------------
# Pure-JAX reference (same math, eval-mode dropout) for a correctness check.
# ---------------------------------------------------------------------------
def reference(tgt, memory, p, nhead):
    def ln(v, g, b):
        mu = v.mean(-1, keepdims=True)
        var = ((v - mu) ** 2).mean(-1, keepdims=True)
        return (v - mu) / jnp.sqrt(var + 1e-5) * g + b

    def mha(q_in, kv_in, w, b, ow, ob):
        E = q_in.shape[-1]
        hd = E // nhead
        q = q_in @ w[:E].T + b[:E]
        k = kv_in @ w[E:2 * E].T + b[E:2 * E]
        v = kv_in @ w[2 * E:].T + b[2 * E:]
        outs = []
        for h in range(nhead):
            sl = slice(h * hd, (h + 1) * hd)
            s = jnp.einsum("tnd,snd->nts", q[..., sl], k[..., sl]) / math.sqrt(hd)
            pr = jax.nn.softmax(s, axis=-1)
            outs.append(jnp.einsum("nts,snd->tnd", pr, v[..., sl]))
        attn = jnp.concatenate(outs, -1)
        return attn @ ow.T + ob

    x = tgt
    x = ln(x + mha(x, x, p["sa_in_w"], p["sa_in_b"], p["sa_out_w"], p["sa_out_b"]),
           p["g1"], p["be1"])
    x = ln(x + mha(x, memory, p["ca_in_w"], p["ca_in_b"], p["ca_out_w"], p["ca_out_b"]),
           p["g2"], p["be2"])
    ff = jnp.maximum(x @ p["w1"].T + p["b1"], 0.0) @ p["w2"].T + p["b2"]
    x = ln(x + ff, p["g3"], p["be3"])
    return x


def make_params(key, d_model, nhead, dim_feedforward):
    ks = jax.random.split(key, 12)
    E, F = d_model, dim_feedforward
    s = 0.1
    return {
        "sa_in_w": jax.random.normal(ks[0], (3 * E, E), jnp.float32) * s,
        "sa_in_b": jax.random.normal(ks[1], (3 * E,), jnp.float32) * s,
        "sa_out_w": jax.random.normal(ks[2], (E, E), jnp.float32) * s,
        "sa_out_b": jax.random.normal(ks[3], (E,), jnp.float32) * s,
        "ca_in_w": jax.random.normal(ks[4], (3 * E, E), jnp.float32) * s,
        "ca_in_b": jax.random.normal(ks[5], (3 * E,), jnp.float32) * s,
        "ca_out_w": jax.random.normal(ks[6], (E, E), jnp.float32) * s,
        "ca_out_b": jax.random.normal(ks[7], (E,), jnp.float32) * s,
        "w1": jax.random.normal(ks[8], (F, E), jnp.float32) * s,
        "b1": jax.random.normal(ks[9], (F,), jnp.float32) * s,
        "w2": jax.random.normal(ks[10], (E, F), jnp.float32) * s,
        "b2": jax.random.normal(ks[11], (E,), jnp.float32) * s,
        "g1": jnp.ones((E,), jnp.float32),
        "be1": jnp.zeros((E,), jnp.float32),
        "g2": jnp.full((E,), 1.05, jnp.float32),
        "be2": jnp.full((E,), 0.02, jnp.float32),
        "g3": jnp.full((E,), 0.95, jnp.float32),
        "be3": jnp.full((E,), -0.01, jnp.float32),
    }


if __name__ == "__main__":
    d_model, nhead, dim_feedforward = 32, 4, 64
    T, S, N = 8, 8, 2

    key = jax.random.PRNGKey(0)
    k_tgt, k_mem, k_par = jax.random.split(key, 3)
    tgt = jax.random.normal(k_tgt, (T, N, d_model), jnp.float32)      # (T, N, E)
    memory = jax.random.normal(k_mem, (S, N, d_model), jnp.float32)   # (S, N, E)
    params = make_params(k_par, d_model, nhead, dim_feedforward)

    ref = reference(tgt, memory, params, nhead)

    # f32 matmul path (tight-ish check; only diff vs reference is the EUP
    # approximate reciprocal in the softmax normalization).
    out = transformer_decoder_block(tgt, memory, params, nhead,
                                    compute_dtype=jnp.float32)
    out = jax.block_until_ready(out)
    assert out.shape == (T, N, d_model)
    err_f32 = float(jnp.max(jnp.abs(out - ref)))
    assert jnp.allclose(out, ref, atol=3e-2, rtol=3e-2), err_f32

    # bf16 matmul path (MXU-native inputs, f32 accumulation) — loose check.
    out_bf16 = transformer_decoder_block(tgt, memory, params, nhead,
                                         compute_dtype=jnp.bfloat16)
    out_bf16 = jax.block_until_ready(out_bf16)
    err_bf16 = float(jnp.max(jnp.abs(out_bf16 - ref)))
    assert jnp.allclose(out_bf16, ref, atol=1.5e-1, rtol=1.5e-1), err_bf16

    print("KERNEL_OK")
</pallas_src>

<mosaic_0001>
module attributes {stable_mosaic.version = 11 : i64} {
  func.func @_decoder_block_kernel(%arg0: i32, %arg1: memref<1x8x32xf32, #tpu.memory_space<vmem>>, %arg2: memref<1x8x32xf32, #tpu.memory_space<vmem>>, %arg3: memref<32x96xf32, #tpu.memory_space<vmem>>, %arg4: memref<1x96xf32, #tpu.memory_space<vmem>>, %arg5: memref<32x32xf32, #tpu.memory_space<vmem>>, %arg6: memref<1x32xf32, #tpu.memory_space<vmem>>, %arg7: memref<32x32xf32, #tpu.memory_space<vmem>>, %arg8: memref<1x32xf32, #tpu.memory_space<vmem>>, %arg9: memref<32x64xf32, #tpu.memory_space<vmem>>, %arg10: memref<1x64xf32, #tpu.memory_space<vmem>>, %arg11: memref<32x32xf32, #tpu.memory_space<vmem>>, %arg12: memref<1x32xf32, #tpu.memory_space<vmem>>, %arg13: memref<32x64xf32, #tpu.memory_space<vmem>>, %arg14: memref<1x64xf32, #tpu.memory_space<vmem>>, %arg15: memref<64x32xf32, #tpu.memory_space<vmem>>, %arg16: memref<1x32xf32, #tpu.memory_space<vmem>>, %arg17: memref<1x32xf32, #tpu.memory_space<vmem>>, %arg18: memref<1x32xf32, #tpu.memory_space<vmem>>, %arg19: memref<1x32xf32, #tpu.memory_space<vmem>>, %arg20: memref<1x32xf32, #tpu.memory_space<vmem>>, %arg21: memref<1x32xf32, #tpu.memory_space<vmem>>, %arg22: memref<1x32xf32, #tpu.memory_space<vmem>>, %arg23: memref<1x8x32xf32, #tpu.memory_space<vmem>>) attributes {dimension_semantics = [#tpu.dimension_semantics<parallel>], iteration_bounds = array<i64: 2>, scalar_prefetch = 0 : i64, scratch_operands = 0 : i64, tpu.core_type = #tpu.core_type<tc>, window_params = [{transform_indices = @transform_0, window_bounds = array<i64: 1, 8, 32>}, {transform_indices = @transform_1, window_bounds = array<i64: 1, 8, 32>}, {pipeline_mode = #tpu.pipeline_mode<synchronous>, transform_indices = @transform_2, window_bounds = array<i64: 32, 96>}, {pipeline_mode = #tpu.pipeline_mode<synchronous>, transform_indices = @transform_3, window_bounds = array<i64: 1, 96>}, {pipeline_mode = #tpu.pipeline_mode<synchronous>, transform_indices = @transform_4, window_bounds = array<i64: 32, 32>}, {pipeline_mode = #tpu.pipeline_mode<synchronous>, transform_indices = @transform_5, window_bounds = array<i64: 1, 32>}, {pipeline_mode = #tpu.pipeline_mode<synchronous>, transform_indices = @transform_6, window_bounds = array<i64: 32, 32>}, {pipeline_mode = #tpu.pipeline_mode<synchronous>, transform_indices = @transform_7, window_bounds = array<i64: 1, 32>}, {pipeline_mode = #tpu.pipeline_mode<synchronous>, transform_indices = @transform_8, window_bounds = array<i64: 32, 64>}, {pipeline_mode = #tpu.pipeline_mode<synchronous>, transform_indices = @transform_9, window_bounds = array<i64: 1, 64>}, {pipeline_mode = #tpu.pipeline_mode<synchronous>, transform_indices = @transform_10, window_bounds = array<i64: 32, 32>}, {pipeline_mode = #tpu.pipeline_mode<synchronous>, transform_indices = @transform_11, window_bounds = array<i64: 1, 32>}, {pipeline_mode = #tpu.pipeline_mode<synchronous>, transform_indices = @transform_12, window_bounds = array<i64: 32, 64>}, {pipeline_mode = #tpu.pipeline_mode<synchronous>, transform_indices = @transform_13, window_bounds = array<i64: 1, 64>}, {pipeline_mode = #tpu.pipeline_mode<synchronous>, transform_indices = @transform_14, window_bounds = array<i64: 64, 32>}, {pipeline_mode = #tpu.pipeline_mode<synchronous>, transform_indices = @transform_15, window_bounds = array<i64: 1, 32>}, {pipeline_mode = #tpu.pipeline_mode<synchronous>, transform_indices = @transform_16, window_bounds = array<i64: 1, 32>}, {pipeline_mode = #tpu.pipeline_mode<synchronous>, transform_indices = @transform_17, window_bounds = array<i64: 1, 32>}, {pipeline_mode = #tpu.pipeline_mode<synchronous>, transform_indices = @transform_18, window_bounds = array<i64: 1, 32>}, {pipeline_mode = #tpu.pipeline_mode<synchronous>, transform_indices = @transform_19, window_bounds = array<i64: 1, 32>}, {pipeline_mode = #tpu.pipeline_mode<synchronous>, transform_indices = @transform_20, window_bounds = array<i64: 1, 32>}, {pipeline_mode = #tpu.pipeline_mode<synchronous>, transform_indices = @transform_21, window_bounds = array<i64: 1, 32>}, {transform_indices = @transform_22, window_bounds = array<i64: 1, 8, 32>}]} {
    %c0 = arith.constant 0 : index
    %c0_0 = arith.constant 0 : index
    %c0_1 = arith.constant 0 : index
    %0 = vector.load %arg1[%c0, %c0_0, %c0_1] : memref<1x8x32xf32, #tpu.memory_space<vmem>>, vector<1x8x32xf32>
    %c0_2 = arith.constant 0 : index
    %c0_3 = arith.constant 0 : index
    %c0_4 = arith.constant 0 : index
    %1 = vector.load %arg2[%c0_2, %c0_3, %c0_4] : memref<1x8x32xf32, #tpu.memory_space<vmem>>, vector<1x8x32xf32>
    %2 = vector.shape_cast %0 : vector<1x8x32xf32> to vector<8x32xf32>
    %3 = vector.shape_cast %1 : vector<1x8x32xf32> to vector<8x32xf32>
    %c0_5 = arith.constant 0 : index
    %c0_6 = arith.constant 0 : index
    %4 = vector.load %arg3[%c0_5, %c0_6] : memref<32x96xf32, #tpu.memory_space<vmem>>, vector<32x96xf32>
    %cst = arith.constant dense<0.000000e+00> : vector<8x96xf32>
    %5 = tpu.matmul %2, %4, %cst {dimension_numbers = #tpu.dot_dimension_numbers<[1], [0], [0], [1], [0, 0, 1, 1], [], []>} : vector<8x32xf32>, vector<32x96xf32>, vector<8x96xf32> -> vector<8x96xf32>
    %c0_7 = arith.constant 0 : index
    %c0_8 = arith.constant 0 : index
    %6 = vector.load %arg4[%c0_7, %c0_8] : memref<1x96xf32, #tpu.memory_space<vmem>>, vector<1x96xf32>
    %7 = vector.broadcast %6 : vector<1x96xf32> to vector<8x96xf32>
    %8 = arith.addf %5, %7 : vector<8x96xf32>
    %9 = vector.extract_strided_slice %8 {offsets = [0, 0], sizes = [8, 32], strides = [1, 1]} : vector<8x96xf32> to vector<8x32xf32>
    %10 = vector.extract_strided_slice %8 {offsets = [0, 32], sizes = [8, 32], strides = [1, 1]} : vector<8x96xf32> to vector<8x32xf32>
    %11 = vector.extract_strided_slice %8 {offsets = [0, 64], sizes = [8, 32], strides = [1, 1]} : vector<8x96xf32> to vector<8x32xf32>
    %12 = vector.shape_cast %9 : vector<8x32xf32> to vector<1x8x32xf32>
    %13 = vector.shape_cast %10 : vector<8x32xf32> to vector<1x8x32xf32>
    %14 = vector.shape_cast %11 : vector<8x32xf32> to vector<1x8x32xf32>
    %15 = vector.extract_strided_slice %12 {offsets = [0, 0, 0], sizes = [1, 8, 8], strides = [1, 1, 1]} : vector<1x8x32xf32> to vector<1x8x8xf32>
    %16 = vector.extract_strided_slice %13 {offsets = [0, 0, 0], sizes = [1, 8, 8], strides = [1, 1, 1]} : vector<1x8x32xf32> to vector<1x8x8xf32>
    "tpu.trace_start"() <{level = 10 : i32, message = "bqd,bkd->bqk"}> : () -> ()
    %cst_9 = arith.constant dense<0.000000e+00> : vector<1x8x8xf32>
    %17 = tpu.matmul %15, %16, %cst_9 {dimension_numbers = #tpu.dot_dimension_numbers<[2], [2], [1], [1], [0, 0, 0, 1, 1, 1], [0], [0]>} : vector<1x8x8xf32>, vector<1x8x8xf32>, vector<1x8x8xf32> -> vector<1x8x8xf32>
    "tpu.trace_stop"() : () -> ()
    %cst_10 = arith.constant dense<0xFF800000> : vector<1x8xf32>
    %18 = vector.multi_reduction <maximumf>, %17, %cst_10 [2] : vector<1x8x8xf32> to vector<1x8xf32>
    %19 = vector.shape_cast %18 : vector<1x8xf32> to vector<1x8x1xf32>
    %20 = vector.broadcast %19 : vector<1x8x1xf32> to vector<1x8x8xf32>
    %21 = arith.subf %17, %20 : vector<1x8x8xf32>
    %22 = math.exp %21 : vector<1x8x8xf32>
    %cst_11 = arith.constant dense<0.000000e+00> : vector<1x8xf32>
    %23 = vector.multi_reduction <add>, %22, %cst_11 [2] : vector<1x8x8xf32> to vector<1x8xf32>
    %24 = vector.shape_cast %23 : vector<1x8xf32> to vector<1x8x1xf32>
    %25 = tpu.reciprocal %24 {approx = true} : vector<1x8x1xf32> -> vector<1x8x1xf32>
    %26 = vector.broadcast %25 : vector<1x8x1xf32> to vector<1x8x8xf32>
    %27 = arith.mulf %22, %26 : vector<1x8x8xf32>
    %28 = vector.extract_strided_slice %14 {offsets = [0, 0, 0], sizes = [1, 8, 8], strides = [1, 1, 1]} : vector<1x8x32xf32> to vector<1x8x8xf32>
    "tpu.trace_start"() <{level = 10 : i32, message = "bqk,bkd->bqd"}> : () -> ()
    %cst_12 = arith.constant dense<0.000000e+00> : vector<1x8x8xf32>
    %29 = tpu.matmul %27, %28, %cst_12 {dimension_numbers = #tpu.dot_dimension_numbers<[2], [1], [1], [2], [0, 0, 0, 1, 1, 2], [0], [0]>} : vector<1x8x8xf32>, vector<1x8x8xf32>, vector<1x8x8xf32> -> vector<1x8x8xf32>
    "tpu.trace_stop"() : () -> ()
    %30 = vector.extract_strided_slice %12 {offsets = [0, 0, 8], sizes = [1, 8, 8], strides = [1, 1, 1]} : vector<1x8x32xf32> to vector<1x8x8xf32>
    %31 = vector.extract_strided_slice %13 {offsets = [0, 0, 8], sizes = [1, 8, 8], strides = [1, 1, 1]} : vector<1x8x32xf32> to vector<1x8x8xf32>
    "tpu.trace_start"() <{level = 10 : i32, message = "bqd,bkd->bqk"}> : () -> ()
    %cst_13 = arith.constant dense<0.000000e+00> : vector<1x8x8xf32>
    %32 = tpu.matmul %30, %31, %cst_13 {dimension_numbers = #tpu.dot_dimension_numbers<[2], [2], [1], [1], [0, 0, 0, 1, 1, 1], [0], [0]>} : vector<1x8x8xf32>, vector<1x8x8xf32>, vector<1x8x8xf32> -> vector<1x8x8xf32>
    "tpu.trace_stop"() : () -> ()
    %cst_14 = arith.constant dense<0xFF800000> : vector<1x8xf32>
    %33 = vector.multi_reduction <maximumf>, %32, %cst_14 [2] : vector<1x8x8xf32> to vector<1x8xf32>
    %34 = vector.shape_cast %33 : vector<1x8xf32> to vector<1x8x1xf32>
    %35 = vector.broadcast %34 : vector<1x8x1xf32> to vector<1x8x8xf32>
    %36 = arith.subf %32, %35 : vector<1x8x8xf32>
    %37 = math.exp %36 : vector<1x8x8xf32>
    %cst_15 = arith.constant dense<0.000000e+00> : vector<1x8xf32>
    %38 = vector.multi_reduction <add>, %37, %cst_15 [2] : vector<1x8x8xf32> to vector<1x8xf32>
    %39 = vector.shape_cast %38 : vector<1x8xf32> to vector<1x8x1xf32>
    %40 = tpu.reciprocal %39 {approx = true} : vector<1x8x1xf32> -> vector<1x8x1xf32>
    %41 = vector.broadcast %40 : vector<1x8x1xf32> to vector<1x8x8xf32>
    %42 = arith.mulf %37, %41 : vector<1x8x8xf32>
    %43 = vector.extract_strided_slice %14 {offsets = [0, 0, 8], sizes = [1, 8, 8], strides = [1, 1, 1]} : vector<1x8x32xf32> to vector<1x8x8xf32>
    "tpu.trace_start"() <{level = 10 : i32, message = "bqk,bkd->bqd"}> : () -> ()
    %cst_16 = arith.constant dense<0.000000e+00> : vector<1x8x8xf32>
    %44 = tpu.matmul %42, %43, %cst_16 {dimension_numbers = #tpu.dot_dimension_numbers<[2], [1], [1], [2], [0, 0, 0, 1, 1, 2], [0], [0]>} : vector<1x8x8xf32>, vector<1x8x8xf32>, vector<1x8x8xf32> -> vector<1x8x8xf32>
    "tpu.trace_stop"() : () -> ()
    %45 = vector.extract_strided_slice %12 {offsets = [0, 0, 16], sizes = [1, 8, 8], strides = [1, 1, 1]} : vector<1x8x32xf32> to vector<1x8x8xf32>
    %46 = vector.extract_strided_slice %13 {offsets = [0, 0, 16], sizes = [1, 8, 8], strides = [1, 1, 1]} : vector<1x8x32xf32> to vector<1x8x8xf32>
    "tpu.trace_start"() <{level = 10 : i32, message = "bqd,bkd->bqk"}> : () -> ()
    %cst_17 = arith.constant dense<0.000000e+00> : vector<1x8x8xf32>
    %47 = tpu.matmul %45, %46, %cst_17 {dimension_numbers = #tpu.dot_dimension_numbers<[2], [2], [1], [1], [0, 0, 0, 1, 1, 1], [0], [0]>} : vector<1x8x8xf32>, vector<1x8x8xf32>, vector<1x8x8xf32> -> vector<1x8x8xf32>
    "tpu.trace_stop"() : () -> ()
    %cst_18 = arith.constant dense<0xFF800000> : vector<1x8xf32>
    %48 = vector.multi_reduction <maximumf>, %47, %cst_18 [2] : vector<1x8x8xf32> to vector<1x8xf32>
    %49 = vector.shape_cast %48 : vector<1x8xf32> to vector<1x8x1xf32>
    %50 = vector.broadcast %49 : vector<1x8x1xf32> to vector<1x8x8xf32>
    %51 = arith.subf %47, %50 : vector<1x8x8xf32>
    %52 = math.exp %51 : vector<1x8x8xf32>
    %cst_19 = arith.constant dense<0.000000e+00> : vector<1x8xf32>
    %53 = vector.multi_reduction <add>, %52, %cst_19 [2] : vector<1x8x8xf32> to vector<1x8xf32>
    %54 = vector.shape_cast %53 : vector<1x8xf32> to vector<1x8x1xf32>
    %55 = tpu.reciprocal %54 {approx = true} : vector<1x8x1xf32> -> vector<1x8x1xf32>
    %56 = vector.broadcast %55 : vector<1x8x1xf32> to vector<1x8x8xf32>
    %57 = arith.mulf %52, %56 : vector<1x8x8xf32>
    %58 = vector.extract_strided_slice %14 {offsets = [0, 0, 16], sizes = [1, 8, 8], strides = [1, 1, 1]} : vector<1x8x32xf32> to vector<1x8x8xf32>
    "tpu.trace_start"() <{level = 10 : i32, message = "bqk,bkd->bqd"}> : () -> ()
    %cst_20 = arith.constant dense<0.000000e+00> : vector<1x8x8xf32>
    %59 = tpu.matmul %57, %58, %cst_20 {dimension_numbers = #tpu.dot_dimension_numbers<[2], [1], [1], [2], [0, 0, 0, 1, 1, 2], [0], [0]>} : vector<1x8x8xf32>, vector<1x8x8xf32>, vector<1x8x8xf32> -> vector<1x8x8xf32>
    "tpu.trace_stop"() : () -> ()
    %60 = vector.extract_strided_slice %12 {offsets = [0, 0, 24], sizes = [1, 8, 8], strides = [1, 1, 1]} : vector<1x8x32xf32> to vector<1x8x8xf32>
    %61 = vector.extract_strided_slice %13 {offsets = [0, 0, 24], sizes = [1, 8, 8], strides = [1, 1, 1]} : vector<1x8x32xf32> to vector<1x8x8xf32>
    "tpu.trace_start"() <{level = 10 : i32, message = "bqd,bkd->bqk"}> : () -> ()
    %cst_21 = arith.constant dense<0.000000e+00> : vector<1x8x8xf32>
    %62 = tpu.matmul %60, %61, %cst_21 {dimension_numbers = #tpu.dot_dimension_numbers<[2], [2], [1], [1], [0, 0, 0, 1, 1, 1], [0], [0]>} : vector<1x8x8xf32>, vector<1x8x8xf32>, vector<1x8x8xf32> -> vector<1x8x8xf32>
    "tpu.trace_stop"() : () -> ()
    %cst_22 = arith.constant dense<0xFF800000> : vector<1x8xf32>
    %63 = vector.multi_reduction <maximumf>, %62, %cst_22 [2] : vector<1x8x8xf32> to vector<1x8xf32>
    %64 = vector.shape_cast %63 : vector<1x8xf32> to vector<1x8x1xf32>
    %65 = vector.broadcast %64 : vector<1x8x1xf32> to vector<1x8x8xf32>
    %66 = arith.subf %62, %65 : vector<1x8x8xf32>
    %67 = math.exp %66 : vector<1x8x8xf32>
    %cst_23 = arith.constant dense<0.000000e+00> : vector<1x8xf32>
    %68 = vector.multi_reduction <add>, %67, %cst_23 [2] : vector<1x8x8xf32> to vector<1x8xf32>
    %69 = vector.shape_cast %68 : vector<1x8xf32> to vector<1x8x1xf32>
    %70 = tpu.reciprocal %69 {approx = true} : vector<1x8x1xf32> -> vector<1x8x1xf32>
    %71 = vector.broadcast %70 : vector<1x8x1xf32> to vector<1x8x8xf32>
    %72 = arith.mulf %67, %71 : vector<1x8x8xf32>
    %73 = vector.extract_strided_slice %14 {offsets = [0, 0, 24], sizes = [1, 8, 8], strides = [1, 1, 1]} : vector<1x8x32xf32> to vector<1x8x8xf32>
    "tpu.trace_start"() <{level = 10 : i32, message = "bqk,bkd->bqd"}> : () -> ()
    %cst_24 = arith.constant dense<0.000000e+00> : vector<1x8x8xf32>
    %74 = tpu.matmul %72, %73, %cst_24 {dimension_numbers = #tpu.dot_dimension_numbers<[2], [1], [1], [2], [0, 0, 0, 1, 1, 2], [0], [0]>} : vector<1x8x8xf32>, vector<1x8x8xf32>, vector<1x8x8xf32> -> vector<1x8x8xf32>
    "tpu.trace_stop"() : () -> ()
    %75 = tpu.concatenate %29, %44, %59, %74 in 2 : vector<1x8x8xf32>, vector<1x8x8xf32>, vector<1x8x8xf32>, vector<1x8x8xf32> -> vector<1x8x32xf32>
    %76 = vector.shape_cast %75 : vector<1x8x32xf32> to vector<8x32xf32>
    %c0_25 = arith.constant 0 : index
    %c0_26 = arith.constant 0 : index
    %77 = vector.load %arg5[%c0_25, %c0_26] : memref<32x32xf32, #tpu.memory_space<vmem>>, vector<32x32xf32>
    %cst_27 = arith.constant dense<0.000000e+00> : vector<8x32xf32>
    %78 = tpu.matmul %76, %77, %cst_27 {dimension_numbers = #tpu.dot_dimension_numbers<[1], [0], [0], [1], [0, 0, 1, 1], [], []>} : vector<8x32xf32>, vector<32x32xf32>, vector<8x32xf32> -> vector<8x32xf32>
    %c0_28 = arith.constant 0 : index
    %c0_29 = arith.constant 0 : index
    %79 = vector.load %arg6[%c0_28, %c0_29] : memref<1x32xf32, #tpu.memory_space<vmem>>, vector<1x32xf32>
    %80 = vector.broadcast %79 : vector<1x32xf32> to vector<8x32xf32>
    %81 = arith.addf %78, %80 : vector<8x32xf32>
    %82 = arith.addf %2, %81 : vector<8x32xf32>
    %cst_30 = arith.constant dense<0.000000e+00> : vector<8xf32>
    %83 = vector.multi_reduction <add>, %82, %cst_30 [1] : vector<8x32xf32> to vector<8xf32>
    %84 = vector.shape_cast %83 : vector<8xf32> to vector<8x1xf32>
    %cst_31 = arith.constant 3.200000e+01 : f32
    %85 = vector.broadcast %cst_31 : f32 to vector<8x1xf32>
    %86 = arith.divf %84, %85 : vector<8x1xf32>
    %87 = vector.broadcast %86 : vector<8x1xf32> to vector<8x32xf32>
    %88 = arith.subf %82, %87 : vector<8x32xf32>
    %89 = arith.mulf %88, %88 : vector<8x32xf32>
    %cst_32 = arith.constant dense<0.000000e+00> : vector<8xf32>
    %90 = vector.multi_reduction <add>, %89, %cst_32 [1] : vector<8x32xf32> to vector<8xf32>
    %91 = vector.shape_cast %90 : vector<8xf32> to vector<8x1xf32>
    %cst_33 = arith.constant 3.200000e+01 : f32
    %92 = vector.broadcast %cst_33 : f32 to vector<8x1xf32>
    %93 = arith.divf %91, %92 : vector<8x1xf32>
    %cst_34 = arith.constant 9.99999974E-6 : f32
    %94 = vector.broadcast %cst_34 : f32 to vector<8x1xf32>
    %95 = arith.addf %93, %94 : vector<8x1xf32>
    %96 = math.rsqrt %95 : vector<8x1xf32>
    %97 = vector.broadcast %96 : vector<8x1xf32> to vector<8x32xf32>
    %98 = arith.mulf %88, %97 : vector<8x32xf32>
    %c0_35 = arith.constant 0 : index
    %c0_36 = arith.constant 0 : index
    %99 = vector.load %arg17[%c0_35, %c0_36] : memref<1x32xf32, #tpu.memory_space<vmem>>, vector<1x32xf32>
    %100 = vector.broadcast %99 : vector<1x32xf32> to vector<8x32xf32>
    %101 = arith.mulf %98, %100 : vector<8x32xf32>
    %c0_37 = arith.constant 0 : index
    %c0_38 = arith.constant 0 : index
    %102 = vector.load %arg18[%c0_37, %c0_38] : memref<1x32xf32, #tpu.memory_space<vmem>>, vector<1x32xf32>
    %103 = vector.broadcast %102 : vector<1x32xf32> to vector<8x32xf32>
    %104 = arith.addf %101, %103 : vector<8x32xf32>
    %c0_39 = arith.constant 0 : index
    %c0_40 = arith.constant 0 : index
    %105 = vector.load %arg7[%c0_39, %c0_40] : memref<32x32xf32, #tpu.memory_space<vmem>>, vector<32x32xf32>
    %cst_41 = arith.constant dense<0.000000e+00> : vector<8x32xf32>
    %106 = tpu.matmul %104, %105, %cst_41 {dimension_numbers = #tpu.dot_dimension_numbers<[1], [0], [0], [1], [0, 0, 1, 1], [], []>} : vector<8x32xf32>, vector<32x32xf32>, vector<8x32xf32> -> vector<8x32xf32>
    %c0_42 = arith.constant 0 : index
    %c0_43 = arith.constant 0 : index
    %107 = vector.load %arg8[%c0_42, %c0_43] : memref<1x32xf32, #tpu.memory_space<vmem>>, vector<1x32xf32>
    %108 = vector.broadcast %107 : vector<1x32xf32> to vector<8x32xf32>
    %109 = arith.addf %106, %108 : vector<8x32xf32>
    %c0_44 = arith.constant 0 : index
    %c0_45 = arith.constant 0 : index
    %110 = vector.load %arg9[%c0_44, %c0_45] : memref<32x64xf32, #tpu.memory_space<vmem>>, vector<32x64xf32>
    %cst_46 = arith.constant dense<0.000000e+00> : vector<8x64xf32>
    %111 = tpu.matmul %3, %110, %cst_46 {dimension_numbers = #tpu.dot_dimension_numbers<[1], [0], [0], [1], [0, 0, 1, 1], [], []>} : vector<8x32xf32>, vector<32x64xf32>, vector<8x64xf32> -> vector<8x64xf32>
    %c0_47 = arith.constant 0 : index
    %c0_48 = arith.constant 0 : index
    %112 = vector.load %arg10[%c0_47, %c0_48] : memref<1x64xf32, #tpu.memory_space<vmem>>, vector<1x64xf32>
    %113 = vector.broadcast %112 : vector<1x64xf32> to vector<8x64xf32>
    %114 = arith.addf %111, %113 : vector<8x64xf32>
    %115 = vector.extract_strided_slice %114 {offsets = [0, 0], sizes = [8, 32], strides = [1, 1]} : vector<8x64xf32> to vector<8x32xf32>
    %116 = vector.extract_strided_slice %114 {offsets = [0, 32], sizes = [8, 32], strides = [1, 1]} : vector<8x64xf32> to vector<8x32xf32>
    %117 = vector.shape_cast %109 : vector<8x32xf32> to vector<1x8x32xf32>
    %118 = vector.shape_cast %115 : vector<8x32xf32> to vector<1x8x32xf32>
    %119 = vector.shape_cast %116 : vector<8x32xf32> to vector<1x8x32xf32>
    %120 = vector.extract_strided_slice %117 {offsets = [0, 0, 0], sizes = [1, 8, 8], strides = [1, 1, 1]} : vector<1x8x32xf32> to vector<1x8x8xf32>
    %121 = vector.extract_strided_slice %118 {offsets = [0, 0, 0], sizes = [1, 8, 8], strides = [1, 1, 1]} : vector<1x8x32xf32> to vector<1x8x8xf32>
    "tpu.trace_start"() <{level = 10 : i32, message = "bqd,bkd->bqk"}> : () -> ()
    %cst_49 = arith.constant dense<0.000000e+00> : vector<1x8x8xf32>
    %122 = tpu.matmul %120, %121, %cst_49 {dimension_numbers = #tpu.dot_dimension_numbers<[2], [2], [1], [1], [0, 0, 0, 1, 1, 1], [0], [0]>} : vector<1x8x8xf32>, vector<1x8x8xf32>, vector<1x8x8xf32> -> vector<1x8x8xf32>
    "tpu.trace_stop"() : () -> ()
    %cst_50 = arith.constant dense<0xFF800000> : vector<1x8xf32>
    %123 = vector.multi_reduction <maximumf>, %122, %cst_50 [2] : vector<1x8x8xf32> to vector<1x8xf32>
    %124 = vector.shape_cast %123 : vector<1x8xf32> to vector<1x8x1xf32>
    %125 = vector.broadcast %124 : vector<1x8x1xf32> to vector<1x8x8xf32>
    %126 = arith.subf %122, %125 : vector<1x8x8xf32>
    %127 = math.exp %126 : vector<1x8x8xf32>
    %cst_51 = arith.constant dense<0.000000e+00> : vector<1x8xf32>
    %128 = vector.multi_reduction <add>, %127, %cst_51 [2] : vector<1x8x8xf32> to vector<1x8xf32>
    %129 = vector.shape_cast %128 : vector<1x8xf32> to vector<1x8x1xf32>
    %130 = tpu.reciprocal %129 {approx = true} : vector<1x8x1xf32> -> vector<1x8x1xf32>
    %131 = vector.broadcast %130 : vector<1x8x1xf32> to vector<1x8x8xf32>
    %132 = arith.mulf %127, %131 : vector<1x8x8xf32>
    %133 = vector.extract_strided_slice %119 {offsets = [0, 0, 0], sizes = [1, 8, 8], strides = [1, 1, 1]} : vector<1x8x32xf32> to vector<1x8x8xf32>
    "tpu.trace_start"() <{level = 10 : i32, message = "bqk,bkd->bqd"}> : () -> ()
    %cst_52 = arith.constant dense<0.000000e+00> : vector<1x8x8xf32>
    %134 = tpu.matmul %132, %133, %cst_52 {dimension_numbers = #tpu.dot_dimension_numbers<[2], [1], [1], [2], [0, 0, 0, 1, 1, 2], [0], [0]>} : vector<1x8x8xf32>, vector<1x8x8xf32>, vector<1x8x8xf32> -> vector<1x8x8xf32>
    "tpu.trace_stop"() : () -> ()
    %135 = vector.extract_strided_slice %117 {offsets = [0, 0, 8], sizes = [1, 8, 8], strides = [1, 1, 1]} : vector<1x8x32xf32> to vector<1x8x8xf32>
    %136 = vector.extract_strided_slice %118 {offsets = [0, 0, 8], sizes = [1, 8, 8], strides = [1, 1, 1]} : vector<1x8x32xf32> to vector<1x8x8xf32>
    "tpu.trace_start"() <{level = 10 : i32, message = "bqd,bkd->bqk"}> : () -> ()
    %cst_53 = arith.constant dense<0.000000e+00> : vector<1x8x8xf32>
    %137 = tpu.matmul %135, %136, %cst_53 {dimension_numbers = #tpu.dot_dimension_numbers<[2], [2], [1], [1], [0, 0, 0, 1, 1, 1], [0], [0]>} : vector<1x8x8xf32>, vector<1x8x8xf32>, vector<1x8x8xf32> -> vector<1x8x8xf32>
    "tpu.trace_stop"() : () -> ()
    %cst_54 = arith.constant dense<0xFF800000> : vector<1x8xf32>
    %138 = vector.multi_reduction <maximumf>, %137, %cst_54 [2] : vector<1x8x8xf32> to vector<1x8xf32>
    %139 = vector.shape_cast %138 : vector<1x8xf32> to vector<1x8x1xf32>
    %140 = vector.broadcast %139 : vector<1x8x1xf32> to vector<1x8x8xf32>
    %141 = arith.subf %137, %140 : vector<1x8x8xf32>
    %142 = math.exp %141 : vector<1x8x8xf32>
    %cst_55 = arith.constant dense<0.000000e+00> : vector<1x8xf32>
    %143 = vector.multi_reduction <add>, %142, %cst_55 [2] : vector<1x8x8xf32> to vector<1x8xf32>
    %144 = vector.shape_cast %143 : vector<1x8xf32> to vector<1x8x1xf32>
    %145 = tpu.reciprocal %144 {approx = true} : vector<1x8x1xf32> -> vector<1x8x1xf32>
    %146 = vector.broadcast %145 : vector<1x8x1xf32> to vector<1x8x8xf32>
    %147 = arith.mulf %142, %146 : vector<1x8x8xf32>
    %148 = vector.extract_strided_slice %119 {offsets = [0, 0, 8], sizes = [1, 8, 8], strides = [1, 1, 1]} : vector<1x8x32xf32> to vector<1x8x8xf32>
    "tpu.trace_start"() <{level = 10 : i32, message = "bqk,bkd->bqd"}> : () -> ()
    %cst_56 = arith.constant dense<0.000000e+00> : vector<1x8x8xf32>
    %149 = tpu.matmul %147, %148, %cst_56 {dimension_numbers = #tpu.dot_dimension_numbers<[2], [1], [1], [2], [0, 0, 0, 1, 1, 2], [0], [0]>} : vector<1x8x8xf32>, vector<1x8x8xf32>, vector<1x8x8xf32> -> vector<1x8x8xf32>
    "tpu.trace_stop"() : () -> ()
    %150 = vector.extract_strided_slice %117 {offsets = [0, 0, 16], sizes = [1, 8, 8], strides = [1, 1, 1]} : vector<1x8x32xf32> to vector<1x8x8xf32>
    %151 = vector.extract_strided_slice %118 {offsets = [0, 0, 16], sizes = [1, 8, 8], strides = [1, 1, 1]} : vector<1x8x32xf32> to vector<1x8x8xf32>
    "tpu.trace_start"() <{level = 10 : i32, message = "bqd,bkd->bqk"}> : () -> ()
    %cst_57 = arith.constant dense<0.000000e+00> : vector<1x8x8xf32>
    %152 = tpu.matmul %150, %151, %cst_57 {dimension_numbers = #tpu.dot_dimension_numbers<[2], [2], [1], [1], [0, 0, 0, 1, 1, 1], [0], [0]>} : vector<1x8x8xf32>, vector<1x8x8xf32>, vector<1x8x8xf32> -> vector<1x8x8xf32>
    "tpu.trace_stop"() : () -> ()
    %cst_58 = arith.constant dense<0xFF800000> : vector<1x8xf32>
    %153 = vector.multi_reduction <maximumf>, %152, %cst_58 [2] : vector<1x8x8xf32> to vector<1x8xf32>
    %154 = vector.shape_cast %153 : vector<1x8xf32> to vector<1x8x1xf32>
    %155 = vector.broadcast %154 : vector<1x8x1xf32> to vector<1x8x8xf32>
    %156 = arith.subf %152, %155 : vector<1x8x8xf32>
    %157 = math.exp %156 : vector<1x8x8xf32>
    %cst_59 = arith.constant dense<0.000000e+00> : vector<1x8xf32>
    %158 = vector.multi_reduction <add>, %157, %cst_59 [2] : vector<1x8x8xf32> to vector<1x8xf32>
    %159 = vector.shape_cast %158 : vector<1x8xf32> to vector<1x8x1xf32>
    %160 = tpu.reciprocal %159 {approx = true} : vector<1x8x1xf32> -> vector<1x8x1xf32>
    %161 = vector.broadcast %160 : vector<1x8x1xf32> to vector<1x8x8xf32>
    %162 = arith.mulf %157, %161 : vector<1x8x8xf32>
    %163 = vector.extract_strided_slice %119 {offsets = [0, 0, 16], sizes = [1, 8, 8], strides = [1, 1, 1]} : vector<1x8x32xf32> to vector<1x8x8xf32>
    "tpu.trace_start"() <{level = 10 : i32, message = "bqk,bkd->bqd"}> : () -> ()
    %cst_60 = arith.constant dense<0.000000e+00> : vector<1x8x8xf32>
    %164 = tpu.matmul %162, %163, %cst_60 {dimension_numbers = #tpu.dot_dimension_numbers<[2], [1], [1], [2], [0, 0, 0, 1, 1, 2], [0], [0]>} : vector<1x8x8xf32>, vector<1x8x8xf32>, vector<1x8x8xf32> -> vector<1x8x8xf32>
    "tpu.trace_stop"() : () -> ()
    %165 = vector.extract_strided_slice %117 {offsets = [0, 0, 24], sizes = [1, 8, 8], strides = [1, 1, 1]} : vector<1x8x32xf32> to vector<1x8x8xf32>
    %166 = vector.extract_strided_slice %118 {offsets = [0, 0, 24], sizes = [1, 8, 8], strides = [1, 1, 1]} : vector<1x8x32xf32> to vector<1x8x8xf32>
    "tpu.trace_start"() <{level = 10 : i32, message = "bqd,bkd->bqk"}> : () -> ()
    %cst_61 = arith.constant dense<0.000000e+00> : vector<1x8x8xf32>
    %167 = tpu.matmul %165, %166, %cst_61 {dimension_numbers = #tpu.dot_dimension_numbers<[2], [2], [1], [1], [0, 0, 0, 1, 1, 1], [0], [0]>} : vector<1x8x8xf32>, vector<1x8x8xf32>, vector<1x8x8xf32> -> vector<1x8x8xf32>
    "tpu.trace_stop"() : () -> ()
    %cst_62 = arith.constant dense<0xFF800000> : vector<1x8xf32>
    %168 = vector.multi_reduction <maximumf>, %167, %cst_62 [2] : vector<1x8x8xf32> to vector<1x8xf32>
    %169 = vector.shape_cast %168 : vector<1x8xf32> to vector<1x8x1xf32>
    %170 = vector.broadcast %169 : vector<1x8x1xf32> to vector<1x8x8xf32>
    %171 = arith.subf %167, %170 : vector<1x8x8xf32>
    %172 = math.exp %171 : vector<1x8x8xf32>
    %cst_63 = arith.constant dense<0.000000e+00> : vector<1x8xf32>
    %173 = vector.multi_reduction <add>, %172, %cst_63 [2] : vector<1x8x8xf32> to vector<1x8xf32>
    %174 = vector.shape_cast %173 : vector<1x8xf32> to vector<1x8x1xf32>
    %175 = tpu.reciprocal %174 {approx = true} : vector<1x8x1xf32> -> vector<1x8x1xf32>
    %176 = vector.broadcast %175 : vector<1x8x1xf32> to vector<1x8x8xf32>
    %177 = arith.mulf %172, %176 : vector<1x8x8xf32>
    %178 = vector.extract_strided_slice %119 {offsets = [0, 0, 24], sizes = [1, 8, 8], strides = [1, 1, 1]} : vector<1x8x32xf32> to vector<1x8x8xf32>
    "tpu.trace_start"() <{level = 10 : i32, message = "bqk,bkd->bqd"}> : () -> ()
    %cst_64 = arith.constant dense<0.000000e+00> : vector<1x8x8xf32>
    %179 = tpu.matmul %177, %178, %cst_64 {dimension_numbers = #tpu.dot_dimension_numbers<[2], [1], [1], [2], [0, 0, 0, 1, 1, 2], [0], [0]>} : vector<1x8x8xf32>, vector<1x8x8xf32>, vector<1x8x8xf32> -> vector<1x8x8xf32>
    "tpu.trace_stop"() : () -> ()
    %180 = tpu.concatenate %134, %149, %164, %179 in 2 : vector<1x8x8xf32>, vector<1x8x8xf32>, vector<1x8x8xf32>, vector<1x8x8xf32> -> vector<1x8x32xf32>
    %181 = vector.shape_cast %180 : vector<1x8x32xf32> to vector<8x32xf32>
    %c0_65 = arith.constant 0 : index
    %c0_66 = arith.constant 0 : index
    %182 = vector.load %arg11[%c0_65, %c0_66] : memref<32x32xf32, #tpu.memory_space<vmem>>, vector<32x32xf32>
    %cst_67 = arith.constant dense<0.000000e+00> : vector<8x32xf32>
    %183 = tpu.matmul %181, %182, %cst_67 {dimension_numbers = #tpu.dot_dimension_numbers<[1], [0], [0], [1], [0, 0, 1, 1], [], []>} : vector<8x32xf32>, vector<32x32xf32>, vector<8x32xf32> -> vector<8x32xf32>
    %c0_68 = arith.constant 0 : index
    %c0_69 = arith.constant 0 : index
    %184 = vector.load %arg12[%c0_68, %c0_69] : memref<1x32xf32, #tpu.memory_space<vmem>>, vector<1x32xf32>
    %185 = vector.broadcast %184 : vector<1x32xf32> to vector<8x32xf32>
    %186 = arith.addf %183, %185 : vector<8x32xf32>
    %187 = arith.addf %104, %186 : vector<8x32xf32>
    %cst_70 = arith.constant dense<0.000000e+00> : vector<8xf32>
    %188 = vector.multi_reduction <add>, %187, %cst_70 [1] : vector<8x32xf32> to vector<8xf32>
    %189 = vector.shape_cast %188 : vector<8xf32> to vector<8x1xf32>
    %cst_71 = arith.constant 3.200000e+01 : f32
    %190 = vector.broadcast %cst_71 : f32 to vector<8x1xf32>
    %191 = arith.divf %189, %190 : vector<8x1xf32>
    %192 = vector.broadcast %191 : vector<8x1xf32> to vector<8x32xf32>
    %193 = arith.subf %187, %192 : vector<8x32xf32>
    %194 = arith.mulf %193, %193 : vector<8x32xf32>
    %cst_72 = arith.constant dense<0.000000e+00> : vector<8xf32>
    %195 = vector.multi_reduction <add>, %194, %cst_72 [1] : vector<8x32xf32> to vector<8xf32>
    %196 = vector.shape_cast %195 : vector<8xf32> to vector<8x1xf32>
    %cst_73 = arith.constant 3.200000e+01 : f32
    %197 = vector.broadcast %cst_73 : f32 to vector<8x1xf32>
    %198 = arith.divf %196, %197 : vector<8x1xf32>
    %cst_74 = arith.constant 9.99999974E-6 : f32
    %199 = vector.broadcast %cst_74 : f32 to vector<8x1xf32>
    %200 = arith.addf %198, %199 : vector<8x1xf32>
    %201 = math.rsqrt %200 : vector<8x1xf32>
    %202 = vector.broadcast %201 : vector<8x1xf32> to vector<8x32xf32>
    %203 = arith.mulf %193, %202 : vector<8x32xf32>
    %c0_75 = arith.constant 0 : index
    %c0_76 = arith.constant 0 : index
    %204 = vector.load %arg19[%c0_75, %c0_76] : memref<1x32xf32, #tpu.memory_space<vmem>>, vector<1x32xf32>
    %205 = vector.broadcast %204 : vector<1x32xf32> to vector<8x32xf32>
    %206 = arith.mulf %203, %205 : vector<8x32xf32>
    %c0_77 = arith.constant 0 : index
    %c0_78 = arith.constant 0 : index
    %207 = vector.load %arg20[%c0_77, %c0_78] : memref<1x32xf32, #tpu.memory_space<vmem>>, vector<1x32xf32>
    %208 = vector.broadcast %207 : vector<1x32xf32> to vector<8x32xf32>
    %209 = arith.addf %206, %208 : vector<8x32xf32>
    %c0_79 = arith.constant 0 : index
    %c0_80 = arith.constant 0 : index
    %210 = vector.load %arg13[%c0_79, %c0_80] : memref<32x64xf32, #tpu.memory_space<vmem>>, vector<32x64xf32>
    %cst_81 = arith.constant dense<0.000000e+00> : vector<8x64xf32>
    %211 = tpu.matmul %209, %210, %cst_81 {dimension_numbers = #tpu.dot_dimension_numbers<[1], [0], [0], [1], [0, 0, 1, 1], [], []>} : vector<8x32xf32>, vector<32x64xf32>, vector<8x64xf32> -> vector<8x64xf32>
    %c0_82 = arith.constant 0 : index
    %c0_83 = arith.constant 0 : index
    %212 = vector.load %arg14[%c0_82, %c0_83] : memref<1x64xf32, #tpu.memory_space<vmem>>, vector<1x64xf32>
    %213 = vector.broadcast %212 : vector<1x64xf32> to vector<8x64xf32>
    %214 = arith.addf %211, %213 : vector<8x64xf32>
    %cst_84 = arith.constant 0.000000e+00 : f32
    %215 = vector.broadcast %cst_84 : f32 to vector<8x64xf32>
    %216 = arith.maximumf %214, %215 : vector<8x64xf32>
    %c0_85 = arith.constant 0 : index
    %c0_86 = arith.constant 0 : index
    %217 = vector.load %arg15[%c0_85, %c0_86] : memref<64x32xf32, #tpu.memory_space<vmem>>, vector<64x32xf32>
    %cst_87 = arith.constant dense<0.000000e+00> : vector<8x32xf32>
    %218 = tpu.matmul %216, %217, %cst_87 {dimension_numbers = #tpu.dot_dimension_numbers<[1], [0], [0], [1], [0, 0, 1, 1], [], []>} : vector<8x64xf32>, vector<64x32xf32>, vector<8x32xf32> -> vector<8x32xf32>
    %c0_88 = arith.constant 0 : index
    %c0_89 = arith.constant 0 : index
    %219 = vector.load %arg16[%c0_88, %c0_89] : memref<1x32xf32, #tpu.memory_space<vmem>>, vector<1x32xf32>
    %220 = vector.broadcast %219 : vector<1x32xf32> to vector<8x32xf32>
    %221 = arith.addf %218, %220 : vector<8x32xf32>
    %222 = arith.addf %209, %221 : vector<8x32xf32>
    %cst_90 = arith.constant dense<0.000000e+00> : vector<8xf32>
    %223 = vector.multi_reduction <add>, %222, %cst_90 [1] : vector<8x32xf32> to vector<8xf32>
    %224 = vector.shape_cast %223 : vector<8xf32> to vector<8x1xf32>
    %cst_91 = arith.constant 3.200000e+01 : f32
    %225 = vector.broadcast %cst_91 : f32 to vector<8x1xf32>
    %226 = arith.divf %224, %225 : vector<8x1xf32>
    %227 = vector.broadcast %226 : vector<8x1xf32> to vector<8x32xf32>
    %228 = arith.subf %222, %227 : vector<8x32xf32>
    %229 = arith.mulf %228, %228 : vector<8x32xf32>
    %cst_92 = arith.constant dense<0.000000e+00> : vector<8xf32>
    %230 = vector.multi_reduction <add>, %229, %cst_92 [1] : vector<8x32xf32> to vector<8xf32>
    %231 = vector.shape_cast %230 : vector<8xf32> to vector<8x1xf32>
    %cst_93 = arith.constant 3.200000e+01 : f32
    %232 = vector.broadcast %cst_93 : f32 to vector<8x1xf32>
    %233 = arith.divf %231, %232 : vector<8x1xf32>
    %cst_94 = arith.constant 9.99999974E-6 : f32
    %234 = vector.broadcast %cst_94 : f32 to vector<8x1xf32>
    %235 = arith.addf %233, %234 : vector<8x1xf32>
    %236 = math.rsqrt %235 : vector<8x1xf32>
    %237 = vector.broadcast %236 : vector<8x1xf32> to vector<8x32xf32>
    %238 = arith.mulf %228, %237 : vector<8x32xf32>
    %c0_95 = arith.constant 0 : index
    %c0_96 = arith.constant 0 : index
    %239 = vector.load %arg21[%c0_95, %c0_96] : memref<1x32xf32, #tpu.memory_space<vmem>>, vector<1x32xf32>
    %240 = vector.broadcast %239 : vector<1x32xf32> to vector<8x32xf32>
    %241 = arith.mulf %238, %240 : vector<8x32xf32>
    %c0_97 = arith.constant 0 : index
    %c0_98 = arith.constant 0 : index
    %242 = vector.load %arg22[%c0_97, %c0_98] : memref<1x32xf32, #tpu.memory_space<vmem>>, vector<1x32xf32>
    %243 = vector.broadcast %242 : vector<1x32xf32> to vector<8x32xf32>
    %244 = arith.addf %241, %243 : vector<8x32xf32>
    %245 = vector.shape_cast %244 : vector<8x32xf32> to vector<1x8x32xf32>
    %c0_99 = arith.constant 0 : index
    %c0_100 = arith.constant 0 : index
    %c0_101 = arith.constant 0 : index
    %246 = vector.load %arg23[%c0_99, %c0_100, %c0_101] : memref<1x8x32xf32, #tpu.memory_space<vmem>>, vector<1x8x32xf32>
    tpu.vector_store %arg23[%c0_99, %c0_100, %c0_101], %245 {strides = array<i32>} : memref<1x8x32xf32, #tpu.memory_space<vmem>>, vector<1x8x32xf32>,
    return
  }
  func.func @transform_0(%arg0: i32) -> (i32, i32, i32) {
    %c0_i32 = arith.constant 0 : i32
    %c0_i32_0 = arith.constant 0 : i32
    %c0_i32_1 = arith.constant 0 : i32
    return %arg0, %c0_i32, %c0_i32_0 : i32, i32, i32
  }
  func.func @transform_1(%arg0: i32) -> (i32, i32, i32) {
    %c0_i32 = arith.constant 0 : i32
    %c0_i32_0 = arith.constant 0 : i32
    %c0_i32_1 = arith.constant 0 : i32
    return %arg0, %c0_i32, %c0_i32_0 : i32, i32, i32
  }
  func.func @transform_2(%arg0: i32) -> (i32, i32) {
    %c0_i32 = arith.constant 0 : i32
    %c0_i32_0 = arith.constant 0 : i32
    %c0_i32_1 = arith.constant 0 : i32
    return %c0_i32, %c0_i32_0 : i32, i32
  }
  func.func @transform_3(%arg0: i32) -> (i32, i32) {
    %c0_i32 = arith.constant 0 : i32
    %c0_i32_0 = arith.constant 0 : i32
    %c0_i32_1 = arith.constant 0 : i32
    return %c0_i32, %c0_i32_0 : i32, i32
  }
  func.func @transform_4(%arg0: i32) -> (i32, i32) {
    %c0_i32 = arith.constant 0 : i32
    %c0_i32_0 = arith.constant 0 : i32
    %c0_i32_1 = arith.constant 0 : i32
    return %c0_i32, %c0_i32_0 : i32, i32
  }
  func.func @transform_5(%arg0: i32) -> (i32, i32) {
    %c0_i32 = arith.constant 0 : i32
    %c0_i32_0 = arith.constant 0 : i32
    %c0_i32_1 = arith.constant 0 : i32
    return %c0_i32, %c0_i32_0 : i32, i32
  }
  func.func @transform_6(%arg0: i32) -> (i32, i32) {
    %c0_i32 = arith.constant 0 : i32
    %c0_i32_0 = arith.constant 0 : i32
    %c0_i32_1 = arith.constant 0 : i32
    return %c0_i32, %c0_i32_0 : i32, i32
  }
  func.func @transform_7(%arg0: i32) -> (i32, i32) {
    %c0_i32 = arith.constant 0 : i32
    %c0_i32_0 = arith.constant 0 : i32
    %c0_i32_1 = arith.constant 0 : i32
    return %c0_i32, %c0_i32_0 : i32, i32
  }
  func.func @transform_8(%arg0: i32) -> (i32, i32) {
    %c0_i32 = arith.constant 0 : i32
    %c0_i32_0 = arith.constant 0 : i32
    %c0_i32_1 = arith.constant 0 : i32
    return %c0_i32, %c0_i32_0 : i32, i32
  }
  func.func @transform_9(%arg0: i32) -> (i32, i32) {
    %c0_i32 = arith.constant 0 : i32
    %c0_i32_0 = arith.constant 0 : i32
    %c0_i32_1 = arith.constant 0 : i32
    return %c0_i32, %c0_i32_0 : i32, i32
  }
  func.func @transform_10(%arg0: i32) -> (i32, i32) {
    %c0_i32 = arith.constant 0 : i32
    %c0_i32_0 = arith.constant 0 : i32
    %c0_i32_1 = arith.constant 0 : i32
    return %c0_i32, %c0_i32_0 : i32, i32
  }
  func.func @transform_11(%arg0: i32) -> (i32, i32) {
    %c0_i32 = arith.constant 0 : i32
    %c0_i32_0 = arith.constant 0 : i32
    %c0_i32_1 = arith.constant 0 : i32
    return %c0_i32, %c0_i32_0 : i32, i32
  }
  func.func @transform_12(%arg0: i32) -> (i32, i32) {
    %c0_i32 = arith.constant 0 : i32
    %c0_i32_0 = arith.constant 0 : i32
    %c0_i32_1 = arith.constant 0 : i32
    return %c0_i32, %c0_i32_0 : i32, i32
  }
  func.func @transform_13(%arg0: i32) -> (i32, i32) {
    %c0_i32 = arith.constant 0 : i32
    %c0_i32_0 = arith.constant 0 : i32
    %c0_i32_1 = arith.constant 0 : i32
    return %c0_i32, %c0_i32_0 : i32, i32
  }
  func.func @transform_14(%arg0: i32) -> (i32, i32) {
    %c0_i32 = arith.constant 0 : i32
    %c0_i32_0 = arith.constant 0 : i32
    %c0_i32_1 = arith.constant 0 : i32
    return %c0_i32, %c0_i32_0 : i32, i32
  }
  func.func @transform_15(%arg0: i32) -> (i32, i32) {
    %c0_i32 = arith.constant 0 : i32
    %c0_i32_0 = arith.constant 0 : i32
    %c0_i32_1 = arith.constant 0 : i32
    return %c0_i32, %c0_i32_0 : i32, i32
  }
  func.func @transform_16(%arg0: i32) -> (i32, i32) {
    %c0_i32 = arith.constant 0 : i32
    %c0_i32_0 = arith.constant 0 : i32
    %c0_i32_1 = arith.constant 0 : i32
    return %c0_i32, %c0_i32_0 : i32, i32
  }
  func.func @transform_17(%arg0: i32) -> (i32, i32) {
    %c0_i32 = arith.constant 0 : i32
    %c0_i32_0 = arith.constant 0 : i32
    %c0_i32_1 = arith.constant 0 : i32
    return %c0_i32, %c0_i32_0 : i32, i32
  }
  func.func @transform_18(%arg0: i32) -> (i32, i32) {
    %c0_i32 = arith.constant 0 : i32
    %c0_i32_0 = arith.constant 0 : i32
    %c0_i32_1 = arith.constant 0 : i32
    return %c0_i32, %c0_i32_0 : i32, i32
  }
  func.func @transform_19(%arg0: i32) -> (i32, i32) {
    %c0_i32 = arith.constant 0 : i32
    %c0_i32_0 = arith.constant 0 : i32
    %c0_i32_1 = arith.constant 0 : i32
    return %c0_i32, %c0_i32_0 : i32, i32
  }
  func.func @transform_20(%arg0: i32) -> (i32, i32) {
    %c0_i32 = arith.constant 0 : i32
    %c0_i32_0 = arith.constant 0 : i32
    %c0_i32_1 = arith.constant 0 : i32
    return %c0_i32, %c0_i32_0 : i32, i32
  }
  func.func @transform_21(%arg0: i32) -> (i32, i32) {
    %c0_i32 = arith.constant 0 : i32
    %c0_i32_0 = arith.constant 0 : i32
    %c0_i32_1 = arith.constant 0 : i32
    return %c0_i32, %c0_i32_0 : i32, i32
  }
  func.func @transform_22(%arg0: i32) -> (i32, i32, i32) {
    %c0_i32 = arith.constant 0 : i32
    %c0_i32_0 = arith.constant 0 : i32
    %c0_i32_1 = arith.constant 0 : i32
    return %arg0, %c0_i32, %c0_i32_0 : i32, i32, i32
  }
}

module attributes {stable_mosaic.version = 11 : i64} {
  func.func @_decoder_block_kernel(%arg0: i32, %arg1: memref<1x8x32xf32, #tpu.memory_space<vmem>>, %arg2: memref<1x8x32xf32, #tpu.memory_space<vmem>>, %arg3: memref<32x96xf32, #tpu.memory_space<vmem>>, %arg4: memref<1x96xf32, #tpu.memory_space<vmem>>, %arg5: memref<32x32xf32, #tpu.memory_space<vmem>>, %arg6: memref<1x32xf32, #tpu.memory_space<vmem>>, %arg7: memref<32x32xf32, #tpu.memory_space<vmem>>, %arg8: memref<1x32xf32, #tpu.memory_space<vmem>>, %arg9: memref<32x64xf32, #tpu.memory_space<vmem>>, %arg10: memref<1x64xf32, #tpu.memory_space<vmem>>, %arg11: memref<32x32xf32, #tpu.memory_space<vmem>>, %arg12: memref<1x32xf32, #tpu.memory_space<vmem>>, %arg13: memref<32x64xf32, #tpu.memory_space<vmem>>, %arg14: memref<1x64xf32, #tpu.memory_space<vmem>>, %arg15: memref<64x32xf32, #tpu.memory_space<vmem>>, %arg16: memref<1x32xf32, #tpu.memory_space<vmem>>, %arg17: memref<1x32xf32, #tpu.memory_space<vmem>>, %arg18: memref<1x32xf32, #tpu.memory_space<vmem>>, %arg19: memref<1x32xf32, #tpu.memory_space<vmem>>, %arg20: memref<1x32xf32, #tpu.memory_space<vmem>>, %arg21: memref<1x32xf32, #tpu.memory_space<vmem>>, %arg22: memref<1x32xf32, #tpu.memory_space<vmem>>, %arg23: memref<1x8x32xf32, #tpu.memory_space<vmem>>) attributes {dimension_semantics = [#tpu.dimension_semantics<parallel>], iteration_bounds = array<i64: 2>, scalar_prefetch = 0 : i64, scratch_operands = 0 : i64, tpu.core_type = #tpu.core_type<tc>, window_params = [{transform_indices = @transform_0, window_bounds = array<i64: 1, 8, 32>}, {transform_indices = @transform_1, window_bounds = array<i64: 1, 8, 32>}, {pipeline_mode = #tpu.pipeline_mode<synchronous>, transform_indices = @transform_2, window_bounds = array<i64: 32, 96>}, {pipeline_mode = #tpu.pipeline_mode<synchronous>, transform_indices = @transform_3, window_bounds = array<i64: 1, 96>}, {pipeline_mode = #tpu.pipeline_mode<synchronous>, transform_indices = @transform_4, window_bounds = array<i64: 32, 32>}, {pipeline_mode = #tpu.pipeline_mode<synchronous>, transform_indices = @transform_5, window_bounds = array<i64: 1, 32>}, {pipeline_mode = #tpu.pipeline_mode<synchronous>, transform_indices = @transform_6, window_bounds = array<i64: 32, 32>}, {pipeline_mode = #tpu.pipeline_mode<synchronous>, transform_indices = @transform_7, window_bounds = array<i64: 1, 32>}, {pipeline_mode = #tpu.pipeline_mode<synchronous>, transform_indices = @transform_8, window_bounds = array<i64: 32, 64>}, {pipeline_mode = #tpu.pipeline_mode<synchronous>, transform_indices = @transform_9, window_bounds = array<i64: 1, 64>}, {pipeline_mode = #tpu.pipeline_mode<synchronous>, transform_indices = @transform_10, window_bounds = array<i64: 32, 32>}, {pipeline_mode = #tpu.pipeline_mode<synchronous>, transform_indices = @transform_11, window_bounds = array<i64: 1, 32>}, {pipeline_mode = #tpu.pipeline_mode<synchronous>, transform_indices = @transform_12, window_bounds = array<i64: 32, 64>}, {pipeline_mode = #tpu.pipeline_mode<synchronous>, transform_indices = @transform_13, window_bounds = array<i64: 1, 64>}, {pipeline_mode = #tpu.pipeline_mode<synchronous>, transform_indices = @transform_14, window_bounds = array<i64: 64, 32>}, {pipeline_mode = #tpu.pipeline_mode<synchronous>, transform_indices = @transform_15, window_bounds = array<i64: 1, 32>}, {pipeline_mode = #tpu.pipeline_mode<synchronous>, transform_indices = @transform_16, window_bounds = array<i64: 1, 32>}, {pipeline_mode = #tpu.pipeline_mode<synchronous>, transform_indices = @transform_17, window_bounds = array<i64: 1, 32>}, {pipeline_mode = #tpu.pipeline_mode<synchronous>, transform_indices = @transform_18, window_bounds = array<i64: 1, 32>}, {pipeline_mode = #tpu.pipeline_mode<synchronous>, transform_indices = @transform_19, window_bounds = array<i64: 1, 32>}, {pipeline_mode = #tpu.pipeline_mode<synchronous>, transform_indices = @transform_20, window_bounds = array<i64: 1, 32>}, {pipeline_mode = #tpu.pipeline_mode<synchronous>, transform_indices = @transform_21, window_bounds = array<i64: 1, 32>}, {transform_indices = @transform_22, window_bounds = array<i64: 1, 8, 32>}]} {
    %c0 = arith.constant 0 : index
    %c0_0 = arith.constant 0 : index
    %c0_1 = arith.constant 0 : index
    %0 = vector.load %arg1[%c0, %c0_0, %c0_1] : memref<1x8x32xf32, #tpu.memory_space<vmem>>, vector<1x8x32xf32>
    %c0_2 = arith.constant 0 : index
    %c0_3 = arith.constant 0 : index
    %c0_4 = arith.constant 0 : index
    %1 = vector.load %arg2[%c0_2, %c0_3, %c0_4] : memref<1x8x32xf32, #tpu.memory_space<vmem>>, vector<1x8x32xf32>
    %2 = vector.shape_cast %0 : vector<1x8x32xf32> to vector<8x32xf32>
    %3 = vector.shape_cast %1 : vector<1x8x32xf32> to vector<8x32xf32>
    %c0_5 = arith.constant 0 : index
    %c0_6 = arith.constant 0 : index
    %4 = vector.load %arg3[%c0_5, %c0_6] : memref<32x96xf32, #tpu.memory_space<vmem>>, vector<32x96xf32>
    %cst = arith.constant dense<0.000000e+00> : vector<8x96xf32>
    %5 = tpu.matmul %2, %4, %cst {dimension_numbers = #tpu.dot_dimension_numbers<[1], [0], [0], [1], [0, 0, 1, 1], [], []>} : vector<8x32xf32>, vector<32x96xf32>, vector<8x96xf32> -> vector<8x96xf32>
    %c0_7 = arith.constant 0 : index
    %c0_8 = arith.constant 0 : index
    %6 = vector.load %arg4[%c0_7, %c0_8] : memref<1x96xf32, #tpu.memory_space<vmem>>, vector<1x96xf32>
    %7 = vector.broadcast %6 : vector<1x96xf32> to vector<8x96xf32>
    %8 = arith.addf %5, %7 : vector<8x96xf32>
    %9 = vector.extract_strided_slice %8 {offsets = [0, 0], sizes = [8, 32], strides = [1, 1]} : vector<8x96xf32> to vector<8x32xf32>
    %10 = vector.extract_strided_slice %8 {offsets = [0, 32], sizes = [8, 32], strides = [1, 1]} : vector<8x96xf32> to vector<8x32xf32>
    %11 = vector.extract_strided_slice %8 {offsets = [0, 64], sizes = [8, 32], strides = [1, 1]} : vector<8x96xf32> to vector<8x32xf32>
    %12 = vector.shape_cast %9 : vector<8x32xf32> to vector<1x8x32xf32>
    %13 = vector.shape_cast %10 : vector<8x32xf32> to vector<1x8x32xf32>
    %14 = vector.shape_cast %11 : vector<8x32xf32> to vector<1x8x32xf32>
    %15 = vector.extract_strided_slice %12 {offsets = [0, 0, 0], sizes = [1, 8, 8], strides = [1, 1, 1]} : vector<1x8x32xf32> to vector<1x8x8xf32>
    %16 = vector.extract_strided_slice %13 {offsets = [0, 0, 0], sizes = [1, 8, 8], strides = [1, 1, 1]} : vector<1x8x32xf32> to vector<1x8x8xf32>
    "tpu.trace_start"() <{level = 10 : i32, message = "bqd,bkd->bqk"}> : () -> ()
    %cst_9 = arith.constant dense<0.000000e+00> : vector<1x8x8xf32>
    %17 = tpu.matmul %15, %16, %cst_9 {dimension_numbers = #tpu.dot_dimension_numbers<[2], [2], [1], [1], [0, 0, 0, 1, 1, 1], [0], [0]>} : vector<1x8x8xf32>, vector<1x8x8xf32>, vector<1x8x8xf32> -> vector<1x8x8xf32>
    "tpu.trace_stop"() : () -> ()
    %cst_10 = arith.constant dense<0xFF800000> : vector<1x8xf32>
    %18 = vector.multi_reduction <maximumf>, %17, %cst_10 [2] : vector<1x8x8xf32> to vector<1x8xf32>
    %19 = vector.shape_cast %18 : vector<1x8xf32> to vector<1x8x1xf32>
    %20 = vector.broadcast %19 : vector<1x8x1xf32> to vector<1x8x8xf32>
    %21 = arith.subf %17, %20 : vector<1x8x8xf32>
    %22 = math.exp %21 : vector<1x8x8xf32>
    %cst_11 = arith.constant dense<0.000000e+00> : vector<1x8xf32>
    %23 = vector.multi_reduction <add>, %22, %cst_11 [2] : vector<1x8x8xf32> to vector<1x8xf32>
    %24 = vector.shape_cast %23 : vector<1x8xf32> to vector<1x8x1xf32>
    %25 = tpu.reciprocal %24 {approx = true} : vector<1x8x1xf32> -> vector<1x8x1xf32>
    %26 = vector.broadcast %25 : vector<1x8x1xf32> to vector<1x8x8xf32>
    %27 = arith.mulf %22, %26 : vector<1x8x8xf32>
    %28 = vector.extract_strided_slice %14 {offsets = [0, 0, 0], sizes = [1, 8, 8], strides = [1, 1, 1]} : vector<1x8x32xf32> to vector<1x8x8xf32>
    "tpu.trace_start"() <{level = 10 : i32, message = "bqk,bkd->bqd"}> : () -> ()
    %cst_12 = arith.constant dense<0.000000e+00> : vector<1x8x8xf32>
    %29 = tpu.matmul %27, %28, %cst_12 {dimension_numbers = #tpu.dot_dimension_numbers<[2], [1], [1], [2], [0, 0, 0, 1, 1, 2], [0], [0]>} : vector<1x8x8xf32>, vector<1x8x8xf32>, vector<1x8x8xf32> -> vector<1x8x8xf32>
    "tpu.trace_stop"() : () -> ()
    %30 = vector.extract_strided_slice %12 {offsets = [0, 0, 8], sizes = [1, 8, 8], strides = [1, 1, 1]} : vector<1x8x32xf32> to vector<1x8x8xf32>
    %31 = vector.extract_strided_slice %13 {offsets = [0, 0, 8], sizes = [1, 8, 8], strides = [1, 1, 1]} : vector<1x8x32xf32> to vector<1x8x8xf32>
    "tpu.trace_start"() <{level = 10 : i32, message = "bqd,bkd->bqk"}> : () -> ()
    %cst_13 = arith.constant dense<0.000000e+00> : vector<1x8x8xf32>
    %32 = tpu.matmul %30, %31, %cst_13 {dimension_numbers = #tpu.dot_dimension_numbers<[2], [2], [1], [1], [0, 0, 0, 1, 1, 1], [0], [0]>} : vector<1x8x8xf32>, vector<1x8x8xf32>, vector<1x8x8xf32> -> vector<1x8x8xf32>
    "tpu.trace_stop"() : () -> ()
    %cst_14 = arith.constant dense<0xFF800000> : vector<1x8xf32>
    %33 = vector.multi_reduction <maximumf>, %32, %cst_14 [2] : vector<1x8x8xf32> to vector<1x8xf32>
    %34 = vector.shape_cast %33 : vector<1x8xf32> to vector<1x8x1xf32>
    %35 = vector.broadcast %34 : vector<1x8x1xf32> to vector<1x8x8xf32>
    %36 = arith.subf %32, %35 : vector<1x8x8xf32>
    %37 = math.exp %36 : vector<1x8x8xf32>
    %cst_15 = arith.constant dense<0.000000e+00> : vector<1x8xf32>
    %38 = vector.multi_reduction <add>, %37, %cst_15 [2] : vector<1x8x8xf32> to vector<1x8xf32>
    %39 = vector.shape_cast %38 : vector<1x8xf32> to vector<1x8x1xf32>
    %40 = tpu.reciprocal %39 {approx = true} : vector<1x8x1xf32> -> vector<1x8x1xf32>
    %41 = vector.broadcast %40 : vector<1x8x1xf32> to vector<1x8x8xf32>
    %42 = arith.mulf %37, %41 : vector<1x8x8xf32>
    %43 = vector.extract_strided_slice %14 {offsets = [0, 0, 8], sizes = [1, 8, 8], strides = [1, 1, 1]} : vector<1x8x32xf32> to vector<1x8x8xf32>
    "tpu.trace_start"() <{level = 10 : i32, message = "bqk,bkd->bqd"}> : () -> ()
    %cst_16 = arith.constant dense<0.000000e+00> : vector<1x8x8xf32>
    %44 = tpu.matmul %42, %43, %cst_16 {dimension_numbers = #tpu.dot_dimension_numbers<[2], [1], [1], [2], [0, 0, 0, 1, 1, 2], [0], [0]>} : vector<1x8x8xf32>, vector<1x8x8xf32>, vector<1x8x8xf32> -> vector<1x8x8xf32>
    "tpu.trace_stop"() : () -> ()
    %45 = vector.extract_strided_slice %12 {offsets = [0, 0, 16], sizes = [1, 8, 8], strides = [1, 1, 1]} : vector<1x8x32xf32> to vector<1x8x8xf32>
    %46 = vector.extract_strided_slice %13 {offsets = [0, 0, 16], sizes = [1, 8, 8], strides = [1, 1, 1]} : vector<1x8x32xf32> to vector<1x8x8xf32>
    "tpu.trace_start"() <{level = 10 : i32, message = "bqd,bkd->bqk"}> : () -> ()
    %cst_17 = arith.constant dense<0.000000e+00> : vector<1x8x8xf32>
    %47 = tpu.matmul %45, %46, %cst_17 {dimension_numbers = #tpu.dot_dimension_numbers<[2], [2], [1], [1], [0, 0, 0, 1, 1, 1], [0], [0]>} : vector<1x8x8xf32>, vector<1x8x8xf32>, vector<1x8x8xf32> -> vector<1x8x8xf32>
    "tpu.trace_stop"() : () -> ()
    %cst_18 = arith.constant dense<0xFF800000> : vector<1x8xf32>
    %48 = vector.multi_reduction <maximumf>, %47, %cst_18 [2] : vector<1x8x8xf32> to vector<1x8xf32>
    %49 = vector.shape_cast %48 : vector<1x8xf32> to vector<1x8x1xf32>
    %50 = vector.broadcast %49 : vector<1x8x1xf32> to vector<1x8x8xf32>
    %51 = arith.subf %47, %50 : vector<1x8x8xf32>
    %52 = math.exp %51 : vector<1x8x8xf32>
    %cst_19 = arith.constant dense<0.000000e+00> : vector<1x8xf32>
    %53 = vector.multi_reduction <add>, %52, %cst_19 [2] : vector<1x8x8xf32> to vector<1x8xf32>
    %54 = vector.shape_cast %53 : vector<1x8xf32> to vector<1x8x1xf32>
    %55 = tpu.reciprocal %54 {approx = true} : vector<1x8x1xf32> -> vector<1x8x1xf32>
    %56 = vector.broadcast %55 : vector<1x8x1xf32> to vector<1x8x8xf32>
    %57 = arith.mulf %52, %56 : vector<1x8x8xf32>
    %58 = vector.extract_strided_slice %14 {offsets = [0, 0, 16], sizes = [1, 8, 8], strides = [1, 1, 1]} : vector<1x8x32xf32> to vector<1x8x8xf32>
    "tpu.trace_start"() <{level = 10 : i32, message = "bqk,bkd->bqd"}> : () -> ()
    %cst_20 = arith.constant dense<0.000000e+00> : vector<1x8x8xf32>
    %59 = tpu.matmul %57, %58, %cst_20 {dimension_numbers = #tpu.dot_dimension_numbers<[2], [1], [1], [2], [0, 0, 0, 1, 1, 2], [0], [0]>} : vector<1x8x8xf32>, vector<1x8x8xf32>, vector<1x8x8xf32> -> vector<1x8x8xf32>
    "tpu.trace_stop"() : () -> ()
    %60 = vector.extract_strided_slice %12 {offsets = [0, 0, 24], sizes = [1, 8, 8], strides = [1, 1, 1]} : vector<1x8x32xf32> to vector<1x8x8xf32>
    %61 = vector.extract_strided_slice %13 {offsets = [0, 0, 24], sizes = [1, 8, 8], strides = [1, 1, 1]} : vector<1x8x32xf32> to vector<1x8x8xf32>
    "tpu.trace_start"() <{level = 10 : i32, message = "bqd,bkd->bqk"}> : () -> ()
    %cst_21 = arith.constant dense<0.000000e+00> : vector<1x8x8xf32>
    %62 = tpu.matmul %60, %61, %cst_21 {dimension_numbers = #tpu.dot_dimension_numbers<[2], [2], [1], [1], [0, 0, 0, 1, 1, 1], [0], [0]>} : vector<1x8x8xf32>, vector<1x8x8xf32>, vector<1x8x8xf32> -> vector<1x8x8xf32>
    "tpu.trace_stop"() : () -> ()
    %cst_22 = arith.constant dense<0xFF800000> : vector<1x8xf32>
    %63 = vector.multi_reduction <maximumf>, %62, %cst_22 [2] : vector<1x8x8xf32> to vector<1x8xf32>
    %64 = vector.shape_cast %63 : vector<1x8xf32> to vector<1x8x1xf32>
    %65 = vector.broadcast %64 : vector<1x8x1xf32> to vector<1x8x8xf32>
    %66 = arith.subf %62, %65 : vector<1x8x8xf32>
    %67 = math.exp %66 : vector<1x8x8xf32>
    %cst_23 = arith.constant dense<0.000000e+00> : vector<1x8xf32>
    %68 = vector.multi_reduction <add>, %67, %cst_23 [2] : vector<1x8x8xf32> to vector<1x8xf32>
    %69 = vector.shape_cast %68 : vector<1x8xf32> to vector<1x8x1xf32>
    %70 = tpu.reciprocal %69 {approx = true} : vector<1x8x1xf32> -> vector<1x8x1xf32>
    %71 = vector.broadcast %70 : vector<1x8x1xf32> to vector<1x8x8xf32>
    %72 = arith.mulf %67, %71 : vector<1x8x8xf32>
    %73 = vector.extract_strided_slice %14 {offsets = [0, 0, 24], sizes = [1, 8, 8], strides = [1, 1, 1]} : vector<1x8x32xf32> to vector<1x8x8xf32>
    "tpu.trace_start"() <{level = 10 : i32, message = "bqk,bkd->bqd"}> : () -> ()
    %cst_24 = arith.constant dense<0.000000e+00> : vector<1x8x8xf32>
    %74 = tpu.matmul %72, %73, %cst_24 {dimension_numbers = #tpu.dot_dimension_numbers<[2], [1], [1], [2], [0, 0, 0, 1, 1, 2], [0], [0]>} : vector<1x8x8xf32>, vector<1x8x8xf32>, vector<1x8x8xf32> -> vector<1x8x8xf32>
    "tpu.trace_stop"() : () -> ()
    %75 = tpu.concatenate %29, %44, %59, %74 in 2 : vector<1x8x8xf32>, vector<1x8x8xf32>, vector<1x8x8xf32>, vector<1x8x8xf32> -> vector<1x8x32xf32>
    %76 = vector.shape_cast %75 : vector<1x8x32xf32> to vector<8x32xf32>
    %c0_25 = arith.constant 0 : index
    %c0_26 = arith.constant 0 : index
    %77 = vector.load %arg5[%c0_25, %c0_26] : memref<32x32xf32, #tpu.memory_space<vmem>>, vector<32x32xf32>
    %cst_27 = arith.constant dense<0.000000e+00> : vector<8x32xf32>
    %78 = tpu.matmul %76, %77, %cst_27 {dimension_numbers = #tpu.dot_dimension_numbers<[1], [0], [0], [1], [0, 0, 1, 1], [], []>} : vector<8x32xf32>, vector<32x32xf32>, vector<8x32xf32> -> vector<8x32xf32>
    %c0_28 = arith.constant 0 : index
    %c0_29 = arith.constant 0 : index
    %79 = vector.load %arg6[%c0_28, %c0_29] : memref<1x32xf32, #tpu.memory_space<vmem>>, vector<1x32xf32>
    %80 = vector.broadcast %79 : vector<1x32xf32> to vector<8x32xf32>
    %81 = arith.addf %78, %80 : vector<8x32xf32>
    %82 = arith.addf %2, %81 : vector<8x32xf32>
    %cst_30 = arith.constant dense<0.000000e+00> : vector<8xf32>
    %83 = vector.multi_reduction <add>, %82, %cst_30 [1] : vector<8x32xf32> to vector<8xf32>
    %84 = vector.shape_cast %83 : vector<8xf32> to vector<8x1xf32>
    %cst_31 = arith.constant 3.200000e+01 : f32
    %85 = vector.broadcast %cst_31 : f32 to vector<8x1xf32>
    %86 = arith.divf %84, %85 : vector<8x1xf32>
    %87 = vector.broadcast %86 : vector<8x1xf32> to vector<8x32xf32>
    %88 = arith.subf %82, %87 : vector<8x32xf32>
    %89 = arith.mulf %88, %88 : vector<8x32xf32>
    %cst_32 = arith.constant dense<0.000000e+00> : vector<8xf32>
    %90 = vector.multi_reduction <add>, %89, %cst_32 [1] : vector<8x32xf32> to vector<8xf32>
    %91 = vector.shape_cast %90 : vector<8xf32> to vector<8x1xf32>
    %cst_33 = arith.constant 3.200000e+01 : f32
    %92 = vector.broadcast %cst_33 : f32 to vector<8x1xf32>
    %93 = arith.divf %91, %92 : vector<8x1xf32>
    %cst_34 = arith.constant 9.99999974E-6 : f32
    %94 = vector.broadcast %cst_34 : f32 to vector<8x1xf32>
    %95 = arith.addf %93, %94 : vector<8x1xf32>
    %96 = math.rsqrt %95 : vector<8x1xf32>
    %97 = vector.broadcast %96 : vector<8x1xf32> to vector<8x32xf32>
    %98 = arith.mulf %88, %97 : vector<8x32xf32>
    %c0_35 = arith.constant 0 : index
    %c0_36 = arith.constant 0 : index
    %99 = vector.load %arg17[%c0_35, %c0_36] : memref<1x32xf32, #tpu.memory_space<vmem>>, vector<1x32xf32>
    %100 = vector.broadcast %99 : vector<1x32xf32> to vector<8x32xf32>
    %101 = arith.mulf %98, %100 : vector<8x32xf32>
    %c0_37 = arith.constant 0 : index
    %c0_38 = arith.constant 0 : index
    %102 = vector.load %arg18[%c0_37, %c0_38] : memref<1x32xf32, #tpu.memory_space<vmem>>, vector<1x32xf32>
    %103 = vector.broadcast %102 : vector<1x32xf32> to vector<8x32xf32>
    %104 = arith.addf %101, %103 : vector<8x32xf32>
    %c0_39 = arith.constant 0 : index
    %c0_40 = arith.constant 0 : index
    %105 = vector.load %arg7[%c0_39, %c0_40] : memref<32x32xf32, #tpu.memory_space<vmem>>, vector<32x32xf32>
    %cst_41 = arith.constant dense<0.000000e+00> : vector<8x32xf32>
    %106 = tpu.matmul %104, %105, %cst_41 {dimension_numbers = #tpu.dot_dimension_numbers<[1], [0], [0], [1], [0, 0, 1, 1], [], []>} : vector<8x32xf32>, vector<32x32xf32>, vector<8x32xf32> -> vector<8x32xf32>
    %c0_42 = arith.constant 0 : index
    %c0_43 = arith.constant 0 : index
    %107 = vector.load %arg8[%c0_42, %c0_43] : memref<1x32xf32, #tpu.memory_space<vmem>>, vector<1x32xf32>
    %108 = vector.broadcast %107 : vector<1x32xf32> to vector<8x32xf32>
    %109 = arith.addf %106, %108 : vector<8x32xf32>
    %c0_44 = arith.constant 0 : index
    %c0_45 = arith.constant 0 : index
    %110 = vector.load %arg9[%c0_44, %c0_45] : memref<32x64xf32, #tpu.memory_space<vmem>>, vector<32x64xf32>
    %cst_46 = arith.constant dense<0.000000e+00> : vector<8x64xf32>
    %111 = tpu.matmul %3, %110, %cst_46 {dimension_numbers = #tpu.dot_dimension_numbers<[1], [0], [0], [1], [0, 0, 1, 1], [], []>} : vector<8x32xf32>, vector<32x64xf32>, vector<8x64xf32> -> vector<8x64xf32>
    %c0_47 = arith.constant 0 : index
    %c0_48 = arith.constant 0 : index
    %112 = vector.load %arg10[%c0_47, %c0_48] : memref<1x64xf32, #tpu.memory_space<vmem>>, vector<1x64xf32>
    %113 = vector.broadcast %112 : vector<1x64xf32> to vector<8x64xf32>
    %114 = arith.addf %111, %113 : vector<8x64xf32>
    %115 = vector.extract_strided_slice %114 {offsets = [0, 0], sizes = [8, 32], strides = [1, 1]} : vector<8x64xf32> to vector<8x32xf32>
    %116 = vector.extract_strided_slice %114 {offsets = [0, 32], sizes = [8, 32], strides = [1, 1]} : vector<8x64xf32> to vector<8x32xf32>
    %117 = vector.shape_cast %109 : vector<8x32xf32> to vector<1x8x32xf32>
    %118 = vector.shape_cast %115 : vector<8x32xf32> to vector<1x8x32xf32>
    %119 = vector.shape_cast %116 : vector<8x32xf32> to vector<1x8x32xf32>
    %120 = vector.extract_strided_slice %117 {offsets = [0, 0, 0], sizes = [1, 8, 8], strides = [1, 1, 1]} : vector<1x8x32xf32> to vector<1x8x8xf32>
    %121 = vector.extract_strided_slice %118 {offsets = [0, 0, 0], sizes = [1, 8, 8], strides = [1, 1, 1]} : vector<1x8x32xf32> to vector<1x8x8xf32>
    "tpu.trace_start"() <{level = 10 : i32, message = "bqd,bkd->bqk"}> : () -> ()
    %cst_49 = arith.constant dense<0.000000e+00> : vector<1x8x8xf32>
    %122 = tpu.matmul %120, %121, %cst_49 {dimension_numbers = #tpu.dot_dimension_numbers<[2], [2], [1], [1], [0, 0, 0, 1, 1, 1], [0], [0]>} : vector<1x8x8xf32>, vector<1x8x8xf32>, vector<1x8x8xf32> -> vector<1x8x8xf32>
    "tpu.trace_stop"() : () -> ()
    %cst_50 = arith.constant dense<0xFF800000> : vector<1x8xf32>
    %123 = vector.multi_reduction <maximumf>, %122, %cst_50 [2] : vector<1x8x8xf32> to vector<1x8xf32>
    %124 = vector.shape_cast %123 : vector<1x8xf32> to vector<1x8x1xf32>
    %125 = vector.broadcast %124 : vector<1x8x1xf32> to vector<1x8x8xf32>
    %126 = arith.subf %122, %125 : vector<1x8x8xf32>
    %127 = math.exp %126 : vector<1x8x8xf32>
    %cst_51 = arith.constant dense<0.000000e+00> : vector<1x8xf32>
    %128 = vector.multi_reduction <add>, %127, %cst_51 [2] : vector<1x8x8xf32> to vector<1x8xf32>
    %129 = vector.shape_cast %128 : vector<1x8xf32> to vector<1x8x1xf32>
    %130 = tpu.reciprocal %129 {approx = true} : vector<1x8x1xf32> -> vector<1x8x1xf32>
    %131 = vector.broadcast %130 : vector<1x8x1xf32> to vector<1x8x8xf32>
    %132 = arith.mulf %127, %131 : vector<1x8x8xf32>
    %133 = vector.extract_strided_slice %119 {offsets = [0, 0, 0], sizes = [1, 8, 8], strides = [1, 1, 1]} : vector<1x8x32xf32> to vector<1x8x8xf32>
    "tpu.trace_start"() <{level = 10 : i32, message = "bqk,bkd->bqd"}> : () -> ()
    %cst_52 = arith.constant dense<0.000000e+00> : vector<1x8x8xf32>
    %134 = tpu.matmul %132, %133, %cst_52 {dimension_numbers = #tpu.dot_dimension_numbers<[2], [1], [1], [2], [0, 0, 0, 1, 1, 2], [0], [0]>} : vector<1x8x8xf32>, vector<1x8x8xf32>, vector<1x8x8xf32> -> vector<1x8x8xf32>
    "tpu.trace_stop"() : () -> ()
    %135 = vector.extract_strided_slice %117 {offsets = [0, 0, 8], sizes = [1, 8, 8], strides = [1, 1, 1]} : vector<1x8x32xf32> to vector<1x8x8xf32>
    %136 = vector.extract_strided_slice %118 {offsets = [0, 0, 8], sizes = [1, 8, 8], strides = [1, 1, 1]} : vector<1x8x32xf32> to vector<1x8x8xf32>
    "tpu.trace_start"() <{level = 10 : i32, message = "bqd,bkd->bqk"}> : () -> ()
    %cst_53 = arith.constant dense<0.000000e+00> : vector<1x8x8xf32>
    %137 = tpu.matmul %135, %136, %cst_53 {dimension_numbers = #tpu.dot_dimension_numbers<[2], [2], [1], [1], [0, 0, 0, 1, 1, 1], [0], [0]>} : vector<1x8x8xf32>, vector<1x8x8xf32>, vector<1x8x8xf32> -> vector<1x8x8xf32>
    "tpu.trace_stop"() : () -> ()
    %cst_54 = arith.constant dense<0xFF800000> : vector<1x8xf32>
    %138 = vector.multi_reduction <maximumf>, %137, %cst_54 [2] : vector<1x8x8xf32> to vector<1x8xf32>
    %139 = vector.shape_cast %138 : vector<1x8xf32> to vector<1x8x1xf32>
    %140 = vector.broadcast %139 : vector<1x8x1xf32> to vector<1x8x8xf32>
    %141 = arith.subf %137, %140 : vector<1x8x8xf32>
    %142 = math.exp %141 : vector<1x8x8xf32>
    %cst_55 = arith.constant dense<0.000000e+00> : vector<1x8xf32>
    %143 = vector.multi_reduction <add>, %142, %cst_55 [2] : vector<1x8x8xf32> to vector<1x8xf32>
    %144 = vector.shape_cast %143 : vector<1x8xf32> to vector<1x8x1xf32>
    %145 = tpu.reciprocal %144 {approx = true} : vector<1x8x1xf32> -> vector<1x8x1xf32>
    %146 = vector.broadcast %145 : vector<1x8x1xf32> to vector<1x8x8xf32>
    %147 = arith.mulf %142, %146 : vector<1x8x8xf32>
    %148 = vector.extract_strided_slice %119 {offsets = [0, 0, 8], sizes = [1, 8, 8], strides = [1, 1, 1]} : vector<1x8x32xf32> to vector<1x8x8xf32>
    "tpu.trace_start"() <{level = 10 : i32, message = "bqk,bkd->bqd"}> : () -> ()
    %cst_56 = arith.constant dense<0.000000e+00> : vector<1x8x8xf32>
    %149 = tpu.matmul %147, %148, %cst_56 {dimension_numbers = #tpu.dot_dimension_numbers<[2], [1], [1], [2], [0, 0, 0, 1, 1, 2], [0], [0]>} : vector<1x8x8xf32>, vector<1x8x8xf32>, vector<1x8x8xf32> -> vector<1x8x8xf32>
    "tpu.trace_stop"() : () -> ()
    %150 = vector.extract_strided_slice %117 {offsets = [0, 0, 16], sizes = [1, 8, 8], strides = [1, 1, 1]} : vector<1x8x32xf32> to vector<1x8x8xf32>
    %151 = vector.extract_strided_slice %118 {offsets = [0, 0, 16], sizes = [1, 8, 8], strides = [1, 1, 1]} : vector<1x8x32xf32> to vector<1x8x8xf32>
    "tpu.trace_start"() <{level = 10 : i32, message = "bqd,bkd->bqk"}> : () -> ()
    %cst_57 = arith.constant dense<0.000000e+00> : vector<1x8x8xf32>
    %152 = tpu.matmul %150, %151, %cst_57 {dimension_numbers = #tpu.dot_dimension_numbers<[2], [2], [1], [1], [0, 0, 0, 1, 1, 1], [0], [0]>} : vector<1x8x8xf32>, vector<1x8x8xf32>, vector<1x8x8xf32> -> vector<1x8x8xf32>
    "tpu.trace_stop"() : () -> ()
    %cst_58 = arith.constant dense<0xFF800000> : vector<1x8xf32>
    %153 = vector.multi_reduction <maximumf>, %152, %cst_58 [2] : vector<1x8x8xf32> to vector<1x8xf32>
    %154 = vector.shape_cast %153 : vector<1x8xf32> to vector<1x8x1xf32>
    %155 = vector.broadcast %154 : vector<1x8x1xf32> to vector<1x8x8xf32>
    %156 = arith.subf %152, %155 : vector<1x8x8xf32>
    %157 = math.exp %156 : vector<1x8x8xf32>
    %cst_59 = arith.constant dense<0.000000e+00> : vector<1x8xf32>
    %158 = vector.multi_reduction <add>, %157, %cst_59 [2] : vector<1x8x8xf32> to vector<1x8xf32>
    %159 = vector.shape_cast %158 : vector<1x8xf32> to vector<1x8x1xf32>
    %160 = tpu.reciprocal %159 {approx = true} : vector<1x8x1xf32> -> vector<1x8x1xf32>
    %161 = vector.broadcast %160 : vector<1x8x1xf32> to vector<1x8x8xf32>
    %162 = arith.mulf %157, %161 : vector<1x8x8xf32>
    %163 = vector.extract_strided_slice %119 {offsets = [0, 0, 16], sizes = [1, 8, 8], strides = [1, 1, 1]} : vector<1x8x32xf32> to vector<1x8x8xf32>
    "tpu.trace_start"() <{level = 10 : i32, message = "bqk,bkd->bqd"}> : () -> ()
    %cst_60 = arith.constant dense<0.000000e+00> : vector<1x8x8xf32>
    %164 = tpu.matmul %162, %163, %cst_60 {dimension_numbers = #tpu.dot_dimension_numbers<[2], [1], [1], [2], [0, 0, 0, 1, 1, 2], [0], [0]>} : vector<1x8x8xf32>, vector<1x8x8xf32>, vector<1x8x8xf32> -> vector<1x8x8xf32>
    "tpu.trace_stop"() : () -> ()
    %165 = vector.extract_strided_slice %117 {offsets = [0, 0, 24], sizes = [1, 8, 8], strides = [1, 1, 1]} : vector<1x8x32xf32> to vector<1x8x8xf32>
    %166 = vector.extract_strided_slice %118 {offsets = [0, 0, 24], sizes = [1, 8, 8], strides = [1, 1, 1]} : vector<1x8x32xf32> to vector<1x8x8xf32>
    "tpu.trace_start"() <{level = 10 : i32, message = "bqd,bkd->bqk"}> : () -> ()
    %cst_61 = arith.constant dense<0.000000e+00> : vector<1x8x8xf32>
    %167 = tpu.matmul %165, %166, %cst_61 {dimension_numbers = #tpu.dot_dimension_numbers<[2], [2], [1], [1], [0, 0, 0, 1, 1, 1], [0], [0]>} : vector<1x8x8xf32>, vector<1x8x8xf32>, vector<1x8x8xf32> -> vector<1x8x8xf32>
    "tpu.trace_stop"() : () -> ()
    %cst_62 = arith.constant dense<0xFF800000> : vector<1x8xf32>
    %168 = vector.multi_reduction <maximumf>, %167, %cst_62 [2] : vector<1x8x8xf32> to vector<1x8xf32>
    %169 = vector.shape_cast %168 : vector<1x8xf32> to vector<1x8x1xf32>
    %170 = vector.broadcast %169 : vector<1x8x1xf32> to vector<1x8x8xf32>
    %171 = arith.subf %167, %170 : vector<1x8x8xf32>
    %172 = math.exp %171 : vector<1x8x8xf32>
    %cst_63 = arith.constant dense<0.000000e+00> : vector<1x8xf32>
    %173 = vector.multi_reduction <add>, %172, %cst_63 [2] : vector<1x8x8xf32> to vector<1x8xf32>
    %174 = vector.shape_cast %173 : vector<1x8xf32> to vector<1x8x1xf32>
    %175 = tpu.reciprocal %174 {approx = true} : vector<1x8x1xf32> -> vector<1x8x1xf32>
    %176 = vector.broadcast %175 : vector<1x8x1xf32> to vector<1x8x8xf32>
    %177 = arith.mulf %172, %176 : vector<1x8x8xf32>
    %178 = vector.extract_strided_slice %119 {offsets = [0, 0, 24], sizes = [1, 8, 8], strides = [1, 1, 1]} : vector<1x8x32xf32> to vector<1x8x8xf32>
    "tpu.trace_start"() <{level = 10 : i32, message = "bqk,bkd->bqd"}> : () -> ()
    %cst_64 = arith.constant dense<0.000000e+00> : vector<1x8x8xf32>
    %179 = tpu.matmul %177, %178, %cst_64 {dimension_numbers = #tpu.dot_dimension_numbers<[2], [1], [1], [2], [0, 0, 0, 1, 1, 2], [0], [0]>} : vector<1x8x8xf32>, vector<1x8x8xf32>, vector<1x8x8xf32> -> vector<1x8x8xf32>
    "tpu.trace_stop"() : () -> ()
    %180 = tpu.concatenate %134, %149, %164, %179 in 2 : vector<1x8x8xf32>, vector<1x8x8xf32>, vector<1x8x8xf32>, vector<1x8x8xf32> -> vector<1x8x32xf32>
    %181 = vector.shape_cast %180 : vector<1x8x32xf32> to vector<8x32xf32>
    %c0_65 = arith.constant 0 : index
    %c0_66 = arith.constant 0 : index
    %182 = vector.load %arg11[%c0_65, %c0_66] : memref<32x32xf32, #tpu.memory_space<vmem>>, vector<32x32xf32>
    %cst_67 = arith.constant dense<0.000000e+00> : vector<8x32xf32>
    %183 = tpu.matmul %181, %182, %cst_67 {dimension_numbers = #tpu.dot_dimension_numbers<[1], [0], [0], [1], [0, 0, 1, 1], [], []>} : vector<8x32xf32>, vector<32x32xf32>, vector<8x32xf32> -> vector<8x32xf32>
    %c0_68 = arith.constant 0 : index
    %c0_69 = arith.constant 0 : index
    %184 = vector.load %arg12[%c0_68, %c0_69] : memref<1x32xf32, #tpu.memory_space<vmem>>, vector<1x32xf32>
    %185 = vector.broadcast %184 : vector<1x32xf32> to vector<8x32xf32>
    %186 = arith.addf %183, %185 : vector<8x32xf32>
    %187 = arith.addf %104, %186 : vector<8x32xf32>
    %cst_70 = arith.constant dense<0.000000e+00> : vector<8xf32>
    %188 = vector.multi_reduction <add>, %187, %cst_70 [1] : vector<8x32xf32> to vector<8xf32>
    %189 = vector.shape_cast %188 : vector<8xf32> to vector<8x1xf32>
    %cst_71 = arith.constant 3.200000e+01 : f32
    %190 = vector.broadcast %cst_71 : f32 to vector<8x1xf32>
    %191 = arith.divf %189, %190 : vector<8x1xf32>
    %192 = vector.broadcast %191 : vector<8x1xf32> to vector<8x32xf32>
    %193 = arith.subf %187, %192 : vector<8x32xf32>
    %194 = arith.mulf %193, %193 : vector<8x32xf32>
    %cst_72 = arith.constant dense<0.000000e+00> : vector<8xf32>
    %195 = vector.multi_reduction <add>, %194, %cst_72 [1] : vector<8x32xf32> to vector<8xf32>
    %196 = vector.shape_cast %195 : vector<8xf32> to vector<8x1xf32>
    %cst_73 = arith.constant 3.200000e+01 : f32
    %197 = vector.broadcast %cst_73 : f32 to vector<8x1xf32>
    %198 = arith.divf %196, %197 : vector<8x1xf32>
    %cst_74 = arith.constant 9.99999974E-6 : f32
    %199 = vector.broadcast %cst_74 : f32 to vector<8x1xf32>
    %200 = arith.addf %198, %199 : vector<8x1xf32>
    %201 = math.rsqrt %200 : vector<8x1xf32>
    %202 = vector.broadcast %201 : vector<8x1xf32> to vector<8x32xf32>
    %203 = arith.mulf %193, %202 : vector<8x32xf32>
    %c0_75 = arith.constant 0 : index
    %c0_76 = arith.constant 0 : index
    %204 = vector.load %arg19[%c0_75, %c0_76] : memref<1x32xf32, #tpu.memory_space<vmem>>, vector<1x32xf32>
    %205 = vector.broadcast %204 : vector<1x32xf32> to vector<8x32xf32>
    %206 = arith.mulf %203, %205 : vector<8x32xf32>
    %c0_77 = arith.constant 0 : index
    %c0_78 = arith.constant 0 : index
    %207 = vector.load %arg20[%c0_77, %c0_78] : memref<1x32xf32, #tpu.memory_space<vmem>>, vector<1x32xf32>
    %208 = vector.broadcast %207 : vector<1x32xf32> to vector<8x32xf32>
    %209 = arith.addf %206, %208 : vector<8x32xf32>
    %c0_79 = arith.constant 0 : index
    %c0_80 = arith.constant 0 : index
    %210 = vector.load %arg13[%c0_79, %c0_80] : memref<32x64xf32, #tpu.memory_space<vmem>>, vector<32x64xf32>
    %cst_81 = arith.constant dense<0.000000e+00> : vector<8x64xf32>
    %211 = tpu.matmul %209, %210, %cst_81 {dimension_numbers = #tpu.dot_dimension_numbers<[1], [0], [0], [1], [0, 0, 1, 1], [], []>} : vector<8x32xf32>, vector<32x64xf32>, vector<8x64xf32> -> vector<8x64xf32>
    %c0_82 = arith.constant 0 : index
    %c0_83 = arith.constant 0 : index
    %212 = vector.load %arg14[%c0_82, %c0_83] : memref<1x64xf32, #tpu.memory_space<vmem>>, vector<1x64xf32>
    %213 = vector.broadcast %212 : vector<1x64xf32> to vector<8x64xf32>
    %214 = arith.addf %211, %213 : vector<8x64xf32>
    %cst_84 = arith.constant 0.000000e+00 : f32
    %215 = vector.broadcast %cst_84 : f32 to vector<8x64xf32>
    %216 = arith.maximumf %214, %215 : vector<8x64xf32>
    %c0_85 = arith.constant 0 : index
    %c0_86 = arith.constant 0 : index
    %217 = vector.load %arg15[%c0_85, %c0_86] : memref<64x32xf32, #tpu.memory_space<vmem>>, vector<64x32xf32>
    %cst_87 = arith.constant dense<0.000000e+00> : vector<8x32xf32>
    %218 = tpu.matmul %216, %217, %cst_87 {dimension_numbers = #tpu.dot_dimension_numbers<[1], [0], [0], [1], [0, 0, 1, 1], [], []>} : vector<8x64xf32>, vector<64x32xf32>, vector<8x32xf32> -> vector<8x32xf32>
    %c0_88 = arith.constant 0 : index
    %c0_89 = arith.constant 0 : index
    %219 = vector.load %arg16[%c0_88, %c0_89] : memref<1x32xf32, #tpu.memory_space<vmem>>, vector<1x32xf32>
    %220 = vector.broadcast %219 : vector<1x32xf32> to vector<8x32xf32>
    %221 = arith.addf %218, %220 : vector<8x32xf32>
    %222 = arith.addf %209, %221 : vector<8x32xf32>
    %cst_90 = arith.constant dense<0.000000e+00> : vector<8xf32>
    %223 = vector.multi_reduction <add>, %222, %cst_90 [1] : vector<8x32xf32> to vector<8xf32>
    %224 = vector.shape_cast %223 : vector<8xf32> to vector<8x1xf32>
    %cst_91 = arith.constant 3.200000e+01 : f32
    %225 = vector.broadcast %cst_91 : f32 to vector<8x1xf32>
    %226 = arith.divf %224, %225 : vector<8x1xf32>
    %227 = vector.broadcast %226 : vector<8x1xf32> to vector<8x32xf32>
    %228 = arith.subf %222, %227 : vector<8x32xf32>
    %229 = arith.mulf %228, %228 : vector<8x32xf32>
    %cst_92 = arith.constant dense<0.000000e+00> : vector<8xf32>
    %230 = vector.multi_reduction <add>, %229, %cst_92 [1] : vector<8x32xf32> to vector<8xf32>
    %231 = vector.shape_cast %230 : vector<8xf32> to vector<8x1xf32>
    %cst_93 = arith.constant 3.200000e+01 : f32
    %232 = vector.broadcast %cst_93 : f32 to vector<8x1xf32>
    %233 = arith.divf %231, %232 : vector<8x1xf32>
    %cst_94 = arith.constant 9.99999974E-6 : f32
    %234 = vector.broadcast %cst_94 : f32 to vector<8x1xf32>
    %235 = arith.addf %233, %234 : vector<8x1xf32>
    %236 = math.rsqrt %235 : vector<8x1xf32>
    %237 = vector.broadcast %236 : vector<8x1xf32> to vector<8x32xf32>
    %238 = arith.mulf %228, %237 : vector<8x32xf32>
    %c0_95 = arith.constant 0 : index
    %c0_96 = arith.constant 0 : index
    %239 = vector.load %arg21[%c0_95, %c0_96] : memref<1x32xf32, #tpu.memory_space<vmem>>, vector<1x32xf32>
    %240 = vector.broadcast %239 : vector<1x32xf32> to vector<8x32xf32>
    %241 = arith.mulf %238, %240 : vector<8x32xf32>
    %c0_97 = arith.constant 0 : index
    %c0_98 = arith.constant 0 : index
    %242 = vector.load %arg22[%c0_97, %c0_98] : memref<1x32xf32, #tpu.memory_space<vmem>>, vector<1x32xf32>
    %243 = vector.broadcast %242 : vector<1x32xf32> to vector<8x32xf32>
    %244 = arith.addf %241, %243 : vector<8x32xf32>
    %245 = vector.shape_cast %244 : vector<8x32xf32> to vector<1x8x32xf32>
    %c0_99 = arith.constant 0 : index
    %c0_100 = arith.constant 0 : index
    %c0_101 = arith.constant 0 : index
    %246 = vector.load %arg23[%c0_99, %c0_100, %c0_101] : memref<1x8x32xf32, #tpu.memory_space<vmem>>, vector<1x8x32xf32>
    tpu.vector_store %arg23[%c0_99, %c0_100, %c0_101], %245 {strides = array<i32>} : memref<1x8x32xf32, #tpu.memory_space<vmem>>, vector<1x8x32xf32>,
    return
  }
  func.func @transform_0(%arg0: i32) -> (i32, i32, i32) {
    %c0_i32 = arith.constant 0 : i32
    %c0_i32_0 = arith.constant 0 : i32
    %c0_i32_1 = arith.constant 0 : i32
    return %arg0, %c0_i32, %c0_i32_0 : i32, i32, i32
  }
  func.func @transform_1(%arg0: i32) -> (i32, i32, i32) {
    %c0_i32 = arith.constant 0 : i32
    %c0_i32_0 = arith.constant 0 : i32
    %c0_i32_1 = arith.constant 0 : i32
    return %arg0, %c0_i32, %c0_i32_0 : i32, i32, i32
  }
  func.func @transform_2(%arg0: i32) -> (i32, i32) {
    %c0_i32 = arith.constant 0 : i32
    %c0_i32_0 = arith.constant 0 : i32
    %c0_i32_1 = arith.constant 0 : i32
    return %c0_i32, %c0_i32_0 : i32, i32
  }
  func.func @transform_3(%arg0: i32) -> (i32, i32) {
    %c0_i32 = arith.constant 0 : i32
    %c0_i32_0 = arith.constant 0 : i32
    %c0_i32_1 = arith.constant 0 : i32
    return %c0_i32, %c0_i32_0 : i32, i32
  }
  func.func @transform_4(%arg0: i32) -> (i32, i32) {
    %c0_i32 = arith.constant 0 : i32
    %c0_i32_0 = arith.constant 0 : i32
    %c0_i32_1 = arith.constant 0 : i32
    return %c0_i32, %c0_i32_0 : i32, i32
  }
  func.func @transform_5(%arg0: i32) -> (i32, i32) {
    %c0_i32 = arith.constant 0 : i32
    %c0_i32_0 = arith.constant 0 : i32
    %c0_i32_1 = arith.constant 0 : i32
    return %c0_i32, %c0_i32_0 : i32, i32
  }
  func.func @transform_6(%arg0: i32) -> (i32, i32) {
    %c0_i32 = arith.constant 0 : i32
    %c0_i32_0 = arith.constant 0 : i32
    %c0_i32_1 = arith.constant 0 : i32
    return %c0_i32, %c0_i32_0 : i32, i32
  }
  func.func @transform_7(%arg0: i32) -> (i32, i32) {
    %c0_i32 = arith.constant 0 : i32
    %c0_i32_0 = arith.constant 0 : i32
    %c0_i32_1 = arith.constant 0 : i32
    return %c0_i32, %c0_i32_0 : i32, i32
  }
  func.func @transform_8(%arg0: i32) -> (i32, i32) {
    %c0_i32 = arith.constant 0 : i32
    %c0_i32_0 = arith.constant 0 : i32
    %c0_i32_1 = arith.constant 0 : i32
    return %c0_i32, %c0_i32_0 : i32, i32
  }
  func.func @transform_9(%arg0: i32) -> (i32, i32) {
    %c0_i32 = arith.constant 0 : i32
    %c0_i32_0 = arith.constant 0 : i32
    %c0_i32_1 = arith.constant 0 : i32
    return %c0_i32, %c0_i32_0 : i32, i32
  }
  func.func @transform_10(%arg0: i32) -> (i32, i32) {
    %c0_i32 = arith.constant 0 : i32
    %c0_i32_0 = arith.constant 0 : i32
    %c0_i32_1 = arith.constant 0 : i32
    return %c0_i32, %c0_i32_0 : i32, i32
  }
  func.func @transform_11(%arg0: i32) -> (i32, i32) {
    %c0_i32 = arith.constant 0 : i32
    %c0_i32_0 = arith.constant 0 : i32
    %c0_i32_1 = arith.constant 0 : i32
    return %c0_i32, %c0_i32_0 : i32, i32
  }
  func.func @transform_12(%arg0: i32) -> (i32, i32) {
    %c0_i32 = arith.constant 0 : i32
    %c0_i32_0 = arith.constant 0 : i32
    %c0_i32_1 = arith.constant 0 : i32
    return %c0_i32, %c0_i32_0 : i32, i32
  }
  func.func @transform_13(%arg0: i32) -> (i32, i32) {
    %c0_i32 = arith.constant 0 : i32
    %c0_i32_0 = arith.constant 0 : i32
    %c0_i32_1 = arith.constant 0 : i32
    return %c0_i32, %c0_i32_0 : i32, i32
  }
  func.func @transform_14(%arg0: i32) -> (i32, i32) {
    %c0_i32 = arith.constant 0 : i32
    %c0_i32_0 = arith.constant 0 : i32
    %c0_i32_1 = arith.constant 0 : i32
    return %c0_i32, %c0_i32_0 : i32, i32
  }
  func.func @transform_15(%arg0: i32) -> (i32, i32) {
    %c0_i32 = arith.constant 0 : i32
    %c0_i32_0 = arith.constant 0 : i32
    %c0_i32_1 = arith.constant 0 : i32
    return %c0_i32, %c0_i32_0 : i32, i32
  }
  func.func @transform_16(%arg0: i32) -> (i32, i32) {
    %c0_i32 = arith.constant 0 : i32
    %c0_i32_0 = arith.constant 0 : i32
    %c0_i32_1 = arith.constant 0 : i32
    return %c0_i32, %c0_i32_0 : i32, i32
  }
  func.func @transform_17(%arg0: i32) -> (i32, i32) {
    %c0_i32 = arith.constant 0 : i32
    %c0_i32_0 = arith.constant 0 : i32
    %c0_i32_1 = arith.constant 0 : i32
    return %c0_i32, %c0_i32_0 : i32, i32
  }
  func.func @transform_18(%arg0: i32) -> (i32, i32) {
    %c0_i32 = arith.constant 0 : i32
    %c0_i32_0 = arith.constant 0 : i32
    %c0_i32_1 = arith.constant 0 : i32
    return %c0_i32, %c0_i32_0 : i32, i32
  }
  func.func @transform_19(%arg0: i32) -> (i32, i32) {
    %c0_i32 = arith.constant 0 : i32
    %c0_i32_0 = arith.constant 0 : i32
    %c0_i32_1 = arith.constant 0 : i32
    return %c0_i32, %c0_i32_0 : i32, i32
  }
  func.func @transform_20(%arg0: i32) -> (i32, i32) {
    %c0_i32 = arith.constant 0 : i32
    %c0_i32_0 = arith.constant 0 : i32
    %c0_i32_1 = arith.constant 0 : i32
    return %c0_i32, %c0_i32_0 : i32, i32
  }
  func.func @transform_21(%arg0: i32) -> (i32, i32) {
    %c0_i32 = arith.constant 0 : i32
    %c0_i32_0 = arith.constant 0 : i32
    %c0_i32_1 = arith.constant 0 : i32
    return %c0_i32, %c0_i32_0 : i32, i32
  }
  func.func @transform_22(%arg0: i32) -> (i32, i32, i32) {
    %c0_i32 = arith.constant 0 : i32
    %c0_i32_0 = arith.constant 0 : i32
    %c0_i32_1 = arith.constant 0 : i32
    return %arg0, %c0_i32, %c0_i32_0 : i32, i32, i32
  }
}

</mosaic_0001>

<bundles_post_ra>
// kernel: tpu_custom_call.1
= control target key start
LH: loop header
LB: loop body
LE: loop exit
PB: predicated region body
PF: predicated region fallthrough
CT: control target
= control target key end

     0   :  { %s4400_s0 = inlined_call_operand.hbm [shape: f32[2,8,32], index: 0, kind: input, shape index: {}]   ;;  %s4401_s1 = inlined_call_operand.hbm [shape: f32[2,8,32], index: 1, kind: input, shape index: {}]   ;;  %s4402_s2 = inlined_call_operand.vmem [shape: f32[32,96], index: 2, kind: input, shape index: {}]   ;;  %s4403_s3 = inlined_call_operand.vmem [shape: f32[1,96], index: 3, kind: input, shape index: {}]   ;;  %s4404_s4 = inlined_call_operand.vmem [shape: f32[32,32], index: 4, kind: input, shape index: {}]   ;;  %s4405_s5 = inlined_call_operand.vmem [shape: f32[1,32], index: 5, kind: input, shape index: {}]   ;;  %s4406_s6 = inlined_call_operand.vmem [shape: f32[32,32], index: 6, kind: input, shape index: {}]   ;;  %s4407_s7 = inlined_call_operand.vmem [shape: f32[1,32], index: 7, kind: input, shape index: {}]   ;;  %s4408_s8 = inlined_call_operand.hbm [shape: f32[32,64], index: 8, kind: input, shape index: {}]   ;;  %s4409_s9 = inlined_call_operand.vmem [shape: f32[1,64], index: 9, kind: input, shape index: {}]   ;;  %s4410_s10 = inlined_call_operand.hbm [shape: f32[32,32], index: 10, kind: input, shape index: {}]   ;;  %s4411_s11 = inlined_call_operand.vmem [shape: f32[1,32], index: 11, kind: input, shape index: {}]   ;;  %s4412_s12 = inlined_call_operand.hbm [shape: f32[32,64], index: 12, kind: input, shape index: {}]   ;;  %s4413_s13 = inlined_call_operand.vmem [shape: f32[1,64], index: 13, kind: input, shape index: {}]   ;;  %s4414_s14 = inlined_call_operand.vmem [shape: f32[64,32], index: 14, kind: input, shape index: {}]   ;;  %s4415_s15 = inlined_call_operand.vmem [shape: f32[1,32], index: 15, kind: input, shape index: {}]   ;;  %s4416_s16 = inlined_call_operand.vmem [shape: f32[1,32], index: 16, kind: input, shape index: {}]   ;;  %s4417_s17 = inlined_call_operand.vmem [shape: f32[1,32], index: 17, kind: input, shape index: {}]   ;;  %s4418_s18 = inlined_call_operand.vmem [shape: f32[1,32], index: 18, kind: input, shape index: {}]   ;;  %s4419_s19 = inlined_call_operand.vmem [shape: f32[1,32], index: 19, kind: input, shape index: {}]   ;;  %s4420_s20 = inlined_call_operand.vmem [shape: f32[1,32], index: 20, kind: input, shape index: {}]   ;;  %s4421_s21 = inlined_call_operand.vmem [shape: f32[1,32], index: 21, kind: input, shape index: {}]   ;;  %s4422_s22 = inlined_call_operand.hbm [shape: f32[2,8,32], index: 22, kind: output, shape index: {}]  }
   0x1   :  { %4441 = sst [smem:[#allocation21_spill]] %s4400_s0 }
   0x2   :  { %4442 = sst [smem:[#allocation22_spill]] %s4401_s1 }
   0x3   :  { %4443 = sst [smem:[#allocation23_spill]] %s4402_s2 }
   0x4   :  { %4444 = sst [smem:[#allocation24_spill]] %s4403_s3 }
   0x5   :  { %4445 = sst [smem:[#allocation25_spill]] %s4404_s4 }
   0x6   :  { %4446 = sst [smem:[#allocation26_spill]] %s4405_s5 }
   0x7   :  { %4447 = sst [smem:[#allocation27_spill]] %s4406_s6 }
   0x8   :  { %4448 = sst [smem:[#allocation28_spill]] %s4408_s8 }
   0x9   :  { %4449 = sst [smem:[#allocation29_spill]] %s4410_s10 }
   0xa   :  { %4450 = sst [smem:[#allocation30_spill]] %s4412_s12 }
   0xb   :  { %4451 = sst [smem:[#allocation31_spill]] %s4413_s13 }
   0xc   :  { %4452 = sst [smem:[#allocation32_spill]] %s4415_s15 }
   0xd   :  { %4453 = sst [smem:[#allocation33_spill]] %s4418_s18 }
   0xe   :  { %4454 = sst [smem:[#allocation34_spill]] %s4419_s19 }
   0xf   :  { %4455 = sst [smem:[#allocation35_spill]] %s4420_s20 }
  0x10   :  { %4456 = sst [smem:[#allocation36_spill]] %s4421_s21 }
  0x11   :  { %4457 = sst [smem:[#allocation37_spill]] %s4422_s22 }
  0x12   :  { %27 = vsyncpa [#allocation3], 0 }
  0x13   :  { %29 = vsyncpa [#allocation3 + $0x1], 0 }
  0x14   :  { %30 = vsyncpa [#allocation6], 0 }
  0x15   :  { %32 = vsyncpa [#allocation6 + $0x1], 0 }
  0x16   :  { %33 = vsyncpa [#allocation9], 0 }
  0x17   :  { %34 = vsyncpa [#allocation4], 0 }
  0x18   :  { %36 = vsyncpa [#allocation4 + $0x1], 0  ;;  %s3805_s3 = smov 0   ;;  %s3807_s28 = smov 0  }
  0x19   :  { %s3809_s29 = smov 0   ;;  %s3811_s30 = smov 0  }
  0x1a LB: > { %4458 = sst [smem:[#allocation17_spill]] %s3651_s3  ;;  %s3826_s4 = sadd.s32 4294967295, %s3663_s30   ;;  %s3663_s30 = sphi %s3811_s30, %s4507_s30   ;;  %s3659_s29 = sphi %s3809_s29, %s4504_s29   ;;  %s3655_s28 = sphi %s3807_s28, %s4506_s28   ;;  %s3651_s3 = sphi %s3805_s3, %s4505_s3  }
  0x1b   : > { %4459 = sst [smem:[#allocation18_spill]] %s3659_s29  ;;  %s2953_s0 = sadd.s32 4294967294, %s3663_s30  }
  0x1c   : > { %p62_p0 = scmp.ne.s32.totalorder %s3655_s28, %s3651_s3  ;;  %p4431_p1 = scmp.eq.s32.totalorder %s3826_s4, 0 }
  0x1d   : > { %p538_p3 = scmp.eq.s32.totalorder %s2953_s0, 1  ;;  %p2954_p5 = scmp.ge.s32.totalorder %s3663_s30, 1 }
  0x1e   : > { %p3835_p4 = por %p4431_p1, %p62_p0  ;;  %p545_p7 = scmp.lt.s32.totalorder %s3663_s30, 3 }
  0x1f   : > { %p3840_p6 = por %p538_p3, %p62_p0  ;;  %s3665_s24 = smov [#allocation7]  }
  0x20   : > { %s4460_s23 = scalar_select %p3835_p4, 1, 0 }
  0x21   : > { %s4461_s1 = scalar_select %p3840_p6, 1, 0 }
  0x22   : > { %p3845_p8 = pnand %p2954_p5, %p545_p7  ;;  %s575_s6 = sshll.u32 %s3665_s24, 4  ;;  %s3849_s6 = int_to_ptr.vmem [resolvable:$true] %s575_s6 }
  0x23   : > { %4462 = sst [smem:[#allocation19_spill]] %s4461_s1  ;;  %s3666_s26 = smov [#allocation8]  }
  0x24   : > { %s4463_s5 = scalar_select %p3845_p8, 1, 0 }
  0x25   : > { %p3320_p9 = pneg %p3845_p8  ;;  %s591_s2 = sshll.u32 %s3666_s26, 4  ;;  %s3860_s2 = int_to_ptr.vmem [resolvable:$true] %s591_s2 }
  0x26   : > { %s3667_s27 = smov [#allocation10]   ;;  %s4465_s8 = sld [smem:[#allocation28_spill]] }
  0x27   : > { %p3856_p11 = pnand %p3320_p9, %p4431_p1  ;;  %s3862_s0 = sshll.u32 %s3667_s27, 4  ;;  %s608_s0 = int_to_ptr.vmem [resolvable:$true] %s3862_s0 }
  0x29   : > { %p3872_p13 = pneg %p3856_p11 }
  0x2c   : > { %s3441_s3 = scalar_lea.hbm %s4465_s8, 512 }
  0x2d   : > { %p3442_p12 = scmp.ne.s32.totalorder %s4465_s8, %s3441_s3  ;;  %p3448_p5 = scmp.lt.u32.totalorder %s3441_s3, %s4465_s8 }
  0x2f   : > { %p3444_p0 = pnand %p3872_p13, %p3442_p12 }
  0x31   : > { %p3445_p3 = pneg %p3444_p0 }
  0x33   : > { %p3450_p7 = pnand %p3448_p5, %p3445_p3 }
  0x35   : > { %3453 = shalt.err (!%p3450_p7)
}
  0x36   : > { %s3454_s21 = scalar_lea.vmem %s3849_s6, 512  ;;  %p3462_p2 = scmp.lt.s32.totalorder %s3849_s6, %s3849_s6 }
  0x37   : > { %p3455_p9 = scmp.ne.s32.totalorder %s3849_s6, %s3454_s21  ;;  %p3463_p6 = scmp.lt.s32.totalorder %s3454_s21, %s3454_s21 }
  0x39   : > { %p3457_p10 = pnand %p3455_p9, %p3872_p13  ;;  %p3464_p12 = por %p3463_p6, %p3462_p2 }
  0x3b   : > { %p3458_p1 = pneg %p3457_p10 }
  0x3d   : > { %p3465_p0 = pnand %p3464_p12, %p3458_p1 }
  0x3f   : > { %3468 = shalt.err (!%p3465_p0)
}
  0x40   : > { %s3668_s22 = smov 128   ;;  %s3669_s3 = smov 8  }
  0x41   : > { %3323 = dma.hbm_to_vmem [thread:$0]  (!%p3856_p11), %s4465_s8, 512, %s3849_s6, [#allocation6], %s3668_s22, %s3668_s22, %s3669_s3  }
  0x42   : > { %s4467_s10 = sld [smem:[#allocation29_spill]] }
  0x48   : > { %s3469_s21 = scalar_lea.hbm %s4467_s10, 512 }
  0x49   : > { %p3470_p1 = scmp.ne.s32.totalorder %s4467_s10, %s3469_s21  ;;  %p3476_p10 = scmp.lt.u32.totalorder %s3469_s21, %s4467_s10 }
  0x4b   : > { %p3472_p2 = pnand %p3470_p1, %p3872_p13 }
  0x4d   : > { %p3473_p6 = pneg %p3472_p2 }
  0x4f   : > { %p3478_p3 = pnand %p3476_p10, %p3473_p6 }
  0x51   : > { %3481 = shalt.err (!%p3478_p3)
}
  0x52   : > { %s3482_s6 = scalar_lea.vmem %s3860_s2, 512  ;;  %p3490_p12 = scmp.lt.s32.totalorder %s3860_s2, %s3860_s2 }
  0x53   : > { %p3483_p5 = scmp.ne.s32.totalorder %s3860_s2, %s3482_s6  ;;  %p3491_p0 = scmp.lt.s32.totalorder %s3482_s6, %s3482_s6 }
  0x55   : > { %p3485_p7 = pnand %p3483_p5, %p3872_p13  ;;  %p3492_p1 = por %p3491_p0, %p3490_p12 }
  0x57   : > { %p3486_p9 = pneg %p3485_p7 }
  0x59   : > { %p3493_p2 = pnand %p3492_p1, %p3486_p9 }
  0x5b   : > { %3496 = shalt.err (!%p3493_p2)
}
  0x5c   : > { %3326 = dma.hbm_to_vmem [thread:$0]  (!%p3856_p11), %s4467_s10, 512, %s3860_s2, [#allocation9], %s3668_s22, %s3668_s22, %s3669_s3  }
  0x5d   : > { %s4468_s12 = sld [smem:[#allocation30_spill]] }
  0x63   : > { %s3497_s1 = scalar_lea.hbm %s4468_s12, 512 }
  0x64   : > { %p3498_p6 = scmp.ne.s32.totalorder %s4468_s12, %s3497_s1  ;;  %p3504_p5 = scmp.lt.u32.totalorder %s3497_s1, %s4468_s12 }
  0x66   : > { %p3500_p10 = pnand %p3498_p6, %p3872_p13 }
  0x68   : > { %p3501_p3 = pneg %p3500_p10 }
  0x6a   : > { %p3506_p7 = pnand %p3504_p5, %p3501_p3 }
  0x6c   : > { %3509 = shalt.err (!%p3506_p7)
}
  0x6d   : > { %s3510_s6 = scalar_lea.vmem %s608_s0, 512  ;;  %p3518_p1 = scmp.lt.s32.totalorder %s608_s0, %s608_s0 }
  0x6e   : > { %p3511_p9 = scmp.ne.s32.totalorder %s608_s0, %s3510_s6  ;;  %p3519_p2 = scmp.lt.s32.totalorder %s3510_s6, %s3510_s6 }
  0x70   : > { %p3513_p12 = pnand %p3511_p9, %p3872_p13  ;;  %p3520_p4 = por %p3519_p2, %p3518_p1 }
  0x72   : > { %p3514_p0 = pneg %p3513_p12 }
  0x74   : > { %p3521_p8 = pnand %p3520_p4, %p3514_p0 }
  0x76   : > { %3524 = shalt.err (!%p3521_p8)
}
  0x77   : > { %3329 = dma.hbm_to_vmem [thread:$0]  (!%p3856_p11), %s4468_s12, 512, %s608_s0, [#allocation9], %s3668_s22, %s3668_s22, %s3669_s3  }
  0x78   : > { %s3945_s20 = sadd.s32 1, %s3663_s30   ;;  %s49_s15 = sadd.s32 1, %s3659_s29 }
  0x79   : > { %s46_s25 = ssub.s32 %s3663_s30, %s3945_s20  ;;  %p56_p8 = scmp.ne.s32.totalorder %s3659_s29, %s3655_s28 }
  0x7a   : > { %p47_p4 = scmp.eq.s32.totalorder %s46_s25, 0  ;;  %p57_p13 = scmp.eq.s32.totalorder %s3663_s30, 0 }
  0x7b   : > { %p3344_p6 = scmp.lt.s32.totalorder %s3663_s30, 2  ;;  %p4470_p3 = scmp.eq.s32.totalorder %s3826_s4, 1 }
  0x7c   : > { %s3955_s18 = scalar_select %p47_p4, %s3659_s29, %s49_s15  }
  0x7d   : > { %p58_p10 = por %p57_p13, %p56_p8  ;;  %p3959_p5 = por %p4470_p3, %p56_p8 }
  0x7e   : > { %4469 = sst [smem:[#allocation20_spill]] %s3955_s18  ;;  %s648_s1 = sand.u32 1, %s3659_s29  }
  0x7f   : > { %s4471_s19 = scalar_select %p3959_p5, 1, 0 }
  0x80   : > { %s2960_s24 = sshll.u32 %s3663_s30, 7  ;;  %s3965_s0 = sshll.u32 %s648_s1, 3 }
  0x81   : > { %s4472_s26 = sld [smem:[#allocation21_spill]]  ;;  %s652_s21 = scalar_lea.vmem [#allocation2], %s3965_s0 }
  0x82   : > { %s659_s6 = sshll.u32 %s652_s21, 4  ;;  %p3973_p11 = pnand %p3344_p6, %p58_p10  ;;  %s3977_s6 = int_to_ptr.vmem [resolvable:$true] %s659_s6 }
  0x83   : > { %s4474_s15 = sld [smem:[#allocation22_spill]]  ;;  %s649_s3 = scalar_lea.sflag [#allocation3], %s648_s1 }
  0x84   : > { %p3527_p9 = pneg %p3973_p11 }
  0x87   : > { %s3970_s27 = scalar_lea.hbm %s4472_s26, %s2960_s24  ;;  %s3530_s12 = scalar_lea.hbm %s4472_s26, 256 }
  0x88   : > { %s3525_s8 = scalar_lea.hbm %s3970_s27, 128  ;;  %p3531_p1 = scmp.lt.u32.totalorder %s3970_s27, %s4472_s26 }
  0x89   : > { %s3982_s22 = scalar_lea.hbm %s4474_s15, %s2960_s24  ;;  %p3526_p7 = scmp.ne.s32.totalorder %s3970_s27, %s3525_s8 }
  0x8a   : > { %p3532_p2 = scmp.lt.u32.totalorder %s3530_s12, %s3525_s8  ;;  %p3534_p8 = scmp.lt.u32.totalorder %s3525_s8, %s3970_s27 }
  0x8b   : > { %p3528_p12 = pnand %p3527_p9, %p3526_p7 }
  0x8c   : > { %p3533_p4 = por %p3532_p2, %p3531_p1 }
  0x8d   : > { %p3529_p0 = pneg %p3528_p12 }
  0x8e   : > { %p3535_p13 = por %p3534_p8, %p3533_p4 }
  0x90   : > { %p3536_p6 = pnand %p3535_p13, %p3529_p0 }
  0x92   : > { %3539 = shalt.err (!%p3536_p6)
}
  0x93   : > { %s3540_s1 = scalar_lea.vmem %s3977_s6, 128  ;;  %s3670_s10 = smov [#allocation2]  }
  0x94   : > { %p3541_p10 = scmp.ne.s32.totalorder %s3977_s6, %s3540_s1  ;;  %s3545_s24 = sshll.u32 %s3670_s10, 4  ;;  %s3546_s24 = int_to_ptr.vmem [resolvable:$false] %s3545_s24 }
  0x95   : > { %s3547_s29 = scalar_lea.vmem %s3546_s24, 256  ;;  %p3548_p12 = scmp.lt.s32.totalorder %s3977_s6, %s3546_s24 }
  0x96   : > { %p3543_p3 = pnand %p3541_p10, %p3527_p9  ;;  %p3549_p1 = scmp.lt.s32.totalorder %s3547_s29, %s3540_s1 }
  0x98   : > { %p3544_p7 = pneg %p3543_p3  ;;  %p3550_p2 = por %p3549_p1, %p3548_p12 }
  0x9a   : > { %p3551_p4 = pnand %p3550_p2, %p3544_p7 }
  0x9c   : > { %3554 = shalt.err (!%p3551_p4)
}
  0x9d   : > { %3333 = dma.hbm_to_vmem [thread:$0]  (!%p3973_p11), %s3970_s27, 128, %s3977_s6, %s649_s3  }
  0x9e   : > { %s666_s8 = sand.u32 1, %s3663_s30   ;;  %s670_s12 = scalar_lea.vmem [#allocation5], %s3965_s0 }
  0x9f   : > { %s677_s18 = sshll.u32 %s670_s12, 4  ;;  %s667_s13 = scalar_lea.sflag [#allocation6], %s666_s8  ;;  %s678_s18 = int_to_ptr.vmem [resolvable:$true] %s677_s18 }
  0xa0   : > { %s3555_s25 = scalar_lea.hbm %s3982_s22, 128  ;;  %s3560_s10 = scalar_lea.hbm %s4474_s15, 256 }
  0xa1   : > { %p3556_p0 = scmp.ne.s32.totalorder %s3982_s22, %s3555_s25  ;;  %p3561_p6 = scmp.lt.u32.totalorder %s3982_s22, %s4474_s15 }
  0xa2   : > { %p3562_p10 = scmp.lt.u32.totalorder %s3560_s10, %s3555_s25  ;;  %p3564_p7 = scmp.lt.u32.totalorder %s3555_s25, %s3982_s22 }
  0xa3   : > { %p3558_p8 = pnand %p3556_p0, %p3527_p9 }
  0xa4   : > { %p3563_p3 = por %p3562_p10, %p3561_p6 }
  0xa5   : > { %p3559_p13 = pneg %p3558_p8 }
  0xa6   : > { %p3565_p12 = por %p3564_p7, %p3563_p3 }
  0xa8   : > { %p3566_p1 = pnand %p3565_p12, %p3559_p13 }
  0xaa   : > { %3569 = shalt.err (!%p3566_p1)
}
  0xab   : > { %s3570_s0 = scalar_lea.vmem %s678_s18, 128  ;;  %s3671_s27 = smov [#allocation5]  }
  0xac   : > { %p3571_p2 = scmp.ne.s32.totalorder %s678_s18, %s3570_s0  ;;  %s3575_s6 = sshll.u32 %s3671_s27, 4  ;;  %s3576_s6 = int_to_ptr.vmem [resolvable:$false] %s3575_s6 }
  0xad   : > { %s3577_s3 = scalar_lea.vmem %s3576_s6, 256  ;;  %p3578_p8 = scmp.lt.s32.totalorder %s678_s18, %s3576_s6 }
  0xae   : > { %p3573_p4 = pnand %p3571_p2, %p3527_p9  ;;  %p3579_p5 = scmp.lt.s32.totalorder %s3577_s3, %s3570_s0 }
  0xb0   : > { %p3574_p0 = pneg %p3573_p4  ;;  %p3580_p6 = por %p3579_p5, %p3578_p8 }
  0xb2   : > { %p3581_p10 = pnand %p3580_p6, %p3574_p0 }
  0xb4   : > { %3584 = shalt.err (!%p3581_p10)
}
  0xb5   : > { %3336 = dma.hbm_to_vmem [thread:$0]  (!%p3973_p11), %s3982_s22, 128, %s678_s18, %s667_s13  }
  0xb6   : > { %p4475_p13 = scmp.ne.s32.totalorder %s4463_s5, 0 }
  0xb7   : > { %s4033_s8 = sand.u32 (!%p4475_p13), 1, %s3655_s28   ;;  %p4476_p5 = scmp.ne.s32.totalorder (!%p4475_p13), %s4460_s23, 0 }
  0xb8   : > { %686 = sbr.rel (%p4475_p13) target bundleno = 4469 (0x1175), region = 108  ;;  %s4036_s12 = sshll.u32 (!%p4475_p13), %s4033_s8, 3 }
  0xb9   : > { %s689_s25 = scalar_lea.sflag (!%p4475_p13), [#allocation3], %s4033_s8  ;;  %s692_s21 = scalar_lea.vmem (!%p4475_p13), [#allocation2], %s4036_s12 }
  0xbf   : > { %3630 = dma.done.wait (%p4476_p5), %s689_s25, 128  }
  0xc0   : > { %3632 = vsyncadd (%p4476_p5), %s689_s25, 4294967168  ;;  %s697_s5 = sand.u32 1, %s3826_s4   ;;  %s701_s22 = scalar_lea.vmem [#allocation5], %s4036_s12 }
  0xc1   : > { %s698_s2 = scalar_lea.sflag [#allocation6], %s697_s5 }
  0xc2   : > { %3634 = dma.done.wait (%p4476_p5), %s698_s2, 128  }
  0xc3   : > { %3636 = vsyncadd (%p4476_p5), %s698_s2, 4294967168  ;;  %p4477_p11 = scmp.eq.s32.totalorder %s3826_s4, 0 }
  0xc5   : > { %3638 = dma.done.wait (%p4477_p11), [#allocation6], 512   ;;  %p4478_p9 = pmov %p4477_p11 }
  0xc7   : > { %3640 = vsyncadd (%p4478_p9), [#allocation6], 4294966784  ;;  %p4479_p3 = pmov %p4478_p9 }
  0xc9   : > { %3642 = dma.done.wait (%p4479_p3), [#allocation9], 1024   ;;  %p4480_p7 = pmov %p4479_p3 }
  0xca   : > { %v3672_v0 = vmov 0.0|0.0   ;;  %vm3673_vm0 = vmmov 0   ;;  %v3674_v1 = vmov 0.0   ;;  %s4481_s13 = sld [smem:[#allocation23_spill]]  ;;  %v4077_v8 = vld [vmem:[%s692_s21] sm:$0xff]  ;;  %vm792_vm1 = vcmask 261120  }
  0xcb   : > { %3644 = vsyncadd (%p4480_p7), [#allocation9], 4294966272  ;;  %3254 = vmatprep.subr.bf16.mxu1 %v3672_v0  ;;  %3097 = vmatprep.mubr.msk.f32.mxu1 %vm3673_vm0, %v3674_v1  ;;  %s4482_s25 = sld [smem:[#allocation24_spill]]  ;;  %s3675_s5 = smov 120   ;;  %vm869_vm2 = vcmask 64512   ;;  %vm1539_vm3 = vcmask 130048  }
  0xcc   : > { %3110 = vmatprep.subr.mxu0 %v3674_v1  ;;  %3112 = vmatprep.mubr.msk.f32.mxu0 %vm3673_vm0, %v3674_v1  ;;  %s3676_s21 = smov 96   ;;  %s3677_s2 = smov 80   ;;  %vm1541_vm4 = vcmask 195584   ;;  %vm2713_vm5 = vcmask 523264  }
  0xcd   : > { %s4436_s23 = smov 88   ;;  %s4440_s18 = smov 72  }
  0xce   : > { %s3680_s1 = smov 112   ;;  %s3681_s10 = smov 104  }
  0xcf   : > { %s3682_s24 = smov 56   ;;  %s3683_s29 = smov 64  }
  0xd0   : > { %v781_v2 = vld [vmem:[%s4481_s13] sm:$0xff]  ;;  %v782_v3 = vld [vmem:[%s4481_s13 + $0x8] sm:$0xff]  ;;  %v783_v4 = vld [vmem:[%s4481_s13 + $0x10] sm:$0xff]  ;;  %s3684_s0 = smov 48   ;;  %s3685_s27 = smov 40  }
  0xd1   : > { %v3255_v5 = vpack.c.bf16 %v782_v3, %v781_v2  ;;  %v784_v6 = vld [vmem:[%s4481_s13 + $0x18] sm:$0xff]  ;;  %v2970_v9 = vld [vmem:[%s4482_s25] ss:$0 sm:$0xff]  ;;  %s4483_s25 = sld [smem:[#allocation25_spill]]  ;;  %s4484_s6 = sld [smem:[#allocation26_spill]] }
  0xd2   : > { %v3258_v7 = vpack.c.bf16 %v784_v6, %v783_v4  ;;  %p4498_p1 = scmp.ne.s32.totalorder %s4471_s19, 0 }
  0xd3   : > { %3256 = vmatpush3.bf16.msra.mxu1 %v3255_v5 }
  0xd4   : > { %3257 = vmatprep.subr.bf16.mxu1 %v3672_v0 }
  0xd7   : > { %3259 = vmatpush3.bf16.msra.mxu1 %v3258_v7  ;;  %v1543_v6 = vld [vmem:[%s4483_s25] sm:$0xff]  ;;  %v1544_v7 = vld [vmem:[%s4483_s25 + $0x8] sm:$0xff] }
  0xd8   : > { %3100 = vmatprep.subr.mxu1 %v3674_v1 }
  0xda   : > { %3098 = vmatmul.mubr.msk.f32.vlgmr.msra.gmra.mrb[0].mxu1 %vm792_vm1, %v4077_v8 }
  0xdb   : > { %3102 = vmatprep.mubr.msk.f32.mxu1 %vm3673_vm0, %v3674_v1 }
 0x1ad   : > { %v862_v10 = vpop.f32.mrb[0].mxu1 }
 0x1ae   : > { %v4087_v11 = vadd.f32 %v2970_v9, %v862_v10  ;;  %v3099_v12 = vpop.f32.mrb[1].mxu1  ;;  %v3261_v9 = vpack.c.bf16 %v1544_v7, %v1543_v6 }
 0x1b0   : > { %1031 = vrot.lane.b32.xlu1 %v4087_v11, %s3675_s5  ;;  %867 = vrot.lane.b32.xlu0 %v4087_v11, %s3676_s21 }
 0x1b4   : > { %1198 = vrot.lane.b32.xlu1 %v4087_v11, %s3677_s2  ;;  %1033 = vrot.lane.b32.xlu0 %v4087_v11, %s4436_s23 }
 0x1b8   : > { %1363 = vrot.lane.b32.xlu1 %v4087_v11, %s4440_s18  ;;  %1196 = vrot.lane.b32.xlu0 %v4087_v11, %s3680_s1  ;;  %s2819_s18 = scalar_lea.sflag [#allocation4], %s4033_s8 }
 0x1bc   : > { %1361 = vrot.lane.b32.xlu0 %v4087_v11, %s3681_s10 }
 0x222   : > { %v1032_v13 = vpop.permute.xlu1 %1031  ;;  %v868_v14 = vpop.permute.xlu0 %867 }
 0x223   : > { %3101 = vmatpush3.xpose.msk.msra.mxu1 %vm869_vm2, %v868_v14  ;;  %v1545_v14 = vld [vmem:[%s4483_s25 + $0x10] sm:$0xff] }
 0x224   : > { %3105 = vmatprep.subr.mxu1 %v3674_v1 }
 0x226   : > { %3103 = vmatmul.mubr.msk.f32.vlgmr.msra.gmra.mrb[2].mxu1 %vm869_vm2, %v4087_v11  ;;  %v1034_v15 = vpop.permute.xlu0 %1033  ;;  %v1199_v16 = vpop.permute.xlu1 %1198 }
 0x227   : > { %3111 = vmatpush3.xpose.msk.msra.mxu0 %vm869_vm2, %v1034_v15  ;;  %3107 = vmatprep.mubr.msk.f32.mxu1 %vm3673_vm0, %v3674_v1  ;;  %v1546_v15 = vld [vmem:[%s4483_s25 + $0x18] sm:$0xff] }
 0x228   : > { %3120 = vmatprep.subr.mxu0 %v3674_v1 }
 0x22a   : > { %3113 = vmatmul.mubr.msk.f32.vlgmr.msra.gmra.mrb[0].mxu0 %vm869_vm2, %v1032_v13  ;;  %v1197_v17 = vpop.permute.xlu0 %1196  ;;  %v1364_v18 = vpop.permute.xlu1 %1363 }
 0x22b   : > { %3121 = vmatpush3.xpose.msk.msra.mxu0 %vm869_vm2, %v1199_v16  ;;  %3122 = vmatprep.mubr.msk.f32.mxu0 %vm3673_vm0, %v3674_v1  ;;  %v3264_v16 = vpack.c.bf16 %v1546_v15, %v1545_v14 }
 0x22c   : > { %3130 = vmatprep.subr.mxu0 %v3674_v1 }
 0x22e   : > { %3123 = vmatmul.mubr.msk.f32.vlgmr.msra.gmra.mrb[2].mxu0 %vm869_vm2, %v1197_v17  ;;  %v1362_v19 = vpop.permute.xlu0 %1361 }
 0x22f   : > { %3131 = vmatpush3.xpose.msk.msra.mxu0 %vm869_vm2, %v1364_v18  ;;  %3132 = vmatprep.mubr.msk.f32.mxu0 %vm3673_vm0, %v3674_v1 }
 0x230   : > { %3260 = vmatprep.subr.bf16.mxu0 %v3672_v0 }
 0x232   : > { %3133 = vmatmul.mubr.msk.f32.vlgmr.msra.gmra.mrb[4].mxu0 %vm869_vm2, %v1362_v19 }
 0x233   : > { %3148 = vmatprep.mubr.msk.f32.mxu0 %vm3673_vm0, %v3674_v1  ;;  %3262 = vmatpush3.bf16.msra.mxu0 %v3261_v9 }
 0x234   : > { %3263 = vmatprep.subr.bf16.mxu0 %v3672_v0 }
 0x237   : > { %3265 = vmatpush3.bf16.msra.mxu0 %v3264_v16 }
 0x238   : > { %3272 = vmatprep.subr.bf16.mxu0 %v3672_v0 }
 0x2f9   : > { %v940_v20 = vpop.f32.mrb[2].mxu1 }
 0x2fa   : > { %v3104_v21 = vpop.f32.mrb[3].mxu1  ;;  %v944_v22 = vsel %vm869_vm2, %v940_v20, -inf }
 0x2fb   : > { %945 = vmax.xlane.f32.xlu1 %v944_v22 }
 0x2fd   : > { %v1105_v23 = vpop.f32.mrb[0].mxu0 }
 0x2fe   : > { %v3114_v24 = vpop.f32.mrb[1].mxu0  ;;  %v1109_v25 = vsel %vm869_vm2, %v1105_v23, -inf }
 0x2ff   : > { %1110 = vmax.xlane.f32.xlu0 %v1109_v25 }
 0x301   : > { %v1270_v26 = vpop.f32.mrb[2].mxu0 }
 0x302   : > { %v3124_v27 = vpop.f32.mrb[3].mxu0  ;;  %v1274_v28 = vsel %vm869_vm2, %v1270_v26, -inf }
 0x303   : > { %1275 = vmax.xlane.f32.xlu0 %v1274_v28  ;;  %v2984_v27 = vld [vmem:[%s4484_s6] ss:$0 sm:$0xff]  ;;  %s4492_s6 = sld [smem:[#allocation34_spill]] }
 0x305   : > { %v1435_v29 = vpop.f32.mrb[4].mxu0 }
 0x306   : > { %v3134_v30 = vpop.f32.mrb[5].mxu0  ;;  %v1439_v31 = vsel %vm869_vm2, %v1435_v29, -inf }
 0x307   : > { %1440 = vmax.xlane.f32.xlu1 %v1439_v31 }
 0x318   : > { %1120 = vrot.lane.b32.xlu1 %v4087_v11, %s3682_s24  ;;  %s4438_s24 = smov 16  }
 0x388   : > { %v946_v32 = vpop.xlane.xlu1 %945 }
 0x389   : > { %v947_v33 = vsub.f32 %v940_v20, %v946_v32 }
 0x38b   : > { %v948_v34 = vmul.f32 1.442695, %v947_v33 }
 0x38c   : > { %v1111_v35 = vpop.xlane.xlu0 %1110 }
 0x38d   : > { %3403 = vpow2.f32 %v948_v34  ;;  %v1112_v36 = vsub.f32 %v1105_v23, %v1111_v35 }
 0x38f   : > { %v1113_v37 = vmul.f32 1.442695, %v1112_v36 }
 0x390   : > { %v1276_v47 = vpop.xlane.xlu0 %1275 }
 0x391   : > { %3405 = vpow2.f32 %v1113_v37  ;;  %v1277_v48 = vsub.f32 %v1270_v26, %v1276_v47 }
 0x393   : > { %v1278_v49 = vmul.f32 1.442695, %v1277_v48 }
 0x394   : > { %v1441_v38 = vpop.xlane.xlu1 %1440 }
 0x395   : > { %v1442_v39 = vsub.f32 %v1435_v29, %v1441_v38  ;;  %v1742_v38 = vld [vmem:[#allocation7] sm:$0xff] }
 0x397   : > { %v3404_v40 = vpop.eup %3403  ;;  %v1443_v41 = vmul.f32 1.442695, %v1442_v39  ;;  %v1743_v39 = vld [vmem:[#allocation7 + $0x8] sm:$0xff] }
 0x398   : > { %v950_v42 = vsel %vm869_vm2, %v3404_v40, 0.0  ;;  %v1121_v52 = vpop.permute.xlu1 %1120 }
 0x399   : > { %3407 = vpow2.f32 %v1443_v41  ;;  %951 = vadd.xlane.f32.xlu0 %v950_v42  ;;  %v1744_v41 = vld [vmem:[#allocation7 + $0x10] sm:$0xff]  ;;  %v1745_v42 = vld [vmem:[#allocation7 + $0x18] sm:$0xff] }
 0x39a   : > { %3409 = vpow2.f32 %v1278_v49 }
 0x39b   : > { %v3406_v43 = vpop.eup %3405 }
 0x39c   : > { %v1115_v44 = vsel %vm869_vm2, %v3406_v43, 0.0 }
 0x39d   : > { %1116 = vadd.xlane.f32.xlu1 %v1115_v44 }
 0x3a3   : > { %v3408_v45 = vpop.eup %3407 }
 0x3a4   : > { %v1445_v46 = vsel %vm869_vm2, %v3408_v45, 0.0  ;;  %v3410_v50 = vpop.eup %3409 }
 0x3a5   : > { %1446 = vadd.xlane.f32.xlu1 %v1445_v46  ;;  %v1280_v51 = vsel %vm869_vm2, %v3410_v50, 0.0 }
 0x3af   : > { %955 = vrot.lane.b32.xlu0 %v4087_v11, %s3683_s29  ;;  %s4437_s29 = smov 24  }
 0x3b6   : > { %1285 = vrot.lane.b32.xlu1 %v4087_v11, %s3684_s0  ;;  %s4439_s0 = smov 8  }
 0x3ce   : > { %1281 = vadd.xlane.f32.xlu0 %v1280_v51 }
 0x3e4   : > { %1450 = vrot.lane.b32.xlu0 %v4087_v11, %s3685_s27  ;;  %s4485_s27 = sld [smem:[#allocation27_spill]] }
 0x3ea   : > { %v1658_v44 = vld [vmem:[%s4485_s27] sm:$0xff]  ;;  %v1660_v47 = vld [vmem:[%s4485_s27 + $0x10] sm:$0xff]  ;;  %v1661_v48 = vld [vmem:[%s4485_s27 + $0x18] sm:$0xff] }
 0x3eb   : > { %v3270_v49 = vpack.c.bf16 %v1661_v48, %v1660_v47 }
 0x426   : > { %v952_v53 = vpop.xlane.xlu0 %951 }
 0x427   : > { %3411 = vrcp.f32 %v952_v53 }
 0x42a   : > { %v956_v54 = vpop.permute.xlu0 %955  ;;  %v1117_v55 = vpop.xlane.xlu1 %1116 }
 0x42b   : > { %3413 = vrcp.f32 %v1117_v55  ;;  %3106 = vmatpush3.msra.mxu1 %v956_v54  ;;  %v2986_v54 = vld [vmem:[%s4416_s16] ss:$0 sm:$0xff] }
 0x42c   : > { %3115 = vmatprep.subr.mxu1 %v3674_v1 }
 0x431   : > { %v3412_v56 = vpop.eup %3411 }
 0x432   : > { %v954_v57 = vmul.f32 %v3412_v56, %v3404_v40  ;;  %v1447_v58 = vpop.xlane.xlu1 %1446  ;;  %v3273_v40 = vpack.c.bf16 %v1743_v39, %v1742_v38  ;;  %v2987_v56 = vld [vmem:[%s4417_s17] ss:$0 sm:$0xff] }
 0x434   : > { %3108 = vmatmul.mubr.msk.f32.vlgmr.msra.gmra.mrb[4].mxu1 %vm869_vm2, %v954_v57 }
 0x435   : > { %v3414_v59 = vpop.eup %3413  ;;  %3116 = vmatpush3.msra.mxu1 %v1121_v52  ;;  %3117 = vmatprep.mubr.msk.f32.mxu1 %vm3673_vm0, %v3674_v1 }
 0x436   : > { %v1119_v60 = vmul.f32 %v3414_v59, %v3406_v43  ;;  %v1286_v61 = vpop.permute.xlu1 %1285  ;;  %3125 = vmatprep.subr.mxu1 %v3674_v1  ;;  %v780_v43 = vld [vmem:[%s701_s22] sm:$0xff]  ;;  %v2990_v59 = vld [vmem:[%s4409_s9] ss:$0 sm:$0xff] }
 0x438   : > { %3118 = vmatmul.mubr.msk.f32.vlgmr.msra.gmra.mrb[6].mxu1 %vm869_vm2, %v1119_v60 }
 0x439   : > { %3126 = vmatpush3.msra.mxu1 %v1286_v61  ;;  %3127 = vmatprep.mubr.msk.f32.mxu1 %vm3673_vm0, %v3674_v1 }
 0x43a   : > { %3135 = vmatprep.subr.mxu1 %v3674_v1 }
 0x45b   : > { %v1282_v62 = vpop.xlane.xlu0 %1281 }
 0x45c   : > { %3415 = vrcp.f32 %v1282_v62 }
 0x45d   : > { %3417 = vrcp.f32 %v1447_v58 }
 0x45f   : > { %v1451_v4 = vpop.permute.xlu0 %1450 }
 0x466   : > { %v3416_v63 = vpop.eup %3415 }
 0x467   : > { %v1284_v2 = vmul.f32 %v3416_v63, %v3410_v50  ;;  %v3418_v3 = vpop.eup %3417 }
 0x468   : > { %v1449_v5 = vmul.f32 %v3418_v3, %v3408_v45  ;;  %v1659_v45 = vld [vmem:[%s4485_s27 + $0x8] sm:$0xff] }
 0x469   : > { %3128 = vmatmul.mubr.msk.f32.vlgmr.msra.gmra.mrb[8].mxu1 %vm869_vm2, %v1284_v2  ;;  %v3267_v46 = vpack.c.bf16 %v1659_v45, %v1658_v44  ;;  %v2988_v2 = vld [vmem:[%s4407_s7] ss:$0 sm:$0xff] }
 0x46a   : > { %3136 = vmatpush3.msra.mxu1 %v1451_v4  ;;  %3137 = vmatprep.mubr.msk.f32.mxu1 %vm3673_vm0, %v3674_v1 }
 0x46b   : > { %3266 = vmatprep.subr.bf16.mxu1 %v3672_v0 }
 0x46d   : > { %3138 = vmatmul.mubr.msk.f32.vlgmr.msra.gmra.mrb[10].mxu1 %vm869_vm2, %v1449_v5 }
 0x46e   : > { %3159 = vmatprep.mubr.msk.f32.mxu1 %vm3673_vm0, %v3674_v1  ;;  %3268 = vmatpush3.bf16.msra.mxu1 %v3267_v46 }
 0x46f   : > { %3269 = vmatprep.subr.bf16.mxu1 %v3672_v0 }
 0x472   : > { %3271 = vmatpush3.bf16.msra.mxu1 %v3270_v49 }
 0x473   : > { %3173 = vmatprep.subr.mxu1 %v3674_v1 }
 0x507   : > { %v1027_v10 = vpop.f32.mrb[4].mxu1 }
 0x508   : > { %v3109_v11 = vpop.f32.mrb[5].mxu1 }
 0x50b   : > { %v1192_v12 = vpop.f32.mrb[6].mxu1 }
 0x50c   : > { %1527 = vrot.lane.b32.xlu1 %v1192_v12, %s4439_s0  ;;  %v3119_v13 = vpop.f32.mrb[7].mxu1  ;;  %s4497_s0 = sld [smem:[#allocation37_spill]] }
 0x53c   : > { %v1357_v17 = vpop.f32.mrb[8].mxu1 }
 0x53d   : > { %1531 = vrot.lane.b32.xlu0 %v1357_v17, %s4438_s24  ;;  %v3129_v18 = vpop.f32.mrb[9].mxu1  ;;  %s4491_s24 = sld [smem:[#allocation33_spill]] }
 0x540   : > { %v1522_v19 = vpop.f32.mrb[10].mxu1 }
 0x541   : > { %1535 = vrot.lane.b32.xlu1 %v1522_v19, %s4437_s29  ;;  %v3139_v20 = vpop.f32.mrb[11].mxu1  ;;  %s4493_s29 = sld [smem:[#allocation31_spill]] }
 0x57e   : > { %v1528_v21 = vpop.permute.xlu1 %1527 }
 0x57f   : > { %v1538_v23 = vsel %vm869_vm2, %v1027_v10, %v1528_v21 }
 0x5af   : > { %v1532_v22 = vpop.permute.xlu0 %1531 }
 0x5b0   : > { %v1540_v24 = vsel %vm1539_vm3, %v1538_v23, %v1532_v22 }
 0x5b3   : > { %v1536_v25 = vpop.permute.xlu1 %1535 }
 0x5b4   : > { %v1542_v26 = vsel %vm1541_vm4, %v1540_v24, %v1536_v25 }
 0x5b5   : > { %3149 = vmatmul.mubr.msk.f32.vlgmr.msra.gmra.mrb[6].mxu0 %vm792_vm1, %v1542_v26 }
 0x5b6   : > { %3170 = vmatprep.mubr.msk.f32.mxu0 %vm3673_vm0, %v3674_v1  ;;  %3274 = vmatpush3.bf16.msra.mxu0 %v3273_v40 }
 0x5b7   : > { %3275 = vmatprep.subr.bf16.mxu0 %v3672_v0 }
 0x688   : > { %v1623_v28 = vpop.f32.mrb[6].mxu0 }
 0x689   : > { %v1624_v29 = vadd.f32 %v2984_v27, %v1623_v28  ;;  %v3150_v30 = vpop.f32.mrb[7].mxu0 }
 0x68b   : > { %v1627_v31 = vadd.f32 %v1624_v29, %v4077_v8  ;;  %v3276_v8 = vpack.c.bf16 %v1745_v42, %v1744_v41 }
 0x68d   : > { %v1628_v32 = vsel %vm792_vm1, %v1627_v31, 0.0  ;;  %3277 = vmatpush3.bf16.msra.mxu0 %v3276_v8 }
 0x68e   : > { %1629 = vadd.xlane.f32.xlu0 %v1628_v32  ;;  %3183 = vmatprep.subr.mxu0 %v3674_v1 }
 0x690   : > { %3171 = vmatmul.mubr.msk.f32.vlgmr.msra.gmra.mrb[8].mxu0 %vm792_vm1, %v780_v43 }
 0x691   : > { %3185 = vmatprep.mubr.msk.f32.mxu0 %vm3673_vm0, %v3674_v1 }
 0x71b   : > { %v1630_v33 = vpop.xlane.xlu0 %1629 }
 0x71c   : > { %v1632_v34 = vmul.f32 0.03125, %v1630_v33 }
 0x71e   : > { %v1633_v35 = vsub.f32 %v1627_v31, %v1632_v34 }
 0x720   : > { %v1634_v36 = vmul.f32 %v1633_v35, %v1633_v35 }
 0x722   : > { %v1635_v37 = vsel %vm792_vm1, %v1634_v36, 0.0 }
 0x723   : > { %1636 = vadd.xlane.f32.xlu1 %v1635_v37 }
 0x763   : > { %v1822_v60 = vpop.f32.mrb[8].mxu0 }
 0x764   : > { %v4217_v61 = vadd.f32 %v2990_v59, %v1822_v60  ;;  %v3172_v62 = vpop.f32.mrb[9].mxu0 }
 0x765   : > { %v2499_v62 = vld [vmem:[#allocation8] sm:$0xff] }
 0x766   : > { %1991 = vrot.lane.b32.xlu0 %v4217_v61, %s3675_s5 }
 0x76a   : > { %2156 = vrot.lane.b32.xlu0 %v4217_v61, %s3680_s1 }
 0x76e   : > { %2321 = vrot.lane.b32.xlu0 %v4217_v61, %s3681_s10 }
 0x7b0   : > { %v1637_v50 = vpop.xlane.xlu1 %1636 }
 0x7b1   : > { %v1638_v51 = vmul.f32 0.03125, %v1637_v50 }
 0x7b3   : > { %v1639_v52 = vadd.f32 1e-05, %v1638_v51 }
 0x7b5   : > { %3419 = vrsqrt.f32 %v1639_v52 }
 0x7bf   : > { %v3420_v53 = vpop.eup %3419 }
 0x7c0   : > { %v1641_v55 = vmul.f32 %v3420_v53, %v1633_v35 }
 0x7c2   : > { %v1649_v57 = vmul.f32 %v2986_v54, %v1641_v55 }
 0x7c4   : > { %v4208_v58 = vadd.f32 %v2987_v56, %v1649_v57 }
 0x7c6   : > { %3160 = vmatmul.mubr.msk.f32.vlgmr.msra.gmra.mrb[12].mxu1 %vm792_vm1, %v4208_v58 }
 0x7c7   : > { %3175 = vmatprep.mubr.msk.f32.mxu1 %vm3673_vm0, %v3674_v1  ;;  %3174 = vmatpush3.xpose.msk.msra.mxu1 %vm869_vm2, %v4217_v61 }
 0x7c8   : > { %3178 = vmatprep.subr.mxu1 %v3674_v1 }
 0x7d8   : > { %v1992_v63 = vpop.permute.xlu0 %1991 }
 0x7d9   : > { %3184 = vmatpush3.xpose.msk.msra.mxu0 %vm869_vm2, %v1992_v63  ;;  %v2500_v63 = vld [vmem:[#allocation8 + $0x8] sm:$0xff] }
 0x7da   : > { %3193 = vmatprep.subr.mxu0 %v3674_v1 }
 0x7dc   : > { %v2157_v6 = vpop.permute.xlu0 %2156 }
 0x7e0   : > { %v2322_v10 = vpop.permute.xlu0 %2321 }
 0x899   : > { %v1738_v3 = vpop.f32.mrb[12].mxu1 }
 0x89a   : > { %v1739_v4 = vadd.f32 %v2988_v2, %v1738_v3  ;;  %v3161_v5 = vpop.f32.mrb[13].mxu1  ;;  %v3279_v2 = vpack.c.bf16 %v2500_v63, %v2499_v62  ;;  %v2501_v3 = vld [vmem:[#allocation8 + $0x10] sm:$0xff] }
 0x89c   : > { %1989 = vrot.lane.b32.xlu1 %v1739_v4, %s3675_s5  ;;  %3176 = vmatmul.mubr.msk.f32.vlgmr.msra.gmra.mrb[14].mxu1 %vm869_vm2, %v1739_v4  ;;  %s4486_s5 = smov 72  }
 0x89d   : > { %3180 = vmatprep.mubr.msk.f32.mxu1 %vm3673_vm0, %v3674_v1 }
 0x8a0   : > { %2154 = vrot.lane.b32.xlu1 %v1739_v4, %s3680_s1  ;;  %s4489_s1 = smov 16  }
 0x8a4   : > { %2319 = vrot.lane.b32.xlu1 %v1739_v4, %s3681_s10  ;;  %v2502_v4 = vld [vmem:[#allocation8 + $0x18] sm:$0xff]  ;;  %s4490_s10 = smov 24  }
 0x8a5   : > { %v3282_v5 = vpack.c.bf16 %v2502_v4, %v2501_v3 }
 0x90e   : > { %v1990_v7 = vpop.permute.xlu1 %1989 }
 0x90f   : > { %3186 = vmatmul.mubr.msk.f32.vlgmr.msra.gmra.mrb[10].mxu0 %vm869_vm2, %v1990_v7 }
 0x910   : > { %3194 = vmatpush3.xpose.msk.msra.mxu0 %vm869_vm2, %v2157_v6  ;;  %3195 = vmatprep.mubr.msk.f32.mxu0 %vm3673_vm0, %v3674_v1 }
 0x911   : > { %3203 = vmatprep.subr.mxu0 %v3674_v1 }
 0x912   : > { %v2155_v9 = vpop.permute.xlu1 %2154 }
 0x913   : > { %3196 = vmatmul.mubr.msk.f32.vlgmr.msra.gmra.mrb[12].mxu0 %vm869_vm2, %v2155_v9 }
 0x914   : > { %3204 = vmatpush3.xpose.msk.msra.mxu0 %vm869_vm2, %v2322_v10  ;;  %3205 = vmatprep.mubr.msk.f32.mxu0 %vm3673_vm0, %v3674_v1 }
 0x915   : > { %3278 = vmatprep.subr.bf16.mxu0 %v3672_v0 }
 0x916   : > { %v2320_v11 = vpop.permute.xlu1 %2319 }
 0x917   : > { %3206 = vmatmul.mubr.msk.f32.vlgmr.msra.gmra.mrb[14].mxu0 %vm869_vm2, %v2320_v11 }
 0x918   : > { %3221 = vmatprep.mubr.msk.f32.mxu0 %vm3673_vm0, %v3674_v1  ;;  %3280 = vmatpush3.bf16.msra.mxu0 %v3279_v2 }
 0x919   : > { %3281 = vmatprep.subr.bf16.mxu0 %v3672_v0 }
 0x91c   : > { %3283 = vmatpush3.bf16.msra.mxu0 %v3282_v5 }
 0x91d   : > { %3290 = vmatprep.subr.bf16.mxu0 %v3672_v0 }
 0x96f   : > { %v1898_v12 = vpop.f32.mrb[14].mxu1 }
 0x970   : > { %v3177_v13 = vpop.f32.mrb[15].mxu1  ;;  %v1902_v14 = vsel %vm869_vm2, %v1898_v12, -inf }
 0x971   : > { %1903 = vmax.xlane.f32.xlu0 %v1902_v14 }
 0x9e2   : > { %v2063_v15 = vpop.f32.mrb[10].mxu0 }
 0x9e3   : > { %v3187_v16 = vpop.f32.mrb[11].mxu0  ;;  %v2067_v17 = vsel %vm869_vm2, %v2063_v15, -inf }
 0x9e4   : > { %2068 = vmax.xlane.f32.xlu1 %v2067_v17 }
 0x9e6   : > { %v2228_v18 = vpop.f32.mrb[12].mxu0 }
 0x9e7   : > { %v3197_v19 = vpop.f32.mrb[13].mxu0  ;;  %v2232_v20 = vsel %vm869_vm2, %v2228_v18, -inf }
 0x9e8   : > { %2233 = vmax.xlane.f32.xlu0 %v2232_v20  ;;  %v3004_v19 = vld [vmem:[%s4411_s11] ss:$0 sm:$0xff] }
 0x9ea   : > { %v2393_v21 = vpop.f32.mrb[14].mxu0 }
 0x9eb   : > { %v3207_v22 = vpop.f32.mrb[15].mxu0  ;;  %v2397_v23 = vsel %vm869_vm2, %v2393_v21, -inf }
 0x9ec   : > { %2398 = vmax.xlane.f32.xlu0 %v2397_v23 }
 0x9f5   : > { %1913 = vrot.lane.b32.xlu1 %v4217_v61, %s3676_s21  ;;  %s4487_s21 = smov 88  }
 0x9fe   : > { %v1904_v24 = vpop.xlane.xlu0 %1903 }
 0x9ff   : > { %v1905_v25 = vsub.f32 %v1898_v12, %v1904_v24 }
 0xa01   : > { %v1906_v26 = vmul.f32 1.442695, %v1905_v25 }
 0xa03   : > { %3421 = vpow2.f32 %v1906_v26 }
 0xa0d   : > { %v3422_v27 = vpop.eup %3421 }
 0xa0e   : > { %v1908_v28 = vsel %vm869_vm2, %v3422_v27, 0.0 }
 0xa19   : > { %1909 = vadd.xlane.f32.xlu1 %v1908_v28 }
 0xa71   : > { %v2069_v29 = vpop.xlane.xlu1 %2068 }
 0xa72   : > { %v2070_v30 = vsub.f32 %v2063_v15, %v2069_v29 }
 0xa74   : > { %v2071_v31 = vmul.f32 1.442695, %v2070_v30  ;;  %v2614_v30 = vld [vmem:[#allocation10 + $0x8] sm:$0xff] }
 0xa75   : > { %v1914_v32 = vpop.permute.xlu1 %1913  ;;  %v2234_v33 = vpop.xlane.xlu0 %2233 }
 0xa76   : > { %3423 = vpow2.f32 %v2071_v31  ;;  %v2235_v34 = vsub.f32 %v2228_v18, %v2234_v33  ;;  %3179 = vmatpush3.msra.mxu1 %v1914_v32  ;;  %v2615_v32 = vld [vmem:[#allocation10 + $0x10] sm:$0xff]  ;;  %v2616_v33 = vld [vmem:[#allocation10 + $0x18] sm:$0xff] }
 0xa77   : > { %3188 = vmatprep.subr.mxu1 %v3674_v1 }
 0xa78   : > { %v2236_v35 = vmul.f32 1.442695, %v2235_v34  ;;  %v3288_v34 = vpack.c.bf16 %v2616_v33, %v2615_v32 }
 0xa79   : > { %v2399_v36 = vpop.xlane.xlu0 %2398 }
 0xa7a   : > { %3425 = vpow2.f32 %v2236_v35  ;;  %v2400_v37 = vsub.f32 %v2393_v21, %v2399_v36  ;;  %v2699_v35 = vld [vmem:[%s4414_s14 + $0x8] sm:$0xff]  ;;  %v2700_v36 = vld [vmem:[%s4414_s14 + $0x10] sm:$0xff] }
 0xa7c   : > { %v2401_v38 = vmul.f32 1.442695, %v2400_v37 }
 0xa7e   : > { %3427 = vpow2.f32 %v2401_v38  ;;  %v2701_v38 = vld [vmem:[%s4414_s14 + $0x18] sm:$0xff] }
 0xa80   : > { %v3424_v39 = vpop.eup %3423 }
 0xa81   : > { %v2073_v40 = vsel %vm869_vm2, %v3424_v39, 0.0 }
 0xa82   : > { %2074 = vadd.xlane.f32.xlu0 %v2073_v40  ;;  %v2702_v40 = vld [vmem:[%s4414_s14 + $0x20] sm:$0xff] }
 0xa84   : > { %v3426_v41 = vpop.eup %3425 }
 0xa85   : > { %v2238_v42 = vsel %vm869_vm2, %v3426_v41, 0.0 }
 0xa86   : > { %2239 = vadd.xlane.f32.xlu1 %v2238_v42 }
 0xa88   : > { %v3428_v8 = vpop.eup %3427 }
 0xa89   : > { %v2403_v43 = vsel %vm869_vm2, %v3428_v8, 0.0 }
 0xa8a   : > { %2404 = vadd.xlane.f32.xlu0 %v2403_v43 }
 0xa97   : > { %2243 = vrot.lane.b32.xlu1 %v4217_v61, %s3677_s2  ;;  %s4488_s2 = smov 8  }
 0xa9b   : > { %2408 = vrot.lane.b32.xlu1 %v4217_v61, %s4486_s5 }
 0xaa0   : > { %2078 = vrot.lane.b32.xlu0 %v4217_v61, %s4487_s21  ;;  %s4496_s21 = sld [smem:[#allocation36_spill]] }
 0xaa6   : > { %v1910_v44 = vpop.xlane.xlu1 %1909 }
 0xaa7   : > { %3429 = vrcp.f32 %v1910_v44 }
 0xab1   : > { %v3430_v45 = vpop.eup %3429 }
 0xab2   : > { %v1912_v46 = vmul.f32 %v3430_v45, %v3422_v27 }
 0xab4   : > { %3181 = vmatmul.mubr.msk.f32.vlgmr.msra.gmra.mrb[16].mxu1 %vm869_vm2, %v1912_v46  ;;  %v3006_v46 = vld [vmem:[%s4491_s24] ss:$0 sm:$0xff]  ;;  %s4494_s24 = sld [smem:[#allocation32_spill]] }
 0xab5   : > { %3190 = vmatprep.mubr.msk.f32.mxu1 %vm3673_vm0, %v3674_v1 }
 0xb0f   : > { %v2075_v47 = vpop.xlane.xlu0 %2074 }
 0xb10   : > { %3431 = vrcp.f32 %v2075_v47 }
 0xb13   : > { %v2240_v48 = vpop.xlane.xlu1 %2239 }
 0xb14   : > { %3433 = vrcp.f32 %v2240_v48  ;;  %v3007_v48 = vld [vmem:[%s4492_s6] ss:$0 sm:$0xff]  ;;  %s4495_s6 = sld [smem:[#allocation35_spill]] }
 0xb17   : > { %v2405_v49 = vpop.xlane.xlu0 %2404  ;;  %v2244_v52 = vpop.permute.xlu1 %2243 }
 0xb18   : > { %3435 = vrcp.f32 %v2405_v49 }
 0xb1a   : > { %v3432_v50 = vpop.eup %3431 }
 0xb1b   : > { %v2077_v51 = vmul.f32 %v3432_v50, %v3424_v39  ;;  %v2079_v53 = vpop.permute.xlu0 %2078  ;;  %v2409_v56 = vpop.permute.xlu1 %2408  ;;  %v3294_v39 = vpack.c.bf16 %v2701_v38, %v2700_v36 }
 0xb1c   : > { %3189 = vmatpush3.msra.mxu1 %v2079_v53  ;;  %v3008_v53 = vld [vmem:[%s4493_s29] ss:$0 sm:$0xff] }
 0xb1d   : > { %3191 = vmatmul.mubr.msk.f32.vlgmr.msra.gmra.mrb[18].mxu1 %vm869_vm2, %v2077_v51  ;;  %3198 = vmatprep.subr.mxu1 %v3674_v1  ;;  %v2705_v51 = vld [vmem:[%s4414_s14 + $0x38] sm:$0xff] }
 0xb1e   : > { %v3434_v54 = vpop.eup %3433  ;;  %3199 = vmatpush3.msra.mxu1 %v2244_v52  ;;  %3200 = vmatprep.mubr.msk.f32.mxu1 %vm3673_vm0, %v3674_v1 }
 0xb1f   : > { %v2242_v55 = vmul.f32 %v3434_v54, %v3426_v41  ;;  %3208 = vmatprep.subr.mxu1 %v3674_v1  ;;  %v2703_v41 = vld [vmem:[%s4414_s14 + $0x28] sm:$0xff] }
 0xb20   : > { %v3297_v42 = vpack.c.bf16 %v2703_v41, %v2702_v40 }
 0xb21   : > { %3201 = vmatmul.mubr.msk.f32.vlgmr.msra.gmra.mrb[20].mxu1 %vm869_vm2, %v2242_v55 }
 0xb22   : > { %v3436_v57 = vpop.eup %3435  ;;  %3209 = vmatpush3.msra.mxu1 %v2409_v56  ;;  %3210 = vmatprep.mubr.msk.f32.mxu1 %vm3673_vm0, %v3674_v1 }
 0xb23   : > { %v2407_v59 = vmul.f32 %v3436_v57, %v3428_v8  ;;  %3284 = vmatprep.subr.bf16.mxu1 %v3672_v0 }
 0xb25   : > { %3211 = vmatmul.mubr.msk.f32.vlgmr.msra.gmra.mrb[22].mxu1 %vm869_vm2, %v2407_v59  ;;  %v3010_v59 = vld [vmem:[%s4494_s24] ss:$0 sm:$0xff] }
 0xb26   : > { %3232 = vmatprep.mubr.msk.f32.mxu1 %vm3673_vm0, %v3674_v1 }
 0xb87   : > { %v1985_v60 = vpop.f32.mrb[16].mxu1 }
 0xb88   : > { %v3182_v61 = vpop.f32.mrb[17].mxu1 }
 0xbf0   : > { %v2150_v6 = vpop.f32.mrb[18].mxu1 }
 0xbf1   : > { %2485 = vrot.lane.b32.xlu0 %v2150_v6, %s4488_s2  ;;  %v3192_v7 = vpop.f32.mrb[19].mxu1  ;;  %s3015_s2 = sshll.u32 %s3826_s4, 7  ;;  %s3689_s4 = smov [#allocation11]  }
 0xbf2   : > { %s4355_s24 = scalar_lea.hbm %s4497_s0, %s3015_s2 }
 0xbf4   : > { %v2315_v9 = vpop.f32.mrb[20].mxu1 }
 0xbf5   : > { %2489 = vrot.lane.b32.xlu1 %v2315_v9, %s4489_s1  ;;  %v3202_v10 = vpop.f32.mrb[21].mxu1  ;;  %s778_s1 = scalar_lea.vmem [#allocation11], %s4036_s12  ;;  %s3589_s12 = sshll.u32 %s3689_s4, 4  ;;  %s3590_s12 = int_to_ptr.vmem [resolvable:$false] %s3589_s12 }
 0xbf8   : > { %v2480_v11 = vpop.f32.mrb[22].mxu1 }
 0xbf9   : > { %2493 = vrot.lane.b32.xlu0 %v2480_v11, %s4490_s10  ;;  %v3212_v12 = vpop.f32.mrb[23].mxu1  ;;  %s2832_s10 = sshll.u32 %s778_s1, 4  ;;  %s4357_s10 = int_to_ptr.vmem [resolvable:$true] %s2832_s10 }
 0xbfa   : > { %s3585_s23 = scalar_lea.vmem %s4357_s10, 128  ;;  %p3592_p0 = scmp.lt.s32.totalorder %s4357_s10, %s3590_s12 }
 0xbfb   : > { %p3586_p12 = scmp.ne.s32.totalorder %s4357_s10, %s3585_s23 }
 0xbfd   : > { %p3587_p2 = pnand %p3586_p12, %p4498_p1 }
 0xbff   : > { %p3588_p4 = pneg %p3587_p2 }
 0xc63   : > { %v2486_v13 = vpop.permute.xlu0 %2485 }
 0xc64   : > { %v2496_v15 = vsel %vm869_vm2, %v1985_v60, %v2486_v13  ;;  %v3012_v13 = vld [vmem:[%s4495_s6] ss:$0 sm:$0xff]  ;;  %s3591_s6 = scalar_lea.vmem %s3590_s12, 256 }
 0xc65   : > { %p3593_p8 = scmp.lt.s32.totalorder %s3591_s6, %s3585_s23 }
 0xc67   : > { %v2490_v14 = vpop.permute.xlu1 %2489  ;;  %p3594_p6 = por %p3593_p8, %p3592_p0 }
 0xc68   : > { %v2497_v16 = vsel %vm1539_vm3, %v2496_v15, %v2490_v14  ;;  %v3013_v15 = vld [vmem:[%s4496_s21] ss:$0 sm:$0xff] }
 0xc69   : > { %p3595_p10 = pnand %p3594_p6, %p3588_p4 }
 0xc6b   : > { %v2494_v17 = vpop.permute.xlu0 %2493 }
 0xc6c   : > { %v2498_v18 = vsel %vm1541_vm4, %v2497_v16, %v2494_v17 }
 0xc6d   : > { %3222 = vmatmul.mubr.msk.f32.vlgmr.msra.gmra.mrb[16].mxu0 %vm792_vm1, %v2498_v18 }
 0xc6e   : > { %3251 = vmatprep.mubr.msk.f32.mxu0 %vm3673_vm0, %v3674_v1  ;;  %v2613_v1 = vld [vmem:[#allocation10] sm:$0xff] }
 0xc6f   : > { %v3285_v31 = vpack.c.bf16 %v2614_v30, %v2613_v1 }
 0xc71   : > { %3286 = vmatpush3.bf16.msra.mxu1 %v3285_v31 }
 0xc72   : > { %3287 = vmatprep.subr.bf16.mxu1 %v3672_v0 }
 0xc75   : > { %3289 = vmatpush3.bf16.msra.mxu1 %v3288_v34 }
 0xd40   : > { %v2579_v20 = vpop.f32.mrb[16].mxu0 }
 0xd41   : > { %v2580_v21 = vadd.f32 %v3004_v19, %v2579_v20  ;;  %v3223_v22 = vpop.f32.mrb[17].mxu0 }
 0xd43   : > { %v2583_v23 = vadd.f32 %v2580_v21, %v4208_v58  ;;  %v2698_v58 = vld [vmem:[%s4414_s14] sm:$0xff] }
 0xd44   : > { %v3291_v37 = vpack.c.bf16 %v2699_v35, %v2698_v58 }
 0xd45   : > { %v2584_v24 = vsel %vm792_vm1, %v2583_v23, 0.0 }
 0xd46   : > { %2585 = vadd.xlane.f32.xlu1 %v2584_v24  ;;  %3292 = vmatpush3.bf16.msra.mxu0 %v3291_v37 }
 0xd47   : > { %3293 = vmatprep.subr.bf16.mxu0 %v3672_v0 }
 0xd4a   : > { %3295 = vmatpush3.bf16.msra.mxu0 %v3294_v39 }
 0xd4b   : > { %3296 = vmatprep.subr.bf16.mxu0 %v3672_v0 }
 0xd4e   : > { %3298 = vmatpush3.bf16.msra.mxu0 %v3297_v42 }
 0xd4f   : > { %3299 = vmatprep.subr.bf16.mxu0 %v3672_v0  ;;  %v2704_v0 = vld [vmem:[%s4414_s14 + $0x30] sm:$0xff] }
 0xd50   : > { %v3300_v52 = vpack.c.bf16 %v2705_v51, %v2704_v0 }
 0xd52   : > { %3301 = vmatpush3.bf16.msra.mxu0 %v3300_v52 }
 0xdd3   : > { %v2586_v25 = vpop.xlane.xlu1 %2585 }
 0xdd4   : > { %v2587_v26 = vmul.f32 0.03125, %v2586_v25 }
 0xdd6   : > { %v2588_v27 = vsub.f32 %v2583_v23, %v2587_v26 }
 0xdd8   : > { %v2589_v28 = vmul.f32 %v2588_v27, %v2588_v27 }
 0xdda   : > { %v2590_v29 = vsel %vm792_vm1, %v2589_v28, 0.0 }
 0xddb   : > { %2591 = vadd.xlane.f32.xlu0 %v2590_v29 }
 0xe68   : > { %v2592_v8 = vpop.xlane.xlu0 %2591 }
 0xe69   : > { %v2593_v43 = vmul.f32 0.03125, %v2592_v8 }
 0xe6b   : > { %v2594_v44 = vadd.f32 1e-05, %v2593_v43 }
 0xe6d   : > { %3437 = vrsqrt.f32 %v2594_v44 }
 0xe77   : > { %v3438_v45 = vpop.eup %3437 }
 0xe78   : > { %v2596_v47 = vmul.f32 %v3438_v45, %v2588_v27 }
 0xe7a   : > { %v2604_v49 = vmul.f32 %v3006_v46, %v2596_v47 }
 0xe7c   : > { %v2612_v50 = vadd.f32 %v3007_v48, %v2604_v49 }
 0xe7e   : > { %3233 = vmatmul.mubr.msk.f32.vlgmr.msra.gmra.mrb[24].mxu1 %vm792_vm1, %v2612_v50 }
 0xf51   : > { %v2693_v54 = vpop.f32.mrb[24].mxu1 }
 0xf52   : > { %v2694_v55 = vadd.f32 %v3008_v53, %v2693_v54  ;;  %v3234_v56 = vpop.f32.mrb[25].mxu1 }
 0xf54   : > { %v2697_v57 = vmax.f32 %v2694_v55, 0.0 }
 0xf56   : > { %3252 = vmatmul.mubr.msk.f32.vlgmr.msra.gmra.mrb[18].mxu0 %vm2713_vm5, %v2697_v57 }
0x1029   : > { %v2783_v60 = vpop.f32.mrb[18].mxu0 }
0x102a   : > { %v2784_v61 = vadd.f32 %v3010_v59, %v2783_v60  ;;  %v3253_v62 = vpop.f32.mrb[19].mxu0 }
0x102c   : > { %v2787_v63 = vadd.f32 %v2784_v61, %v2612_v50 }
0x102e   : > { %v2788_v2 = vsel %vm792_vm1, %v2787_v63, 0.0 }
0x102f   : > { %2789 = vadd.xlane.f32.xlu0 %v2788_v2 }
0x10bc   : > { %v2790_v3 = vpop.xlane.xlu0 %2789 }
0x10bd   : > { %v2791_v4 = vmul.f32 0.03125, %v2790_v3 }
0x10bf   : > { %v2792_v5 = vsub.f32 %v2787_v63, %v2791_v4 }
0x10c1   : > { %v2793_v6 = vmul.f32 %v2792_v5, %v2792_v5 }
0x10c3   : > { %v2794_v7 = vsel %vm792_vm1, %v2793_v6, 0.0 }
0x10c4   : > { %2795 = vadd.xlane.f32.xlu1 %v2794_v7 }
0x1151   : > { %v2796_v9 = vpop.xlane.xlu1 %2795 }
0x1152   : > { %v2797_v10 = vmul.f32 0.03125, %v2796_v9 }
0x1154   : > { %v2798_v11 = vadd.f32 1e-05, %v2797_v10 }
0x1156   : > { %3439 = vrsqrt.f32 %v2798_v11 }
0x1160   : > { %v3440_v12 = vpop.eup %3439 }
0x1161   : > { %v2800_v14 = vmul.f32 %v3440_v12, %v2792_v5 }
0x1163   : > { %v2808_v16 = vmul.f32 %v3012_v13, %v2800_v14 }
0x1165   : > { %v2816_v17 = vadd.f32 %v3013_v15, %v2808_v16 }
0x1167   : > { %2817 = vst.msk [vmem:[%s778_s1] sm:$0xff] %vm792_vm1, %v2816_v17 }
0x1168   : > { %3598 = shalt.err (!%p3595_p10)
}
0x1169   : > { %s3599_s8 = scalar_lea.hbm %s4355_s24, 128  ;;  %s3603_s21 = scalar_lea.hbm %s4497_s0, 256 }
0x116a   : > { %p3600_p13 = scmp.ne.s32.totalorder %s4355_s24, %s3599_s8  ;;  %p3604_p9 = scmp.lt.u32.totalorder %s4355_s24, %s4497_s0 }
0x116b   : > { %p3605_p3 = scmp.lt.u32.totalorder %s3603_s21, %s3599_s8  ;;  %p3607_p12 = scmp.lt.u32.totalorder %s3599_s8, %s4355_s24 }
0x116c   : > { %p3601_p5 = pnand %p3600_p13, %p4498_p1 }
0x116d   : > { %p3606_p7 = por %p3605_p3, %p3604_p9 }
0x116e   : > { %p3602_p11 = pneg %p3601_p5 }
0x116f   : > { %p3608_p2 = por %p3607_p12, %p3606_p7 }
0x1171   : > { %p3609_p4 = pnand %p3608_p2, %p3602_p11 }
0x1173   : > { %3612 = shalt.err (!%p3609_p4)
}
0x1174   : > { %3318 = dma.vmem_to_hbm [thread:$0]  (%p4498_p1), %s4357_s10, 128, %s4355_s24, %s2819_s18  }
0x1175 PF: > { %s4499_s29 = sld [smem:[#allocation17_spill]]  ;;  %s4500_s3 = sld [smem:[#allocation19_spill]] }
0x1176   : > { %p4502_p8 = scmp.ge.s32.totalorder %s3663_s30, 2 }
0x117b   : > { %s2844_s23 = sand.u32 1, %s4499_s29   ;;  %p4501_p0 = scmp.ne.s32.totalorder %s4500_s3, 0 }
0x117c   : > { %s2845_s4 = scalar_lea.sflag [#allocation4], %s2844_s23 }
0x117d   : > { %p3338_p6 = pnand %p4502_p8, %p4501_p0 }
0x117f   : > { %3646 = dma.done.wait (!%p3338_p6), %s2845_s4, 128  }
0x1180   : > { %3648 = vsyncadd (!%p3338_p6), %s2845_s4, 4294967168  ;;  %s4503_s12 = sld [smem:[#allocation18_spill]]  ;;  %s4504_s29 = sld [smem:[#allocation20_spill]] }
0x1181   : > { %p39_p10 = scmp.ge.s32.totalorder %s3945_s20, 4   ;;  %s4505_s3 = smov %s3655_s28 }
0x1182   : > { %s4507_s30 = smov %s3945_s20 }
0x1183   :  { %41 = sbr.rel (!%p39_p10) target bundleno = 26 (0x1a), region = 178 }
0x1186   : > { %s4506_s28 = smov %s4503_s12 }
0x118a   :  { %2850 = vsyncpa [#allocation3], 1 }
0x118b   :  { %2852 = vsyncpa [#allocation3 + $0x1], 1 }
0x118c   :  { %2853 = vsyncpa [#allocation6], 1 }
0x118d   :  { %2855 = vsyncpa [#allocation6 + $0x1], 1 }
0x118e   :  { %2856 = vsyncpa [#allocation9], 1 }
0x118f   :  { %2857 = vsyncpa [#allocation4], 1 }
0x1190   :  { %2859 = vsyncpa [#allocation4 + $0x1], 1 }

// kernel: tpu_custom_call.1
= control target key start
LH: loop header
LB: loop body
LE: loop exit
PB: predicated region body
PF: predicated region fallthrough
CT: control target
= control target key end

     0   :  { %s4400_s0 = inlined_call_operand.hbm [shape: f32[2,8,32], index: 0, kind: input, shape index: {}]   ;;  %s4401_s1 = inlined_call_operand.hbm [shape: f32[2,8,32], index: 1, kind: input, shape index: {}]   ;;  %s4402_s2 = inlined_call_operand.vmem [shape: f32[32,96], index: 2, kind: input, shape index: {}]   ;;  %s4403_s3 = inlined_call_operand.vmem [shape: f32[1,96], index: 3, kind: input, shape index: {}]   ;;  %s4404_s4 = inlined_call_operand.vmem [shape: f32[32,32], index: 4, kind: input, shape index: {}]   ;;  %s4405_s5 = inlined_call_operand.vmem [shape: f32[1,32], index: 5, kind: input, shape index: {}]   ;;  %s4406_s6 = inlined_call_operand.vmem [shape: f32[32,32], index: 6, kind: input, shape index: {}]   ;;  %s4407_s7 = inlined_call_operand.vmem [shape: f32[1,32], index: 7, kind: input, shape index: {}]   ;;  %s4408_s8 = inlined_call_operand.hbm [shape: f32[32,64], index: 8, kind: input, shape index: {}]   ;;  %s4409_s9 = inlined_call_operand.vmem [shape: f32[1,64], index: 9, kind: input, shape index: {}]   ;;  %s4410_s10 = inlined_call_operand.hbm [shape: f32[32,32], index: 10, kind: input, shape index: {}]   ;;  %s4411_s11 = inlined_call_operand.vmem [shape: f32[1,32], index: 11, kind: input, shape index: {}]   ;;  %s4412_s12 = inlined_call_operand.hbm [shape: f32[32,64], index: 12, kind: input, shape index: {}]   ;;  %s4413_s13 = inlined_call_operand.vmem [shape: f32[1,64], index: 13, kind: input, shape index: {}]   ;;  %s4414_s14 = inlined_call_operand.vmem [shape: f32[64,32], index: 14, kind: input, shape index: {}]   ;;  %s4415_s15 = inlined_call_operand.vmem [shape: f32[1,32], index: 15, kind: input, shape index: {}]   ;;  %s4416_s16 = inlined_call_operand.vmem [shape: f32[1,32], index: 16, kind: input, shape index: {}]   ;;  %s4417_s17 = inlined_call_operand.vmem [shape: f32[1,32], index: 17, kind: input, shape index: {}]   ;;  %s4418_s18 = inlined_call_operand.vmem [shape: f32[1,32], index: 18, kind: input, shape index: {}]   ;;  %s4419_s19 = inlined_call_operand.vmem [shape: f32[1,32], index: 19, kind: input, shape index: {}]   ;;  %s4420_s20 = inlined_call_operand.vmem [shape: f32[1,32], index: 20, kind: input, shape index: {}]   ;;  %s4421_s21 = inlined_call_operand.vmem [shape: f32[1,32], index: 21, kind: input, shape index: {}]   ;;  %s4422_s22 = inlined_call_operand.hbm [shape: f32[2,8,32], index: 22, kind: output, shape index: {}]  }
   0x1   :  { %4441 = sst [smem:[#allocation21_spill]] %s4400_s0 }
   0x2   :  { %4442 = sst [smem:[#allocation22_spill]] %s4401_s1 }
   0x3   :  { %4443 = sst [smem:[#allocation23_spill]] %s4402_s2 }
   0x4   :  { %4444 = sst [smem:[#allocation24_spill]] %s4403_s3 }
   0x5   :  { %4445 = sst [smem:[#allocation25_spill]] %s4404_s4 }
   0x6   :  { %4446 = sst [smem:[#allocation26_spill]] %s4405_s5 }
   0x7   :  { %4447 = sst [smem:[#allocation27_spill]] %s4406_s6 }
   0x8   :  { %4448 = sst [smem:[#allocation28_spill]] %s4408_s8 }
   0x9   :  { %4449 = sst [smem:[#allocation29_spill]] %s4410_s10 }
   0xa   :  { %4450 = sst [smem:[#allocation30_spill]] %s4412_s12 }
   0xb   :  { %4451 = sst [smem:[#allocation31_spill]] %s4413_s13 }
   0xc   :  { %4452 = sst [smem:[#allocation32_spill]] %s4415_s15 }
   0xd   :  { %4453 = sst [smem:[#allocation33_spill]] %s4418_s18 }
   0xe   :  { %4454 = sst [smem:[#allocation34_spill]] %s4419_s19 }
   0xf   :  { %4455 = sst [smem:[#allocation35_spill]] %s4420_s20 }
  0x10   :  { %4456 = sst [smem:[#allocation36_spill]] %s4421_s21 }
  0x11   :  { %4457 = sst [smem:[#allocation37_spill]] %s4422_s22 }
  0x12   :  { %27 = vsyncpa [#allocation3], 0 }
  0x13   :  { %29 = vsyncpa [#allocation3 + $0x1], 0 }
  0x14   :  { %30 = vsyncpa [#allocation6], 0 }
  0x15   :  { %32 = vsyncpa [#allocation6 + $0x1], 0 }
  0x16   :  { %33 = vsyncpa [#allocation9], 0 }
  0x17   :  { %34 = vsyncpa [#allocation4], 0 }
  0x18   :  { %36 = vsyncpa [#allocation4 + $0x1], 0  ;;  %s3805_s3 = smov 0   ;;  %s3807_s28 = smov 0  }
  0x19   :  { %s3809_s29 = smov 0   ;;  %s3811_s30 = smov 0  }
  0x1a LB: > { %4458 = sst [smem:[#allocation17_spill]] %s3651_s3  ;;  %s3826_s4 = sadd.s32 4294967295, %s3663_s30   ;;  %s3663_s30 = sphi %s3811_s30, %s4507_s30   ;;  %s3659_s29 = sphi %s3809_s29, %s4504_s29   ;;  %s3655_s28 = sphi %s3807_s28, %s4506_s28   ;;  %s3651_s3 = sphi %s3805_s3, %s4505_s3  }
  0x1b   : > { %4459 = sst [smem:[#allocation18_spill]] %s3659_s29  ;;  %s2953_s0 = sadd.s32 4294967294, %s3663_s30  }
  0x1c   : > { %p62_p0 = scmp.ne.s32.totalorder %s3655_s28, %s3651_s3  ;;  %p4431_p1 = scmp.eq.s32.totalorder %s3826_s4, 0 }
  0x1d   : > { %p538_p3 = scmp.eq.s32.totalorder %s2953_s0, 1  ;;  %p2954_p5 = scmp.ge.s32.totalorder %s3663_s30, 1 }
  0x1e   : > { %p3835_p4 = por %p4431_p1, %p62_p0  ;;  %p545_p7 = scmp.lt.s32.totalorder %s3663_s30, 3 }
  0x1f   : > { %p3840_p6 = por %p538_p3, %p62_p0  ;;  %s3665_s24 = smov [#allocation7]  }
  0x20   : > { %s4460_s23 = scalar_select %p3835_p4, 1, 0 }
  0x21   : > { %s4461_s1 = scalar_select %p3840_p6, 1, 0 }
  0x22   : > { %p3845_p8 = pnand %p2954_p5, %p545_p7  ;;  %s575_s6 = sshll.u32 %s3665_s24, 4  ;;  %s3849_s6 = int_to_ptr.vmem [resolvable:$true] %s575_s6 }
  0x23   : > { %4462 = sst [smem:[#allocation19_spill]] %s4461_s1  ;;  %s3666_s26 = smov [#allocation8]  }
  0x24   : > { %s4463_s5 = scalar_select %p3845_p8, 1, 0 }
  0x25   : > { %p3320_p9 = pneg %p3845_p8  ;;  %s591_s2 = sshll.u32 %s3666_s26, 4  ;;  %s3860_s2 = int_to_ptr.vmem [resolvable:$true] %s591_s2 }
  0x26   : > { %s3667_s27 = smov [#allocation10]   ;;  %s4465_s8 = sld [smem:[#allocation28_spill]] }
  0x27   : > { %p3856_p11 = pnand %p3320_p9, %p4431_p1  ;;  %s3862_s0 = sshll.u32 %s3667_s27, 4  ;;  %s608_s0 = int_to_ptr.vmem [resolvable:$true] %s3862_s0 }
  0x29   : > { %p3872_p13 = pneg %p3856_p11 }
  0x2c   : > { %s3441_s3 = scalar_lea.hbm %s4465_s8, 512 }
  0x2d   : > { %p3442_p12 = scmp.ne.s32.totalorder %s4465_s8, %s3441_s3  ;;  %p3448_p5 = scmp.lt.u32.totalorder %s3441_s3, %s4465_s8 }
  0x2f   : > { %p3444_p0 = pnand %p3872_p13, %p3442_p12 }
  0x31   : > { %p3445_p3 = pneg %p3444_p0 }
  0x33   : > { %p3450_p7 = pnand %p3448_p5, %p3445_p3 }
  0x35   : > { %3453 = shalt.err (!%p3450_p7)
}
  0x36   : > { %s3454_s21 = scalar_lea.vmem %s3849_s6, 512  ;;  %p3462_p2 = scmp.lt.s32.totalorder %s3849_s6, %s3849_s6 }
  0x37   : > { %p3455_p9 = scmp.ne.s32.totalorder %s3849_s6, %s3454_s21  ;;  %p3463_p6 = scmp.lt.s32.totalorder %s3454_s21, %s3454_s21 }
  0x39   : > { %p3457_p10 = pnand %p3455_p9, %p3872_p13  ;;  %p3464_p12 = por %p3463_p6, %p3462_p2 }
  0x3b   : > { %p3458_p1 = pneg %p3457_p10 }
  0x3d   : > { %p3465_p0 = pnand %p3464_p12, %p3458_p1 }
  0x3f   : > { %3468 = shalt.err (!%p3465_p0)
}
  0x40   : > { %s3668_s22 = smov 128   ;;  %s3669_s3 = smov 8  }
  0x41   : > { %3323 = dma.hbm_to_vmem [thread:$0]  (!%p3856_p11), %s4465_s8, 512, %s3849_s6, [#allocation6], %s3668_s22, %s3668_s22, %s3669_s3  }
  0x42   : > { %s4467_s10 = sld [smem:[#allocation29_spill]] }
  0x48   : > { %s3469_s21 = scalar_lea.hbm %s4467_s10, 512 }
  0x49   : > { %p3470_p1 = scmp.ne.s32.totalorder %s4467_s10, %s3469_s21  ;;  %p3476_p10 = scmp.lt.u32.totalorder %s3469_s21, %s4467_s10 }
  0x4b   : > { %p3472_p2 = pnand %p3470_p1, %p3872_p13 }
  0x4d   : > { %p3473_p6 = pneg %p3472_p2 }
  0x4f   : > { %p3478_p3 = pnand %p3476_p10, %p3473_p6 }
  0x51   : > { %3481 = shalt.err (!%p3478_p3)
}
  0x52   : > { %s3482_s6 = scalar_lea.vmem %s3860_s2, 512  ;;  %p3490_p12 = scmp.lt.s32.totalorder %s3860_s2, %s3860_s2 }
  0x53   : > { %p3483_p5 = scmp.ne.s32.totalorder %s3860_s2, %s3482_s6  ;;  %p3491_p0 = scmp.lt.s32.totalorder %s3482_s6, %s3482_s6 }
  0x55   : > { %p3485_p7 = pnand %p3483_p5, %p3872_p13  ;;  %p3492_p1 = por %p3491_p0, %p3490_p12 }
  0x57   : > { %p3486_p9 = pneg %p3485_p7 }
  0x59   : > { %p3493_p2 = pnand %p3492_p1, %p3486_p9 }
  0x5b   : > { %3496 = shalt.err (!%p3493_p2)
}
  0x5c   : > { %3326 = dma.hbm_to_vmem [thread:$0]  (!%p3856_p11), %s4467_s10, 512, %s3860_s2, [#allocation9], %s3668_s22, %s3668_s22, %s3669_s3  }
  0x5d   : > { %s4468_s12 = sld [smem:[#allocation30_spill]] }
  0x63   : > { %s3497_s1 = scalar_lea.hbm %s4468_s12, 512 }
  0x64   : > { %p3498_p6 = scmp.ne.s32.totalorder %s4468_s12, %s3497_s1  ;;  %p3504_p5 = scmp.lt.u32.totalorder %s3497_s1, %s4468_s12 }
  0x66   : > { %p3500_p10 = pnand %p3498_p6, %p3872_p13 }
  0x68   : > { %p3501_p3 = pneg %p3500_p10 }
  0x6a   : > { %p3506_p7 = pnand %p3504_p5, %p3501_p3 }
  0x6c   : > { %3509 = shalt.err (!%p3506_p7)
}
  0x6d   : > { %s3510_s6 = scalar_lea.vmem %s608_s0, 512  ;;  %p3518_p1 = scmp.lt.s32.totalorder %s608_s0, %s608_s0 }
  0x6e   : > { %p3511_p9 = scmp.ne.s32.totalorder %s608_s0, %s3510_s6  ;;  %p3519_p2 = scmp.lt.s32.totalorder %s3510_s6, %s3510_s6 }
  0x70   : > { %p3513_p12 = pnand %p3511_p9, %p3872_p13  ;;  %p3520_p4 = por %p3519_p2, %p3518_p1 }
  0x72   : > { %p3514_p0 = pneg %p3513_p12 }
  0x74   : > { %p3521_p8 = pnand %p3520_p4, %p3514_p0 }
  0x76   : > { %3524 = shalt.err (!%p3521_p8)
}
  0x77   : > { %3329 = dma.hbm_to_vmem [thread:$0]  (!%p3856_p11), %s4468_s12, 512, %s608_s0, [#allocation9], %s3668_s22, %s3668_s22, %s3669_s3  }
  0x78   : > { %s3945_s20 = sadd.s32 1, %s3663_s30   ;;  %s49_s15 = sadd.s32 1, %s3659_s29 }
  0x79   : > { %s46_s25 = ssub.s32 %s3663_s30, %s3945_s20  ;;  %p56_p8 = scmp.ne.s32.totalorder %s3659_s29, %s3655_s28 }
  0x7a   : > { %p47_p4 = scmp.eq.s32.totalorder %s46_s25, 0  ;;  %p57_p13 = scmp.eq.s32.totalorder %s3663_s30, 0 }
  0x7b   : > { %p3344_p6 = scmp.lt.s32.totalorder %s3663_s30, 2  ;;  %p4470_p3 = scmp.eq.s32.totalorder %s3826_s4, 1 }
  0x7c   : > { %s3955_s18 = scalar_select %p47_p4, %s3659_s29, %s49_s15  }
  0x7d   : > { %p58_p10 = por %p57_p13, %p56_p8  ;;  %p3959_p5 = por %p4470_p3, %p56_p8 }
  0x7e   : > { %4469 = sst [smem:[#allocation20_spill]] %s3955_s18  ;;  %s648_s1 = sand.u32 1, %s3659_s29  }
  0x7f   : > { %s4471_s19 = scalar_select %p3959_p5, 1, 0 }
  0x80   : > { %s2960_s24 = sshll.u32 %s3663_s30, 7  ;;  %s3965_s0 = sshll.u32 %s648_s1, 3 }
  0x81   : > { %s4472_s26 = sld [smem:[#allocation21_spill]]  ;;  %s652_s21 = scalar_lea.vmem [#allocation2], %s3965_s0 }
  0x82   : > { %s659_s6 = sshll.u32 %s652_s21, 4  ;;  %p3973_p11 = pnand %p3344_p6, %p58_p10  ;;  %s3977_s6 = int_to_ptr.vmem [resolvable:$true] %s659_s6 }
  0x83   : > { %s4474_s15 = sld [smem:[#allocation22_spill]]  ;;  %s649_s3 = scalar_lea.sflag [#allocation3], %s648_s1 }
  0x84   : > { %p3527_p9 = pneg %p3973_p11 }
  0x87   : > { %s3970_s27 = scalar_lea.hbm %s4472_s26, %s2960_s24  ;;  %s3530_s12 = scalar_lea.hbm %s4472_s26, 256 }
  0x88   : > { %s3525_s8 = scalar_lea.hbm %s3970_s27, 128  ;;  %p3531_p1 = scmp.lt.u32.totalorder %s3970_s27, %s4472_s26 }
  0x89   : > { %s3982_s22 = scalar_lea.hbm %s4474_s15, %s2960_s24  ;;  %p3526_p7 = scmp.ne.s32.totalorder %s3970_s27, %s3525_s8 }
  0x8a   : > { %p3532_p2 = scmp.lt.u32.totalorder %s3530_s12, %s3525_s8  ;;  %p3534_p8 = scmp.lt.u32.totalorder %s3525_s8, %s3970_s27 }
  0x8b   : > { %p3528_p12 = pnand %p3527_p9, %p3526_p7 }
  0x8c   : > { %p3533_p4 = por %p3532_p2, %p3531_p1 }
  0x8d   : > { %p3529_p0 = pneg %p3528_p12 }
  0x8e   : > { %p3535_p13 = por %p3534_p8, %p3533_p4 }
  0x90   : > { %p3536_p6 = pnand %p3535_p13, %p3529_p0 }
  0x92   : > { %3539 = shalt.err (!%p3536_p6)
}
  0x93   : > { %s3540_s1 = scalar_lea.vmem %s3977_s6, 128  ;;  %s3670_s10 = smov [#allocation2]  }
  0x94   : > { %p3541_p10 = scmp.ne.s32.totalorder %s3977_s6, %s3540_s1  ;;  %s3545_s24 = sshll.u32 %s3670_s10, 4  ;;  %s3546_s24 = int_to_ptr.vmem [resolvable:$false] %s3545_s24 }
  0x95   : > { %s3547_s29 = scalar_lea.vmem %s3546_s24, 256  ;;  %p3548_p12 = scmp.lt.s32.totalorder %s3977_s6, %s3546_s24 }
  0x96   : > { %p3543_p3 = pnand %p3541_p10, %p3527_p9  ;;  %p3549_p1 = scmp.lt.s32.totalorder %s3547_s29, %s3540_s1 }
  0x98   : > { %p3544_p7 = pneg %p3543_p3  ;;  %p3550_p2 = por %p3549_p1, %p3548_p12 }
  0x9a   : > { %p3551_p4 = pnand %p3550_p2, %p3544_p7 }
  0x9c   : > { %3554 = shalt.err (!%p3551_p4)
}
  0x9d   : > { %3333 = dma.hbm_to_vmem [thread:$0]  (!%p3973_p11), %s3970_s27, 128, %s3977_s6, %s649_s3  }
  0x9e   : > { %s666_s8 = sand.u32 1, %s3663_s30   ;;  %s670_s12 = scalar_lea.vmem [#allocation5], %s3965_s0 }
  0x9f   : > { %s677_s18 = sshll.u32 %s670_s12, 4  ;;  %s667_s13 = scalar_lea.sflag [#allocation6], %s666_s8  ;;  %s678_s18 = int_to_ptr.vmem [resolvable:$true] %s677_s18 }
  0xa0   : > { %s3555_s25 = scalar_lea.hbm %s3982_s22, 128  ;;  %s3560_s10 = scalar_lea.hbm %s4474_s15, 256 }
  0xa1   : > { %p3556_p0 = scmp.ne.s32.totalorder %s3982_s22, %s3555_s25  ;;  %p3561_p6 = scmp.lt.u32.totalorder %s3982_s22, %s4474_s15 }
  0xa2   : > { %p3562_p10 = scmp.lt.u32.totalorder %s3560_s10, %s3555_s25  ;;  %p3564_p7 = scmp.lt.u32.totalorder %s3555_s25, %s3982_s22 }
  0xa3   : > { %p3558_p8 = pnand %p3556_p0, %p3527_p9 }
  0xa4   : > { %p3563_p3 = por %p3562_p10, %p3561_p6 }
  0xa5   : > { %p3559_p13 = pneg %p3558_p8 }
  0xa6   : > { %p3565_p12 = por %p3564_p7, %p3563_p3 }
  0xa8   : > { %p3566_p1 = pnand %p3565_p12, %p3559_p13 }
  0xaa   : > { %3569 = shalt.err (!%p3566_p1)
}
  0xab   : > { %s3570_s0 = scalar_lea.vmem %s678_s18, 128  ;;  %s3671_s27 = smov [#allocation5]  }
  0xac   : > { %p3571_p2 = scmp.ne.s32.totalorder %s678_s18, %s3570_s0  ;;  %s3575_s6 = sshll.u32 %s3671_s27, 4  ;;  %s3576_s6 = int_to_ptr.vmem [resolvable:$false] %s3575_s6 }
  0xad   : > { %s3577_s3 = scalar_lea.vmem %s3576_s6, 256  ;;  %p3578_p8 = scmp.lt.s32.totalorder %s678_s18, %s3576_s6 }
  0xae   : > { %p3573_p4 = pnand %p3571_p2, %p3527_p9  ;;  %p3579_p5 = scmp.lt.s32.totalorder %s3577_s3, %s3570_s0 }
  0xb0   : > { %p3574_p0 = pneg %p3573_p4  ;;  %p3580_p6 = por %p3579_p5, %p3578_p8 }
  0xb2   : > { %p3581_p10 = pnand %p3580_p6, %p3574_p0 }
  0xb4   : > { %3584 = shalt.err (!%p3581_p10)
}
  0xb5   : > { %3336 = dma.hbm_to_vmem [thread:$0]  (!%p3973_p11), %s3982_s22, 128, %s678_s18, %s667_s13  }
  0xb6   : > { %p4475_p13 = scmp.ne.s32.totalorder %s4463_s5, 0 }
  0xb7   : > { %s4033_s8 = sand.u32 (!%p4475_p13), 1, %s3655_s28   ;;  %p4476_p5 = scmp.ne.s32.totalorder (!%p4475_p13), %s4460_s23, 0 }
  0xb8   : > { %686 = sbr.rel (%p4475_p13) target bundleno = 4469 (0x1175), region = 108  ;;  %s4036_s12 = sshll.u32 (!%p4475_p13), %s4033_s8, 3 }
  0xb9   : > { %s689_s25 = scalar_lea.sflag (!%p4475_p13), [#allocation3], %s4033_s8  ;;  %s692_s21 = scalar_lea.vmem (!%p4475_p13), [#allocation2], %s4036_s12 }
  0xbf   : > { %3630 = dma.done.wait (%p4476_p5), %s689_s25, 128  }
  0xc0   : > { %3632 = vsyncadd (%p4476_p5), %s689_s25, 4294967168  ;;  %s697_s5 = sand.u32 1, %s3826_s4   ;;  %s701_s22 = scalar_lea.vmem [#allocation5], %s4036_s12 }
  0xc1   : > { %s698_s2 = scalar_lea.sflag [#allocation6], %s697_s5 }
  0xc2   : > { %3634 = dma.done.wait (%p4476_p5), %s698_s2, 128  }
  0xc3   : > { %3636 = vsyncadd (%p4476_p5), %s698_s2, 4294967168  ;;  %p4477_p11 = scmp.eq.s32.totalorder %s3826_s4, 0 }
  0xc5   : > { %3638 = dma.done.wait (%p4477_p11), [#allocation6], 512   ;;  %p4478_p9 = pmov %p4477_p11 }
  0xc7   : > { %3640 = vsyncadd (%p4478_p9), [#allocation6], 4294966784  ;;  %p4479_p3 = pmov %p4478_p9 }
  0xc9   : > { %3642 = dma.done.wait (%p4479_p3), [#allocation9], 1024   ;;  %p4480_p7 = pmov %p4479_p3 }
  0xca   : > { %v3672_v0 = vmov 0.0|0.0   ;;  %vm3673_vm0 = vmmov 0   ;;  %v3674_v1 = vmov 0.0   ;;  %s4481_s13 = sld [smem:[#allocation23_spill]]  ;;  %v4077_v8 = vld [vmem:[%s692_s21] sm:$0xff]  ;;  %vm792_vm1 = vcmask 261120  }
  0xcb   : > { %3644 = vsyncadd (%p4480_p7), [#allocation9], 4294966272  ;;  %3254 = vmatprep.subr.bf16.mxu1 %v3672_v0  ;;  %3097 = vmatprep.mubr.msk.f32.mxu1 %vm3673_vm0, %v3674_v1  ;;  %s4482_s25 = sld [smem:[#allocation24_spill]]  ;;  %s3675_s5 = smov 120   ;;  %vm869_vm2 = vcmask 64512   ;;  %vm1539_vm3 = vcmask 130048  }
  0xcc   : > { %3110 = vmatprep.subr.mxu0 %v3674_v1  ;;  %3112 = vmatprep.mubr.msk.f32.mxu0 %vm3673_vm0, %v3674_v1  ;;  %s3676_s21 = smov 96   ;;  %s3677_s2 = smov 80   ;;  %vm1541_vm4 = vcmask 195584   ;;  %vm2713_vm5 = vcmask 523264  }
  0xcd   : > { %s4436_s23 = smov 88   ;;  %s4440_s18 = smov 72  }
  0xce   : > { %s3680_s1 = smov 112   ;;  %s3681_s10 = smov 104  }
  0xcf   : > { %s3682_s24 = smov 56   ;;  %s3683_s29 = smov 64  }
  0xd0   : > { %v781_v2 = vld [vmem:[%s4481_s13] sm:$0xff]  ;;  %v782_v3 = vld [vmem:[%s4481_s13 + $0x8] sm:$0xff]  ;;  %v783_v4 = vld [vmem:[%s4481_s13 + $0x10] sm:$0xff]  ;;  %s3684_s0 = smov 48   ;;  %s3685_s27 = smov 40  }
  0xd1   : > { %v3255_v5 = vpack.c.bf16 %v782_v3, %v781_v2  ;;  %v784_v6 = vld [vmem:[%s4481_s13 + $0x18] sm:$0xff]  ;;  %v2970_v9 = vld [vmem:[%s4482_s25] ss:$0 sm:$0xff]  ;;  %s4483_s25 = sld [smem:[#allocation25_spill]]  ;;  %s4484_s6 = sld [smem:[#allocation26_spill]] }
  0xd2   : > { %v3258_v7 = vpack.c.bf16 %v784_v6, %v783_v4  ;;  %p4498_p1 = scmp.ne.s32.totalorder %s4471_s19, 0 }
  0xd3   : > { %3256 = vmatpush3.bf16.msra.mxu1 %v3255_v5 }
  0xd4   : > { %3257 = vmatprep.subr.bf16.mxu1 %v3672_v0 }
  0xd7   : > { %3259 = vmatpush3.bf16.msra.mxu1 %v3258_v7  ;;  %v1543_v6 = vld [vmem:[%s4483_s25] sm:$0xff]  ;;  %v1544_v7 = vld [vmem:[%s4483_s25 + $0x8] sm:$0xff] }
  0xd8   : > { %3100 = vmatprep.subr.mxu1 %v3674_v1 }
  0xda   : > { %3098 = vmatmul.mubr.msk.f32.vlgmr.msra.gmra.mrb[0].mxu1 %vm792_vm1, %v4077_v8 }
  0xdb   : > { %3102 = vmatprep.mubr.msk.f32.mxu1 %vm3673_vm0, %v3674_v1 }
 0x1ad   : > { %v862_v10 = vpop.f32.mrb[0].mxu1 }
 0x1ae   : > { %v4087_v11 = vadd.f32 %v2970_v9, %v862_v10  ;;  %v3099_v12 = vpop.f32.mrb[1].mxu1  ;;  %v3261_v9 = vpack.c.bf16 %v1544_v7, %v1543_v6 }
 0x1b0   : > { %1031 = vrot.lane.b32.xlu1 %v4087_v11, %s3675_s5  ;;  %867 = vrot.lane.b32.xlu0 %v4087_v11, %s3676_s21 }
 0x1b4   : > { %1198 = vrot.lane.b32.xlu1 %v4087_v11, %s3677_s2  ;;  %1033 = vrot.lane.b32.xlu0 %v4087_v11, %s4436_s23 }
 0x1b8   : > { %1363 = vrot.lane.b32.xlu1 %v4087_v11, %s4440_s18  ;;  %1196 = vrot.lane.b32.xlu0 %v4087_v11, %s3680_s1  ;;  %s2819_s18 = scalar_lea.sflag [#allocation4], %s4033_s8 }
 0x1bc   : > { %1361 = vrot.lane.b32.xlu0 %v4087_v11, %s3681_s10 }
 0x222   : > { %v1032_v13 = vpop.permute.xlu1 %1031  ;;  %v868_v14 = vpop.permute.xlu0 %867 }
 0x223   : > { %3101 = vmatpush3.xpose.msk.msra.mxu1 %vm869_vm2, %v868_v14  ;;  %v1545_v14 = vld [vmem:[%s4483_s25 + $0x10] sm:$0xff] }
 0x224   : > { %3105 = vmatprep.subr.mxu1 %v3674_v1 }
 0x226   : > { %3103 = vmatmul.mubr.msk.f32.vlgmr.msra.gmra.mrb[2].mxu1 %vm869_vm2, %v4087_v11  ;;  %v1034_v15 = vpop.permute.xlu0 %1033  ;;  %v1199_v16 = vpop.permute.xlu1 %1198 }
 0x227   : > { %3111 = vmatpush3.xpose.msk.msra.mxu0 %vm869_vm2, %v1034_v15  ;;  %3107 = vmatprep.mubr.msk.f32.mxu1 %vm3673_vm0, %v3674_v1  ;;  %v1546_v15 = vld [vmem:[%s4483_s25 + $0x18] sm:$0xff] }
 0x228   : > { %3120 = vmatprep.subr.mxu0 %v3674_v1 }
 0x22a   : > { %3113 = vmatmul.mubr.msk.f32.vlgmr.msra.gmra.mrb[0].mxu0 %vm869_vm2, %v1032_v13  ;;  %v1197_v17 = vpop.permute.xlu0 %1196  ;;  %v1364_v18 = vpop.permute.xlu1 %1363 }
 0x22b   : > { %3121 = vmatpush3.xpose.msk.msra.mxu0 %vm869_vm2, %v1199_v16  ;;  %3122 = vmatprep.mubr.msk.f32.mxu0 %vm3673_vm0, %v3674_v1  ;;  %v3264_v16 = vpack.c.bf16 %v1546_v15, %v1545_v14 }
 0x22c   : > { %3130 = vmatprep.subr.mxu0 %v3674_v1 }
 0x22e   : > { %3123 = vmatmul.mubr.msk.f32.vlgmr.msra.gmra.mrb[2].mxu0 %vm869_vm2, %v1197_v17  ;;  %v1362_v19 = vpop.permute.xlu0 %1361 }
 0x22f   : > { %3131 = vmatpush3.xpose.msk.msra.mxu0 %vm869_vm2, %v1364_v18  ;;  %3132 = vmatprep.mubr.msk.f32.mxu0 %vm3673_vm0, %v3674_v1 }
 0x230   : > { %3260 = vmatprep.subr.bf16.mxu0 %v3672_v0 }
 0x232   : > { %3133 = vmatmul.mubr.msk.f32.vlgmr.msra.gmra.mrb[4].mxu0 %vm869_vm2, %v1362_v19 }
 0x233   : > { %3148 = vmatprep.mubr.msk.f32.mxu0 %vm3673_vm0, %v3674_v1  ;;  %3262 = vmatpush3.bf16.msra.mxu0 %v3261_v9 }
 0x234   : > { %3263 = vmatprep.subr.bf16.mxu0 %v3672_v0 }
 0x237   : > { %3265 = vmatpush3.bf16.msra.mxu0 %v3264_v16 }
 0x238   : > { %3272 = vmatprep.subr.bf16.mxu0 %v3672_v0 }
 0x2f9   : > { %v940_v20 = vpop.f32.mrb[2].mxu1 }
 0x2fa   : > { %v3104_v21 = vpop.f32.mrb[3].mxu1  ;;  %v944_v22 = vsel %vm869_vm2, %v940_v20, -inf }
 0x2fb   : > { %945 = vmax.xlane.f32.xlu1 %v944_v22 }
 0x2fd   : > { %v1105_v23 = vpop.f32.mrb[0].mxu0 }
 0x2fe   : > { %v3114_v24 = vpop.f32.mrb[1].mxu0  ;;  %v1109_v25 = vsel %vm869_vm2, %v1105_v23, -inf }
 0x2ff   : > { %1110 = vmax.xlane.f32.xlu0 %v1109_v25 }
 0x301   : > { %v1270_v26 = vpop.f32.mrb[2].mxu0 }
 0x302   : > { %v3124_v27 = vpop.f32.mrb[3].mxu0  ;;  %v1274_v28 = vsel %vm869_vm2, %v1270_v26, -inf }
 0x303   : > { %1275 = vmax.xlane.f32.xlu0 %v1274_v28  ;;  %v2984_v27 = vld [vmem:[%s4484_s6] ss:$0 sm:$0xff]  ;;  %s4492_s6 = sld [smem:[#allocation34_spill]] }
 0x305   : > { %v1435_v29 = vpop.f32.mrb[4].mxu0 }
 0x306   : > { %v3134_v30 = vpop.f32.mrb[5].mxu0  ;;  %v1439_v31 = vsel %vm869_vm2, %v1435_v29, -inf }
 0x307   : > { %1440 = vmax.xlane.f32.xlu1 %v1439_v31 }
 0x318   : > { %1120 = vrot.lane.b32.xlu1 %v4087_v11, %s3682_s24  ;;  %s4438_s24 = smov 16  }
 0x388   : > { %v946_v32 = vpop.xlane.xlu1 %945 }
 0x389   : > { %v947_v33 = vsub.f32 %v940_v20, %v946_v32 }
 0x38b   : > { %v948_v34 = vmul.f32 1.442695, %v947_v33 }
 0x38c   : > { %v1111_v35 = vpop.xlane.xlu0 %1110 }
 0x38d   : > { %3403 = vpow2.f32 %v948_v34  ;;  %v1112_v36 = vsub.f32 %v1105_v23, %v1111_v35 }
 0x38f   : > { %v1113_v37 = vmul.f32 1.442695, %v1112_v36 }
 0x390   : > { %v1276_v47 = vpop.xlane.xlu0 %1275 }
 0x391   : > { %3405 = vpow2.f32 %v1113_v37  ;;  %v1277_v48 = vsub.f32 %v1270_v26, %v1276_v47 }
 0x393   : > { %v1278_v49 = vmul.f32 1.442695, %v1277_v48 }
 0x394   : > { %v1441_v38 = vpop.xlane.xlu1 %1440 }
 0x395   : > { %v1442_v39 = vsub.f32 %v1435_v29, %v1441_v38  ;;  %v1742_v38 = vld [vmem:[#allocation7] sm:$0xff] }
 0x397   : > { %v3404_v40 = vpop.eup %3403  ;;  %v1443_v41 = vmul.f32 1.442695, %v1442_v39  ;;  %v1743_v39 = vld [vmem:[#allocation7 + $0x8] sm:$0xff] }
 0x398   : > { %v950_v42 = vsel %vm869_vm2, %v3404_v40, 0.0  ;;  %v1121_v52 = vpop.permute.xlu1 %1120 }
 0x399   : > { %3407 = vpow2.f32 %v1443_v41  ;;  %951 = vadd.xlane.f32.xlu0 %v950_v42  ;;  %v1744_v41 = vld [vmem:[#allocation7 + $0x10] sm:$0xff]  ;;  %v1745_v42 = vld [vmem:[#allocation7 + $0x18] sm:$0xff] }
 0x39a   : > { %3409 = vpow2.f32 %v1278_v49 }
 0x39b   : > { %v3406_v43 = vpop.eup %3405 }
 0x39c   : > { %v1115_v44 = vsel %vm869_vm2, %v3406_v43, 0.0 }
 0x39d   : > { %1116 = vadd.xlane.f32.xlu1 %v1115_v44 }
 0x3a3   : > { %v3408_v45 = vpop.eup %3407 }
 0x3a4   : > { %v1445_v46 = vsel %vm869_vm2, %v3408_v45, 0.0  ;;  %v3410_v50 = vpop.eup %3409 }
 0x3a5   : > { %1446 = vadd.xlane.f32.xlu1 %v1445_v46  ;;  %v1280_v51 = vsel %vm869_vm2, %v3410_v50, 0.0 }
 0x3af   : > { %955 = vrot.lane.b32.xlu0 %v4087_v11, %s3683_s29  ;;  %s4437_s29 = smov 24  }
 0x3b6   : > { %1285 = vrot.lane.b32.xlu1 %v4087_v11, %s3684_s0  ;;  %s4439_s0 = smov 8  }
 0x3ce   : > { %1281 = vadd.xlane.f32.xlu0 %v1280_v51 }
 0x3e4   : > { %1450 = vrot.lane.b32.xlu0 %v4087_v11, %s3685_s27  ;;  %s4485_s27 = sld [smem:[#allocation27_spill]] }
 0x3ea   : > { %v1658_v44 = vld [vmem:[%s4485_s27] sm:$0xff]  ;;  %v1660_v47 = vld [vmem:[%s4485_s27 + $0x10] sm:$0xff]  ;;  %v1661_v48 = vld [vmem:[%s4485_s27 + $0x18] sm:$0xff] }
 0x3eb   : > { %v3270_v49 = vpack.c.bf16 %v1661_v48, %v1660_v47 }
 0x426   : > { %v952_v53 = vpop.xlane.xlu0 %951 }
 0x427   : > { %3411 = vrcp.f32 %v952_v53 }
 0x42a   : > { %v956_v54 = vpop.permute.xlu0 %955  ;;  %v1117_v55 = vpop.xlane.xlu1 %1116 }
 0x42b   : > { %3413 = vrcp.f32 %v1117_v55  ;;  %3106 = vmatpush3.msra.mxu1 %v956_v54  ;;  %v2986_v54 = vld [vmem:[%s4416_s16] ss:$0 sm:$0xff] }
 0x42c   : > { %3115 = vmatprep.subr.mxu1 %v3674_v1 }
 0x431   : > { %v3412_v56 = vpop.eup %3411 }
 0x432   : > { %v954_v57 = vmul.f32 %v3412_v56, %v3404_v40  ;;  %v1447_v58 = vpop.xlane.xlu1 %1446  ;;  %v3273_v40 = vpack.c.bf16 %v1743_v39, %v1742_v38  ;;  %v2987_v56 = vld [vmem:[%s4417_s17] ss:$0 sm:$0xff] }
 0x434   : > { %3108 = vmatmul.mubr.msk.f32.vlgmr.msra.gmra.mrb[4].mxu1 %vm869_vm2, %v954_v57 }
 0x435   : > { %v3414_v59 = vpop.eup %3413  ;;  %3116 = vmatpush3.msra.mxu1 %v1121_v52  ;;  %3117 = vmatprep.mubr.msk.f32.mxu1 %vm3673_vm0, %v3674_v1 }
 0x436   : > { %v1119_v60 = vmul.f32 %v3414_v59, %v3406_v43  ;;  %v1286_v61 = vpop.permute.xlu1 %1285  ;;  %3125 = vmatprep.subr.mxu1 %v3674_v1  ;;  %v780_v43 = vld [vmem:[%s701_s22] sm:$0xff]  ;;  %v2990_v59 = vld [vmem:[%s4409_s9] ss:$0 sm:$0xff] }
 0x438   : > { %3118 = vmatmul.mubr.msk.f32.vlgmr.msra.gmra.mrb[6].mxu1 %vm869_vm2, %v1119_v60 }
 0x439   : > { %3126 = vmatpush3.msra.mxu1 %v1286_v61  ;;  %3127 = vmatprep.mubr.msk.f32.mxu1 %vm3673_vm0, %v3674_v1 }
 0x43a   : > { %3135 = vmatprep.subr.mxu1 %v3674_v1 }
 0x45b   : > { %v1282_v62 = vpop.xlane.xlu0 %1281 }
 0x45c   : > { %3415 = vrcp.f32 %v1282_v62 }
 0x45d   : > { %3417 = vrcp.f32 %v1447_v58 }
 0x45f   : > { %v1451_v4 = vpop.permute.xlu0 %1450 }
 0x466   : > { %v3416_v63 = vpop.eup %3415 }
 0x467   : > { %v1284_v2 = vmul.f32 %v3416_v63, %v3410_v50  ;;  %v3418_v3 = vpop.eup %3417 }
 0x468   : > { %v1449_v5 = vmul.f32 %v3418_v3, %v3408_v45  ;;  %v1659_v45 = vld [vmem:[%s4485_s27 + $0x8] sm:$0xff] }
 0x469   : > { %3128 = vmatmul.mubr.msk.f32.vlgmr.msra.gmra.mrb[8].mxu1 %vm869_vm2, %v1284_v2  ;;  %v3267_v46 = vpack.c.bf16 %v1659_v45, %v1658_v44  ;;  %v2988_v2 = vld [vmem:[%s4407_s7] ss:$0 sm:$0xff] }
 0x46a   : > { %3136 = vmatpush3.msra.mxu1 %v1451_v4  ;;  %3137 = vmatprep.mubr.msk.f32.mxu1 %vm3673_vm0, %v3674_v1 }
 0x46b   : > { %3266 = vmatprep.subr.bf16.mxu1 %v3672_v0 }
 0x46d   : > { %3138 = vmatmul.mubr.msk.f32.vlgmr.msra.gmra.mrb[10].mxu1 %vm869_vm2, %v1449_v5 }
 0x46e   : > { %3159 = vmatprep.mubr.msk.f32.mxu1 %vm3673_vm0, %v3674_v1  ;;  %3268 = vmatpush3.bf16.msra.mxu1 %v3267_v46 }
 0x46f   : > { %3269 = vmatprep.subr.bf16.mxu1 %v3672_v0 }
 0x472   : > { %3271 = vmatpush3.bf16.msra.mxu1 %v3270_v49 }
 0x473   : > { %3173 = vmatprep.subr.mxu1 %v3674_v1 }
 0x507   : > { %v1027_v10 = vpop.f32.mrb[4].mxu1 }
 0x508   : > { %v3109_v11 = vpop.f32.mrb[5].mxu1 }
 0x50b   : > { %v1192_v12 = vpop.f32.mrb[6].mxu1 }
 0x50c   : > { %1527 = vrot.lane.b32.xlu1 %v1192_v12, %s4439_s0  ;;  %v3119_v13 = vpop.f32.mrb[7].mxu1  ;;  %s4497_s0 = sld [smem:[#allocation37_spill]] }
 0x53c   : > { %v1357_v17 = vpop.f32.mrb[8].mxu1 }
 0x53d   : > { %1531 = vrot.lane.b32.xlu0 %v1357_v17, %s4438_s24  ;;  %v3129_v18 = vpop.f32.mrb[9].mxu1  ;;  %s4491_s24 = sld [smem:[#allocation33_spill]] }
 0x540   : > { %v1522_v19 = vpop.f32.mrb[10].mxu1 }
 0x541   : > { %1535 = vrot.lane.b32.xlu1 %v1522_v19, %s4437_s29  ;;  %v3139_v20 = vpop.f32.mrb[11].mxu1  ;;  %s4493_s29 = sld [smem:[#allocation31_spill]] }
 0x57e   : > { %v1528_v21 = vpop.permute.xlu1 %1527 }
 0x57f   : > { %v1538_v23 = vsel %vm869_vm2, %v1027_v10, %v1528_v21 }
 0x5af   : > { %v1532_v22 = vpop.permute.xlu0 %1531 }
 0x5b0   : > { %v1540_v24 = vsel %vm1539_vm3, %v1538_v23, %v1532_v22 }
 0x5b3   : > { %v1536_v25 = vpop.permute.xlu1 %1535 }
 0x5b4   : > { %v1542_v26 = vsel %vm1541_vm4, %v1540_v24, %v1536_v25 }
 0x5b5   : > { %3149 = vmatmul.mubr.msk.f32.vlgmr.msra.gmra.mrb[6].mxu0 %vm792_vm1, %v1542_v26 }
 0x5b6   : > { %3170 = vmatprep.mubr.msk.f32.mxu0 %vm3673_vm0, %v3674_v1  ;;  %3274 = vmatpush3.bf16.msra.mxu0 %v3273_v40 }
 0x5b7   : > { %3275 = vmatprep.subr.bf16.mxu0 %v3672_v0 }
 0x688   : > { %v1623_v28 = vpop.f32.mrb[6].mxu0 }
 0x689   : > { %v1624_v29 = vadd.f32 %v2984_v27, %v1623_v28  ;;  %v3150_v30 = vpop.f32.mrb[7].mxu0 }
 0x68b   : > { %v1627_v31 = vadd.f32 %v1624_v29, %v4077_v8  ;;  %v3276_v8 = vpack.c.bf16 %v1745_v42, %v1744_v41 }
 0x68d   : > { %v1628_v32 = vsel %vm792_vm1, %v1627_v31, 0.0  ;;  %3277 = vmatpush3.bf16.msra.mxu0 %v3276_v8 }
 0x68e   : > { %1629 = vadd.xlane.f32.xlu0 %v1628_v32  ;;  %3183 = vmatprep.subr.mxu0 %v3674_v1 }
 0x690   : > { %3171 = vmatmul.mubr.msk.f32.vlgmr.msra.gmra.mrb[8].mxu0 %vm792_vm1, %v780_v43 }
 0x691   : > { %3185 = vmatprep.mubr.msk.f32.mxu0 %vm3673_vm0, %v3674_v1 }
 0x71b   : > { %v1630_v33 = vpop.xlane.xlu0 %1629 }
 0x71c   : > { %v1632_v34 = vmul.f32 0.03125, %v1630_v33 }
 0x71e   : > { %v1633_v35 = vsub.f32 %v1627_v31, %v1632_v34 }
 0x720   : > { %v1634_v36 = vmul.f32 %v1633_v35, %v1633_v35 }
 0x722   : > { %v1635_v37 = vsel %vm792_vm1, %v1634_v36, 0.0 }
 0x723   : > { %1636 = vadd.xlane.f32.xlu1 %v1635_v37 }
 0x763   : > { %v1822_v60 = vpop.f32.mrb[8].mxu0 }
 0x764   : > { %v4217_v61 = vadd.f32 %v2990_v59, %v1822_v60  ;;  %v3172_v62 = vpop.f32.mrb[9].mxu0 }
 0x765   : > { %v2499_v62 = vld [vmem:[#allocation8] sm:$0xff] }
 0x766   : > { %1991 = vrot.lane.b32.xlu0 %v4217_v61, %s3675_s5 }
 0x76a   : > { %2156 = vrot.lane.b32.xlu0 %v4217_v61, %s3680_s1 }
 0x76e   : > { %2321 = vrot.lane.b32.xlu0 %v4217_v61, %s3681_s10 }
 0x7b0   : > { %v1637_v50 = vpop.xlane.xlu1 %1636 }
 0x7b1   : > { %v1638_v51 = vmul.f32 0.03125, %v1637_v50 }
 0x7b3   : > { %v1639_v52 = vadd.f32 1e-05, %v1638_v51 }
 0x7b5   : > { %3419 = vrsqrt.f32 %v1639_v52 }
 0x7bf   : > { %v3420_v53 = vpop.eup %3419 }
 0x7c0   : > { %v1641_v55 = vmul.f32 %v3420_v53, %v1633_v35 }
 0x7c2   : > { %v1649_v57 = vmul.f32 %v2986_v54, %v1641_v55 }
 0x7c4   : > { %v4208_v58 = vadd.f32 %v2987_v56, %v1649_v57 }
 0x7c6   : > { %3160 = vmatmul.mubr.msk.f32.vlgmr.msra.gmra.mrb[12].mxu1 %vm792_vm1, %v4208_v58 }
 0x7c7   : > { %3175 = vmatprep.mubr.msk.f32.mxu1 %vm3673_vm0, %v3674_v1  ;;  %3174 = vmatpush3.xpose.msk.msra.mxu1 %vm869_vm2, %v4217_v61 }
 0x7c8   : > { %3178 = vmatprep.subr.mxu1 %v3674_v1 }
 0x7d8   : > { %v1992_v63 = vpop.permute.xlu0 %1991 }
 0x7d9   : > { %3184 = vmatpush3.xpose.msk.msra.mxu0 %vm869_vm2, %v1992_v63  ;;  %v2500_v63 = vld [vmem:[#allocation8 + $0x8] sm:$0xff] }
 0x7da   : > { %3193 = vmatprep.subr.mxu0 %v3674_v1 }
 0x7dc   : > { %v2157_v6 = vpop.permute.xlu0 %2156 }
 0x7e0   : > { %v2322_v10 = vpop.permute.xlu0 %2321 }
 0x899   : > { %v1738_v3 = vpop.f32.mrb[12].mxu1 }
 0x89a   : > { %v1739_v4 = vadd.f32 %v2988_v2, %v1738_v3  ;;  %v3161_v5 = vpop.f32.mrb[13].mxu1  ;;  %v3279_v2 = vpack.c.bf16 %v2500_v63, %v2499_v62  ;;  %v2501_v3 = vld [vmem:[#allocation8 + $0x10] sm:$0xff] }
 0x89c   : > { %1989 = vrot.lane.b32.xlu1 %v1739_v4, %s3675_s5  ;;  %3176 = vmatmul.mubr.msk.f32.vlgmr.msra.gmra.mrb[14].mxu1 %vm869_vm2, %v1739_v4  ;;  %s4486_s5 = smov 72  }
 0x89d   : > { %3180 = vmatprep.mubr.msk.f32.mxu1 %vm3673_vm0, %v3674_v1 }
 0x8a0   : > { %2154 = vrot.lane.b32.xlu1 %v1739_v4, %s3680_s1  ;;  %s4489_s1 = smov 16  }
 0x8a4   : > { %2319 = vrot.lane.b32.xlu1 %v1739_v4, %s3681_s10  ;;  %v2502_v4 = vld [vmem:[#allocation8 + $0x18] sm:$0xff]  ;;  %s4490_s10 = smov 24  }
 0x8a5   : > { %v3282_v5 = vpack.c.bf16 %v2502_v4, %v2501_v3 }
 0x90e   : > { %v1990_v7 = vpop.permute.xlu1 %1989 }
 0x90f   : > { %3186 = vmatmul.mubr.msk.f32.vlgmr.msra.gmra.mrb[10].mxu0 %vm869_vm2, %v1990_v7 }
 0x910   : > { %3194 = vmatpush3.xpose.msk.msra.mxu0 %vm869_vm2, %v2157_v6  ;;  %3195 = vmatprep.mubr.msk.f32.mxu0 %vm3673_vm0, %v3674_v1 }
 0x911   : > { %3203 = vmatprep.subr.mxu0 %v3674_v1 }
 0x912   : > { %v2155_v9 = vpop.permute.xlu1 %2154 }
 0x913   : > { %3196 = vmatmul.mubr.msk.f32.vlgmr.msra.gmra.mrb[12].mxu0 %vm869_vm2, %v2155_v9 }
 0x914   : > { %3204 = vmatpush3.xpose.msk.msra.mxu0 %vm869_vm2, %v2322_v10  ;;  %3205 = vmatprep.mubr.msk.f32.mxu0 %vm3673_vm0, %v3674_v1 }
 0x915   : > { %3278 = vmatprep.subr.bf16.mxu0 %v3672_v0 }
 0x916   : > { %v2320_v11 = vpop.permute.xlu1 %2319 }
 0x917   : > { %3206 = vmatmul.mubr.msk.f32.vlgmr.msra.gmra.mrb[14].mxu0 %vm869_vm2, %v2320_v11 }
 0x918   : > { %3221 = vmatprep.mubr.msk.f32.mxu0 %vm3673_vm0, %v3674_v1  ;;  %3280 = vmatpush3.bf16.msra.mxu0 %v3279_v2 }
 0x919   : > { %3281 = vmatprep.subr.bf16.mxu0 %v3672_v0 }
 0x91c   : > { %3283 = vmatpush3.bf16.msra.mxu0 %v3282_v5 }
 0x91d   : > { %3290 = vmatprep.subr.bf16.mxu0 %v3672_v0 }
 0x96f   : > { %v1898_v12 = vpop.f32.mrb[14].mxu1 }
 0x970   : > { %v3177_v13 = vpop.f32.mrb[15].mxu1  ;;  %v1902_v14 = vsel %vm869_vm2, %v1898_v12, -inf }
 0x971   : > { %1903 = vmax.xlane.f32.xlu0 %v1902_v14 }
 0x9e2   : > { %v2063_v15 = vpop.f32.mrb[10].mxu0 }
 0x9e3   : > { %v3187_v16 = vpop.f32.mrb[11].mxu0  ;;  %v2067_v17 = vsel %vm869_vm2, %v2063_v15, -inf }
 0x9e4   : > { %2068 = vmax.xlane.f32.xlu1 %v2067_v17 }
 0x9e6   : > { %v2228_v18 = vpop.f32.mrb[12].mxu0 }
 0x9e7   : > { %v3197_v19 = vpop.f32.mrb[13].mxu0  ;;  %v2232_v20 = vsel %vm869_vm2, %v2228_v18, -inf }
 0x9e8   : > { %2233 = vmax.xlane.f32.xlu0 %v2232_v20  ;;  %v3004_v19 = vld [vmem:[%s4411_s11] ss:$0 sm:$0xff] }
 0x9ea   : > { %v2393_v21 = vpop.f32.mrb[14].mxu0 }
 0x9eb   : > { %v3207_v22 = vpop.f32.mrb[15].mxu0  ;;  %v2397_v23 = vsel %vm869_vm2, %v2393_v21, -inf }
 0x9ec   : > { %2398 = vmax.xlane.f32.xlu0 %v2397_v23 }
 0x9f5   : > { %1913 = vrot.lane.b32.xlu1 %v4217_v61, %s3676_s21  ;;  %s4487_s21 = smov 88  }
 0x9fe   : > { %v1904_v24 = vpop.xlane.xlu0 %1903 }
 0x9ff   : > { %v1905_v25 = vsub.f32 %v1898_v12, %v1904_v24 }
 0xa01   : > { %v1906_v26 = vmul.f32 1.442695, %v1905_v25 }
 0xa03   : > { %3421 = vpow2.f32 %v1906_v26 }
 0xa0d   : > { %v3422_v27 = vpop.eup %3421 }
 0xa0e   : > { %v1908_v28 = vsel %vm869_vm2, %v3422_v27, 0.0 }
 0xa19   : > { %1909 = vadd.xlane.f32.xlu1 %v1908_v28 }
 0xa71   : > { %v2069_v29 = vpop.xlane.xlu1 %2068 }
 0xa72   : > { %v2070_v30 = vsub.f32 %v2063_v15, %v2069_v29 }
 0xa74   : > { %v2071_v31 = vmul.f32 1.442695, %v2070_v30  ;;  %v2614_v30 = vld [vmem:[#allocation10 + $0x8] sm:$0xff] }
 0xa75   : > { %v1914_v32 = vpop.permute.xlu1 %1913  ;;  %v2234_v33 = vpop.xlane.xlu0 %2233 }
 0xa76   : > { %3423 = vpow2.f32 %v2071_v31  ;;  %v2235_v34 = vsub.f32 %v2228_v18, %v2234_v33  ;;  %3179 = vmatpush3.msra.mxu1 %v1914_v32  ;;  %v2615_v32 = vld [vmem:[#allocation10 + $0x10] sm:$0xff]  ;;  %v2616_v33 = vld [vmem:[#allocation10 + $0x18] sm:$0xff] }
 0xa77   : > { %3188 = vmatprep.subr.mxu1 %v3674_v1 }
 0xa78   : > { %v2236_v35 = vmul.f32 1.442695, %v2235_v34  ;;  %v3288_v34 = vpack.c.bf16 %v2616_v33, %v2615_v32 }
 0xa79   : > { %v2399_v36 = vpop.xlane.xlu0 %2398 }
 0xa7a   : > { %3425 = vpow2.f32 %v2236_v35  ;;  %v2400_v37 = vsub.f32 %v2393_v21, %v2399_v36  ;;  %v2699_v35 = vld [vmem:[%s4414_s14 + $0x8] sm:$0xff]  ;;  %v2700_v36 = vld [vmem:[%s4414_s14 + $0x10] sm:$0xff] }
 0xa7c   : > { %v2401_v38 = vmul.f32 1.442695, %v2400_v37 }
 0xa7e   : > { %3427 = vpow2.f32 %v2401_v38  ;;  %v2701_v38 = vld [vmem:[%s4414_s14 + $0x18] sm:$0xff] }
 0xa80   : > { %v3424_v39 = vpop.eup %3423 }
 0xa81   : > { %v2073_v40 = vsel %vm869_vm2, %v3424_v39, 0.0 }
 0xa82   : > { %2074 = vadd.xlane.f32.xlu0 %v2073_v40  ;;  %v2702_v40 = vld [vmem:[%s4414_s14 + $0x20] sm:$0xff] }
 0xa84   : > { %v3426_v41 = vpop.eup %3425 }
 0xa85   : > { %v2238_v42 = vsel %vm869_vm2, %v3426_v41, 0.0 }
 0xa86   : > { %2239 = vadd.xlane.f32.xlu1 %v2238_v42 }
 0xa88   : > { %v3428_v8 = vpop.eup %3427 }
 0xa89   : > { %v2403_v43 = vsel %vm869_vm2, %v3428_v8, 0.0 }
 0xa8a   : > { %2404 = vadd.xlane.f32.xlu0 %v2403_v43 }
 0xa97   : > { %2243 = vrot.lane.b32.xlu1 %v4217_v61, %s3677_s2  ;;  %s4488_s2 = smov 8  }
 0xa9b   : > { %2408 = vrot.lane.b32.xlu1 %v4217_v61, %s4486_s5 }
 0xaa0   : > { %2078 = vrot.lane.b32.xlu0 %v4217_v61, %s4487_s21  ;;  %s4496_s21 = sld [smem:[#allocation36_spill]] }
 0xaa6   : > { %v1910_v44 = vpop.xlane.xlu1 %1909 }
 0xaa7   : > { %3429 = vrcp.f32 %v1910_v44 }
 0xab1   : > { %v3430_v45 = vpop.eup %3429 }
 0xab2   : > { %v1912_v46 = vmul.f32 %v3430_v45, %v3422_v27 }
 0xab4   : > { %3181 = vmatmul.mubr.msk.f32.vlgmr.msra.gmra.mrb[16].mxu1 %vm869_vm2, %v1912_v46  ;;  %v3006_v46 = vld [vmem:[%s4491_s24] ss:$0 sm:$0xff]  ;;  %s4494_s24 = sld [smem:[#allocation32_spill]] }
 0xab5   : > { %3190 = vmatprep.mubr.msk.f32.mxu1 %vm3673_vm0, %v3674_v1 }
 0xb0f   : > { %v2075_v47 = vpop.xlane.xlu0 %2074 }
 0xb10   : > { %3431 = vrcp.f32 %v2075_v47 }
 0xb13   : > { %v2240_v48 = vpop.xlane.xlu1 %2239 }
 0xb14   : > { %3433 = vrcp.f32 %v2240_v48  ;;  %v3007_v48 = vld [vmem:[%s4492_s6] ss:$0 sm:$0xff]  ;;  %s4495_s6 = sld [smem:[#allocation35_spill]] }
 0xb17   : > { %v2405_v49 = vpop.xlane.xlu0 %2404  ;;  %v2244_v52 = vpop.permute.xlu1 %2243 }
 0xb18   : > { %3435 = vrcp.f32 %v2405_v49 }
 0xb1a   : > { %v3432_v50 = vpop.eup %3431 }
 0xb1b   : > { %v2077_v51 = vmul.f32 %v3432_v50, %v3424_v39  ;;  %v2079_v53 = vpop.permute.xlu0 %2078  ;;  %v2409_v56 = vpop.permute.xlu1 %2408  ;;  %v3294_v39 = vpack.c.bf16 %v2701_v38, %v2700_v36 }
 0xb1c   : > { %3189 = vmatpush3.msra.mxu1 %v2079_v53  ;;  %v3008_v53 = vld [vmem:[%s4493_s29] ss:$0 sm:$0xff] }
 0xb1d   : > { %3191 = vmatmul.mubr.msk.f32.vlgmr.msra.gmra.mrb[18].mxu1 %vm869_vm2, %v2077_v51  ;;  %3198 = vmatprep.subr.mxu1 %v3674_v1  ;;  %v2705_v51 = vld [vmem:[%s4414_s14 + $0x38] sm:$0xff] }
 0xb1e   : > { %v3434_v54 = vpop.eup %3433  ;;  %3199 = vmatpush3.msra.mxu1 %v2244_v52  ;;  %3200 = vmatprep.mubr.msk.f32.mxu1 %vm3673_vm0, %v3674_v1 }
 0xb1f   : > { %v2242_v55 = vmul.f32 %v3434_v54, %v3426_v41  ;;  %3208 = vmatprep.subr.mxu1 %v3674_v1  ;;  %v2703_v41 = vld [vmem:[%s4414_s14 + $0x28] sm:$0xff] }
 0xb20   : > { %v3297_v42 = vpack.c.bf16 %v2703_v41, %v2702_v40 }
 0xb21   : > { %3201 = vmatmul.mubr.msk.f32.vlgmr.msra.gmra.mrb[20].mxu1 %vm869_vm2, %v2242_v55 }
 0xb22   : > { %v3436_v57 = vpop.eup %3435  ;;  %3209 = vmatpush3.msra.mxu1 %v2409_v56  ;;  %3210 = vmatprep.mubr.msk.f32.mxu1 %vm3673_vm0, %v3674_v1 }
 0xb23   : > { %v2407_v59 = vmul.f32 %v3436_v57, %v3428_v8  ;;  %3284 = vmatprep.subr.bf16.mxu1 %v3672_v0 }
 0xb25   : > { %3211 = vmatmul.mubr.msk.f32.vlgmr.msra.gmra.mrb[22].mxu1 %vm869_vm2, %v2407_v59  ;;  %v3010_v59 = vld [vmem:[%s4494_s24] ss:$0 sm:$0xff] }
 0xb26   : > { %3232 = vmatprep.mubr.msk.f32.mxu1 %vm3673_vm0, %v3674_v1 }
 0xb87   : > { %v1985_v60 = vpop.f32.mrb[16].mxu1 }
 0xb88   : > { %v3182_v61 = vpop.f32.mrb[17].mxu1 }
 0xbf0   : > { %v2150_v6 = vpop.f32.mrb[18].mxu1 }
 0xbf1   : > { %2485 = vrot.lane.b32.xlu0 %v2150_v6, %s4488_s2  ;;  %v3192_v7 = vpop.f32.mrb[19].mxu1  ;;  %s3015_s2 = sshll.u32 %s3826_s4, 7  ;;  %s3689_s4 = smov [#allocation11]  }
 0xbf2   : > { %s4355_s24 = scalar_lea.hbm %s4497_s0, %s3015_s2 }
 0xbf4   : > { %v2315_v9 = vpop.f32.mrb[20].mxu1 }
 0xbf5   : > { %2489 = vrot.lane.b32.xlu1 %v2315_v9, %s4489_s1  ;;  %v3202_v10 = vpop.f32.mrb[21].mxu1  ;;  %s778_s1 = scalar_lea.vmem [#allocation11], %s4036_s12  ;;  %s3589_s12 = sshll.u32 %s3689_s4, 4  ;;  %s3590_s12 = int_to_ptr.vmem [resolvable:$false] %s3589_s12 }
 0xbf8   : > { %v2480_v11 = vpop.f32.mrb[22].mxu1 }
 0xbf9   : > { %2493 = vrot.lane.b32.xlu0 %v2480_v11, %s4490_s10  ;;  %v3212_v12 = vpop.f32.mrb[23].mxu1  ;;  %s2832_s10 = sshll.u32 %s778_s1, 4  ;;  %s4357_s10 = int_to_ptr.vmem [resolvable:$true] %s2832_s10 }
 0xbfa   : > { %s3585_s23 = scalar_lea.vmem %s4357_s10, 128  ;;  %p3592_p0 = scmp.lt.s32.totalorder %s4357_s10, %s3590_s12 }
 0xbfb   : > { %p3586_p12 = scmp.ne.s32.totalorder %s4357_s10, %s3585_s23 }
 0xbfd   : > { %p3587_p2 = pnand %p3586_p12, %p4498_p1 }
 0xbff   : > { %p3588_p4 = pneg %p3587_p2 }
 0xc63   : > { %v2486_v13 = vpop.permute.xlu0 %2485 }
 0xc64   : > { %v2496_v15 = vsel %vm869_vm2, %v1985_v60, %v2486_v13  ;;  %v3012_v13 = vld [vmem:[%s4495_s6] ss:$0 sm:$0xff]  ;;  %s3591_s6 = scalar_lea.vmem %s3590_s12, 256 }
 0xc65   : > { %p3593_p8 = scmp.lt.s32.totalorder %s3591_s6, %s3585_s23 }
 0xc67   : > { %v2490_v14 = vpop.permute.xlu1 %2489  ;;  %p3594_p6 = por %p3593_p8, %p3592_p0 }
 0xc68   : > { %v2497_v16 = vsel %vm1539_vm3, %v2496_v15, %v2490_v14  ;;  %v3013_v15 = vld [vmem:[%s4496_s21] ss:$0 sm:$0xff] }
 0xc69   : > { %p3595_p10 = pnand %p3594_p6, %p3588_p4 }
 0xc6b   : > { %v2494_v17 = vpop.permute.xlu0 %2493 }
 0xc6c   : > { %v2498_v18 = vsel %vm1541_vm4, %v2497_v16, %v2494_v17 }
 0xc6d   : > { %3222 = vmatmul.mubr.msk.f32.vlgmr.msra.gmra.mrb[16].mxu0 %vm792_vm1, %v2498_v18 }
 0xc6e   : > { %3251 = vmatprep.mubr.msk.f32.mxu0 %vm3673_vm0, %v3674_v1  ;;  %v2613_v1 = vld [vmem:[#allocation10] sm:$0xff] }
 0xc6f   : > { %v3285_v31 = vpack.c.bf16 %v2614_v30, %v2613_v1 }
 0xc71   : > { %3286 = vmatpush3.bf16.msra.mxu1 %v3285_v31 }
 0xc72   : > { %3287 = vmatprep.subr.bf16.mxu1 %v3672_v0 }
 0xc75   : > { %3289 = vmatpush3.bf16.msra.mxu1 %v3288_v34 }
 0xd40   : > { %v2579_v20 = vpop.f32.mrb[16].mxu0 }
 0xd41   : > { %v2580_v21 = vadd.f32 %v3004_v19, %v2579_v20  ;;  %v3223_v22 = vpop.f32.mrb[17].mxu0 }
 0xd43   : > { %v2583_v23 = vadd.f32 %v2580_v21, %v4208_v58  ;;  %v2698_v58 = vld [vmem:[%s4414_s14] sm:$0xff] }
 0xd44   : > { %v3291_v37 = vpack.c.bf16 %v2699_v35, %v2698_v58 }
 0xd45   : > { %v2584_v24 = vsel %vm792_vm1, %v2583_v23, 0.0 }
 0xd46   : > { %2585 = vadd.xlane.f32.xlu1 %v2584_v24  ;;  %3292 = vmatpush3.bf16.msra.mxu0 %v3291_v37 }
 0xd47   : > { %3293 = vmatprep.subr.bf16.mxu0 %v3672_v0 }
 0xd4a   : > { %3295 = vmatpush3.bf16.msra.mxu0 %v3294_v39 }
 0xd4b   : > { %3296 = vmatprep.subr.bf16.mxu0 %v3672_v0 }
 0xd4e   : > { %3298 = vmatpush3.bf16.msra.mxu0 %v3297_v42 }
 0xd4f   : > { %3299 = vmatprep.subr.bf16.mxu0 %v3672_v0  ;;  %v2704_v0 = vld [vmem:[%s4414_s14 + $0x30] sm:$0xff] }
 0xd50   : > { %v3300_v52 = vpack.c.bf16 %v2705_v51, %v2704_v0 }
 0xd52   : > { %3301 = vmatpush3.bf16.msra.mxu0 %v3300_v52 }
 0xdd3   : > { %v2586_v25 = vpop.xlane.xlu1 %2585 }
 0xdd4   : > { %v2587_v26 = vmul.f32 0.03125, %v2586_v25 }
 0xdd6   : > { %v2588_v27 = vsub.f32 %v2583_v23, %v2587_v26 }
 0xdd8   : > { %v2589_v28 = vmul.f32 %v2588_v27, %v2588_v27 }
 0xdda   : > { %v2590_v29 = vsel %vm792_vm1, %v2589_v28, 0.0 }
 0xddb   : > { %2591 = vadd.xlane.f32.xlu0 %v2590_v29 }
 0xe68   : > { %v2592_v8 = vpop.xlane.xlu0 %2591 }
 0xe69   : > { %v2593_v43 = vmul.f32 0.03125, %v2592_v8 }
 0xe6b   : > { %v2594_v44 = vadd.f32 1e-05, %v2593_v43 }
 0xe6d   : > { %3437 = vrsqrt.f32 %v2594_v44 }
 0xe77   : > { %v3438_v45 = vpop.eup %3437 }
 0xe78   : > { %v2596_v47 = vmul.f32 %v3438_v45, %v2588_v27 }
 0xe7a   : > { %v2604_v49 = vmul.f32 %v3006_v46, %v2596_v47 }
 0xe7c   : > { %v2612_v50 = vadd.f32 %v3007_v48, %v2604_v49 }
 0xe7e   : > { %3233 = vmatmul.mubr.msk.f32.vlgmr.msra.gmra.mrb[24].mxu1 %vm792_vm1, %v2612_v50 }
 0xf51   : > { %v2693_v54 = vpop.f32.mrb[24].mxu1 }
 0xf52   : > { %v2694_v55 = vadd.f32 %v3008_v53, %v2693_v54  ;;  %v3234_v56 = vpop.f32.mrb[25].mxu1 }
 0xf54   : > { %v2697_v57 = vmax.f32 %v2694_v55, 0.0 }
 0xf56   : > { %3252 = vmatmul.mubr.msk.f32.vlgmr.msra.gmra.mrb[18].mxu0 %vm2713_vm5, %v2697_v57 }
0x1029   : > { %v2783_v60 = vpop.f32.mrb[18].mxu0 }
0x102a   : > { %v2784_v61 = vadd.f32 %v3010_v59, %v2783_v60  ;;  %v3253_v62 = vpop.f32.mrb[19].mxu0 }
0x102c   : > { %v2787_v63 = vadd.f32 %v2784_v61, %v2612_v50 }
0x102e   : > { %v2788_v2 = vsel %vm792_vm1, %v2787_v63, 0.0 }
0x102f   : > { %2789 = vadd.xlane.f32.xlu0 %v2788_v2 }
0x10bc   : > { %v2790_v3 = vpop.xlane.xlu0 %2789 }
0x10bd   : > { %v2791_v4 = vmul.f32 0.03125, %v2790_v3 }
0x10bf   : > { %v2792_v5 = vsub.f32 %v2787_v63, %v2791_v4 }
0x10c1   : > { %v2793_v6 = vmul.f32 %v2792_v5, %v2792_v5 }
0x10c3   : > { %v2794_v7 = vsel %vm792_vm1, %v2793_v6, 0.0 }
0x10c4   : > { %2795 = vadd.xlane.f32.xlu1 %v2794_v7 }
0x1151   : > { %v2796_v9 = vpop.xlane.xlu1 %2795 }
0x1152   : > { %v2797_v10 = vmul.f32 0.03125, %v2796_v9 }
0x1154   : > { %v2798_v11 = vadd.f32 1e-05, %v2797_v10 }
0x1156   : > { %3439 = vrsqrt.f32 %v2798_v11 }
0x1160   : > { %v3440_v12 = vpop.eup %3439 }
0x1161   : > { %v2800_v14 = vmul.f32 %v3440_v12, %v2792_v5 }
0x1163   : > { %v2808_v16 = vmul.f32 %v3012_v13, %v2800_v14 }
0x1165   : > { %v2816_v17 = vadd.f32 %v3013_v15, %v2808_v16 }
0x1167   : > { %2817 = vst.msk [vmem:[%s778_s1] sm:$0xff] %vm792_vm1, %v2816_v17 }
0x1168   : > { %3598 = shalt.err (!%p3595_p10)
}
0x1169   : > { %s3599_s8 = scalar_lea.hbm %s4355_s24, 128  ;;  %s3603_s21 = scalar_lea.hbm %s4497_s0, 256 }
0x116a   : > { %p3600_p13 = scmp.ne.s32.totalorder %s4355_s24, %s3599_s8  ;;  %p3604_p9 = scmp.lt.u32.totalorder %s4355_s24, %s4497_s0 }
0x116b   : > { %p3605_p3 = scmp.lt.u32.totalorder %s3603_s21, %s3599_s8  ;;  %p3607_p12 = scmp.lt.u32.totalorder %s3599_s8, %s4355_s24 }
0x116c   : > { %p3601_p5 = pnand %p3600_p13, %p4498_p1 }
0x116d   : > { %p3606_p7 = por %p3605_p3, %p3604_p9 }
0x116e   : > { %p3602_p11 = pneg %p3601_p5 }
0x116f   : > { %p3608_p2 = por %p3607_p12, %p3606_p7 }
0x1171   : > { %p3609_p4 = pnand %p3608_p2, %p3602_p11 }
0x1173   : > { %3612 = shalt.err (!%p3609_p4)
}
0x1174   : > { %3318 = dma.vmem_to_hbm [thread:$0]  (%p4498_p1), %s4357_s10, 128, %s4355_s24, %s2819_s18  }
0x1175 PF: > { %s4499_s29 = sld [smem:[#allocation17_spill]]  ;;  %s4500_s3 = sld [smem:[#allocation19_spill]] }
0x1176   : > { %p4502_p8 = scmp.ge.s32.totalorder %s3663_s30, 2 }
0x117b   : > { %s2844_s23 = sand.u32 1, %s4499_s29   ;;  %p4501_p0 = scmp.ne.s32.totalorder %s4500_s3, 0 }
0x117c   : > { %s2845_s4 = scalar_lea.sflag [#allocation4], %s2844_s23 }
0x117d   : > { %p3338_p6 = pnand %p4502_p8, %p4501_p0 }
0x117f   : > { %3646 = dma.done.wait (!%p3338_p6), %s2845_s4, 128  }
0x1180   : > { %3648 = vsyncadd (!%p3338_p6), %s2845_s4, 4294967168  ;;  %s4503_s12 = sld [smem:[#allocation18_spill]]  ;;  %s4504_s29 = sld [smem:[#allocation20_spill]] }
0x1181   : > { %p39_p10 = scmp.ge.s32.totalorder %s3945_s20, 4   ;;  %s4505_s3 = smov %s3655_s28 }
0x1182   : > { %s4507_s30 = smov %s3945_s20 }
0x1183   :  { %41 = sbr.rel (!%p39_p10) target bundleno = 26 (0x1a), region = 178 }
0x1186   : > { %s4506_s28 = smov %s4503_s12 }
0x118a   :  { %2850 = vsyncpa [#allocation3], 1 }
0x118b   :  { %2852 = vsyncpa [#allocation3 + $0x1], 1 }
0x118c   :  { %2853 = vsyncpa [#allocation6], 1 }
0x118d   :  { %2855 = vsyncpa [#allocation6 + $0x1], 1 }
0x118e   :  { %2856 = vsyncpa [#allocation9], 1 }
0x118f   :  { %2857 = vsyncpa [#allocation4], 1 }
0x1190   :  { %2859 = vsyncpa [#allocation4 + $0x1], 1 }

</bundles_post_ra>
